<compile_context>
chip_gen: v6e
topology: v6e:2x2x1
jax: 0.10.0
libtpu: 0.0.40
codegen_flags: <defaults>
</compile_context>

<pallas_src>
from functools import partial

import numpy as np
import jax
import jax.numpy as jnp
from jax import lax
from jax.experimental import pallas as pl
from jax.experimental.pallas import tpu as pltpu

SQRT_HALF = float(np.sqrt(0.5))


# ----------------------------- Pallas kernel --------------------------------

def converter_kernel(x_ref, spk_ref, wc_ref, bc_ref, wp_ref, bp_ref, o_ref,
                     xpad_ref, *, t_total, tile_t, t_buf, halo_l, lead, tail,
                     h, k_size, n_layers, sharpening):
    """One (batch, time-tile) grid step of the fused Converter forward.

    x_ref:    (1, 1, t_buf, h)   haloed, zero-padded input tile (f32)
    spk_ref:  (1, L, h)          per-layer speaker bias = softsign(Linear(spk)) (f32)
    wc_ref:   (L, K, h, 2h)      conv weights (bf16, resident)
    bc_ref:   (L, 2h)            conv biases (f32)
    wp_ref:   (h, D)             linear-spec projection weight (bf16, resident)
    bp_ref:   (1, D)             linear-spec projection bias (f32)
    o_ref:    (1, tile_t, D)     output linear spectrogram tile
    xpad_ref: (lead+t_buf+tail, h) f32 scratch: zero-padded running activation
    """
    pad = (k_size - 1) // 2
    t_idx = pl.program_id(1)

    # Refresh only the tiny zero-pad rows around the live region (they provide
    # each layer's conv zero padding); the live region is fully rewritten below.
    xpad_ref[0:lead, :] = jnp.zeros((lead, h), jnp.float32)
    xpad_ref[lead + t_buf:lead + t_buf + tail, :] = jnp.zeros((tail, h), jnp.float32)

    # Bring the (tile + halo) input into the live region (sublane-aligned, row 8).
    xpad_ref[lead:lead + t_buf, :] = x_ref[0, 0]

    # Rows outside the real sequence must stay exactly zero at every layer so
    # the per-layer ZeroPad1d at the true sequence boundaries is reproduced.
    g0 = t_idx * tile_t - halo_l
    rows = lax.broadcasted_iota(jnp.int32, (t_buf, 1), 0) + g0
    mask = jnp.logical_and(rows >= 0, rows < t_total).astype(jnp.float32)

    spk_all = spk_ref[0]                     # (L, h)
    bc_all = bc_ref[...]                     # (L, 2h)

    x_last = None
    # Small static unroll (L is small here).
    # TODO(synk): for deep converters (L >~ 6) switch to lax.fori_loop with
    # dynamic wc_ref[l] indexing to bound vreg live ranges / code size.
    for l in range(n_layers):
        acc = None
        x_old = None
        for j in range(k_size):              # K per-tap MXU dots (no im2col buffer)
            r0 = lead - pad + j
            tap = xpad_ref[r0:r0 + t_buf, :]                    # (t_buf, h) f32
            if j == pad:
                x_old = tap                                      # residual (f32)
            d = jnp.dot(tap.astype(jnp.bfloat16), wc_ref[l, j],
                        preferred_element_type=jnp.float32)      # (t_buf, 2h) f32
            acc = d if acc is None else acc + d
        acc = acc + bc_all[l:l + 1, :]
        values = acc[:, :h]
        gates = acc[:, h:]
        x_new = ((values + spk_all[l:l + 1, :]) * jax.nn.sigmoid(gates)
                 + x_old) * SQRT_HALF
        if l + 1 < n_layers:
            # Single aligned full-tile write-back; out-of-range rows forced to 0.
            xpad_ref[lead:lead + t_buf, :] = x_new * mask
        else:
            x_last = x_new

    # Linear-spec projection + clamp + sharpening, interior tile rows only.
    xf = x_last[halo_l:halo_l + tile_t, :]                       # (tile_t, h)
    y = jnp.dot(xf.astype(jnp.bfloat16), wp_ref[...],
                preferred_element_type=jnp.float32) + bp_ref[...]
    y = jnp.maximum(y, 1e-7)
    # y ** s for y > 0 via exp/log on the EUP (avoids lax.pow lowering).
    o_ref[0] = jnp.exp(sharpening * jnp.log(y)).astype(o_ref.dtype)


# ----------------------------- pallas_call wrapper ---------------------------

def converter_forward_pallas(decoder_out, spk_emb, params, *, sharpening,
                             tile_t=256):
    B, T, H = decoder_out.shape
    conv_w, conv_b = params["conv_w"], params["conv_b"]     # (L,K,H,2H), (L,2H)
    spk_w, spk_b = params["spk_w"], params["spk_b"]         # (L,S,H),   (L,H)
    proj_w, proj_b = params["proj_w"], params["proj_b"]     # (H,D),     (D,)
    L, K = int(conv_w.shape[0]), int(conv_w.shape[1])
    D = int(proj_w.shape[1])
    pad = (K - 1) // 2
    assert K % 2 == 1 and L >= 1

    # ---- time tiling: bounded VMEM, DMA/compute pipelining, megacore-friendly.
    TILE_T = int(min(tile_t, T))
    if TILE_T < T:                       # multi-tile => sublane-aligned tile size
        TILE_T = max(8, (TILE_T // 8) * 8)
    NT = -(-T // TILE_T)
    T_pad = NT * TILE_T

    HALO_L = L * pad                     # receptive-field halo of the conv stack
    T_buf = TILE_T + 2 * L * pad
    T_buf = -(-T_buf // 8) * 8           # sublane-aligned working length
    HALO_R = T_buf - TILE_T - HALO_L
    LEAD, TAIL = 8, 8                    # permanent zero rows around live region
    assert pad <= LEAD and pad <= TAIL, "kernel_size too large for LEAD/TAIL pad"

    # ---- lane-dense output: pad linear-spec dim to a multiple of 128 lanes.
    D_pad = -(-D // 128) * 128
    if D_pad != D:
        proj_w = jnp.pad(proj_w, ((0, 0), (0, D_pad - D)))
        proj_b = jnp.pad(proj_b, ((0, D_pad - D),))

    # ---- tiny per-call XLA glue: per-layer speaker bias softsign(Linear(spk)).
    spk_bias = jax.nn.soft_sign(
        jnp.einsum("bs,lsh->blh", spk_emb, spk_w) + spk_b[None, :, :])  # (B,L,H)

    # Haloed, zero-padded time tiles (B, NT, T_buf, H): each tile carries the
    # L*pad halo so the kernel never needs cross-tile reads.
    xp = jnp.pad(decoder_out, ((0, 0), (HALO_L, HALO_R + (T_pad - T)), (0, 0)))
    idx = (jnp.arange(NT) * TILE_T)[:, None] + jnp.arange(T_buf)[None, :]
    x_tiles = xp[:, idx, :]                                              # (B,NT,T_buf,H)

    # One-time weight prep: bf16 at the MXU boundary (elementwise math stays f32).
    wc = conv_w.astype(jnp.bfloat16)          # (L, K, H, 2H) -> per-tap dots
    wp = proj_w.astype(jnp.bfloat16)          # (H, D_pad)
    bp = proj_b.reshape(1, D_pad)

    kern = partial(converter_kernel, t_total=T, tile_t=TILE_T, t_buf=T_buf,
                   halo_l=HALO_L, lead=LEAD, tail=TAIL, h=H, k_size=K,
                   n_layers=L, sharpening=sharpening)

    def build(single_buffer_weights):
        # Constant-index weight blocks are fetched once; single-buffer them to
        # halve their VMEM footprint (matters most under v7x's 64 MiB VMEM).
        wkw = dict(pipeline_mode=pl.Buffered(1)) if single_buffer_weights else {}
        return pl.pallas_call(
            kern,
            out_shape=jax.ShapeDtypeStruct((B, T_pad, D_pad), decoder_out.dtype),
            grid=(B, NT),
            in_specs=[
                pl.BlockSpec((1, 1, T_buf, H), lambda b, t: (b, t, 0, 0)),   # x tile
                pl.BlockSpec((1, L, H), lambda b, t: (b, 0, 0)),             # spk bias
                pl.BlockSpec((L, K, H, 2 * H), lambda b, t: (0, 0, 0, 0), **wkw),
                pl.BlockSpec((L, 2 * H), lambda b, t: (0, 0), **wkw),
                pl.BlockSpec((H, D_pad), lambda b, t: (0, 0), **wkw),
                pl.BlockSpec((1, D_pad), lambda b, t: (0, 0), **wkw),
            ],
            out_specs=pl.BlockSpec((1, TILE_T, D_pad), lambda b, t: (b, t, 0)),
            scratch_shapes=[pltpu.VMEM((LEAD + T_buf + TAIL, H), jnp.float32)],
            compiler_params=pltpu.CompilerParams(
                dimension_semantics=("parallel", "parallel"),
                vmem_limit_bytes=64 * 1024 * 1024),
        )

    args = (x_tiles, spk_bias, wc, conv_b, wp, bp)
    try:
        out = jax.block_until_ready(build(True)(*args))
    except Exception:
        # Fallback for jax versions without pipeline_mode / Buffered(1) support.
        out = build(False)(*args)
    return out[:, :T, :D]


# ----------------------------- pure-JAX reference ----------------------------

def converter_forward_ref(decoder_out, spk_emb, params, *, sharpening):
    x = decoder_out
    B, T, H = x.shape
    conv_w, conv_b = params["conv_w"], params["conv_b"]
    spk_w, spk_b = params["spk_w"], params["spk_b"]
    L, K = conv_w.shape[0], conv_w.shape[1]
    pad = (K - 1) // 2
    for l in range(L):
        sb = jax.nn.soft_sign(spk_emb @ spk_w[l] + spk_b[l])          # (B, H)
        xp = jnp.pad(x, ((0, 0), (pad, pad), (0, 0)))
        acc = jnp.zeros((B, T, 2 * H), jnp.float32)
        for j in range(K):
            acc = acc + jnp.einsum("bti,io->bto", xp[:, j:j + T, :], conv_w[l, j])
        acc = acc + conv_b[l]
        values, gates = acc[..., :H], acc[..., H:]
        x = ((values + sb[:, None, :]) * jax.nn.sigmoid(gates) + x) * SQRT_HALF
    y = x @ params["proj_w"] + params["proj_b"]
    y = jnp.maximum(y, 1e-7)
    return y ** sharpening


# ----------------------------- parameter init --------------------------------

def init_params(key, spk_dim, H, D, L, K):
    k = jax.random.split(key, 6)
    return dict(
        conv_w=0.05 * jax.random.normal(k[0], (L, K, H, 2 * H), jnp.float32),
        conv_b=0.1 * jax.random.normal(k[1], (L, 2 * H), jnp.float32),
        spk_w=0.1 * jax.random.normal(k[2], (L, spk_dim, H), jnp.float32),
        spk_b=jnp.zeros((L, H), jnp.float32),
        proj_w=0.05 * jax.random.normal(k[3], (H, D), jnp.float32),
        proj_b=0.1 * jax.random.normal(k[4], (D,), jnp.float32),
    )


# ----------------------------------- main ------------------------------------

if __name__ == "__main__":
    B, T, H = 2, 56, 128          # batch, decoder steps (NOT a tile multiple), hidden
    SPK_DIM = 16                  # speaker embedding dim
    D_LIN = 128                   # linear_spec_dim (lane-dense)
    N_LAYERS, K = 3, 5            # n_conv_layers, kernel_size (odd)
    SHARPEN = 1.4                 # sharpening_factor
    TILE_T = 32                   # 2 time tiles -> exercises halo + boundary mask

    root = jax.random.PRNGKey(0)
    k_p, k_x, k_s = jax.random.split(root, 3)
    params = init_params(k_p, SPK_DIM, H, D_LIN, N_LAYERS, K)

    decoder_out = 0.5 * jax.random.normal(k_x, (B, T, H), jnp.float32)
    spk_emb = 0.5 * jax.random.normal(k_s, (B, SPK_DIM), jnp.float32)

    out = converter_forward_pallas(decoder_out, spk_emb, params,
                                   sharpening=SHARPEN, tile_t=TILE_T)
    out = jax.block_until_ready(out)

    ref = converter_forward_ref(decoder_out, spk_emb, params, sharpening=SHARPEN)
    ref = jax.block_until_ready(ref)

    np.testing.assert_allclose(np.asarray(out), np.asarray(ref), rtol=3e-2, atol=3e-2)
    assert out.shape == (B, T, D_LIN)
    print("KERNEL_OK")
</pallas_src>

<mosaic_0001>
module attributes {stable_mosaic.version = 11 : i64} {
  func.func @converter_kernel(%arg0: i32, %arg1: i32, %arg2: memref<1x1x48x128xf32, #tpu.memory_space<vmem>>, %arg3: memref<1x3x128xf32, #tpu.memory_space<vmem>>, %arg4: memref<3x5x128x256xbf16, #tpu.memory_space<vmem>>, %arg5: memref<3x256xf32, #tpu.memory_space<vmem>>, %arg6: memref<128x128xbf16, #tpu.memory_space<vmem>>, %arg7: memref<1x128xf32, #tpu.memory_space<vmem>>, %arg8: memref<1x32x128xf32, #tpu.memory_space<vmem>>, %arg9: memref<64x128xf32, #tpu.memory_space<vmem>>) attributes {dimension_semantics = [#tpu.dimension_semantics<parallel>, #tpu.dimension_semantics<parallel>], iteration_bounds = array<i64: 2, 2>, scalar_prefetch = 0 : i64, scratch_operands = 1 : i64, tpu.core_type = #tpu.core_type<tc>, window_params = [{transform_indices = @transform_0, window_bounds = array<i64: 1, 1, 48, 128>}, {transform_indices = @transform_1, window_bounds = array<i64: 1, 3, 128>}, {pipeline_mode = #tpu.pipeline_mode<synchronous>, transform_indices = @transform_2, window_bounds = array<i64: 3, 5, 128, 256>}, {pipeline_mode = #tpu.pipeline_mode<synchronous>, transform_indices = @transform_3, window_bounds = array<i64: 3, 256>}, {pipeline_mode = #tpu.pipeline_mode<synchronous>, transform_indices = @transform_4, window_bounds = array<i64: 128, 128>}, {pipeline_mode = #tpu.pipeline_mode<synchronous>, transform_indices = @transform_5, window_bounds = array<i64: 1, 128>}, {transform_indices = @transform_6, window_bounds = array<i64: 1, 32, 128>}]} {
    %cst = arith.constant 0.000000e+00 : f32
    %0 = vector.broadcast %cst : f32 to vector<8x128xf32>
    %c0 = arith.constant 0 : index
    %c0_0 = arith.constant 0 : index
    %1 = vector.load %arg9[%c0, %c0_0] : memref<64x128xf32, #tpu.memory_space<vmem>>, vector<8x128xf32>
    tpu.vector_store %arg9[%c0, %c0_0], %0 {strides = array<i32>} : memref<64x128xf32, #tpu.memory_space<vmem>>, vector<8x128xf32>,
    %cst_1 = arith.constant 0.000000e+00 : f32
    %2 = vector.broadcast %cst_1 : f32 to vector<8x128xf32>
    %c56 = arith.constant 56 : index
    %c0_2 = arith.constant 0 : index
    %3 = vector.load %arg9[%c56, %c0_2] : memref<64x128xf32, #tpu.memory_space<vmem>>, vector<8x128xf32>
    tpu.vector_store %arg9[%c56, %c0_2], %2 {strides = array<i32>} : memref<64x128xf32, #tpu.memory_space<vmem>>, vector<8x128xf32>,
    %c0_3 = arith.constant 0 : index
    %c0_4 = arith.constant 0 : index
    %c0_5 = arith.constant 0 : index
    %c0_6 = arith.constant 0 : index
    %4 = vector.load %arg2[%c0_3, %c0_4, %c0_5, %c0_6] : memref<1x1x48x128xf32, #tpu.memory_space<vmem>>, vector<1x1x48x128xf32>
    %5 = vector.shape_cast %4 : vector<1x1x48x128xf32> to vector<48x128xf32>
    %c8 = arith.constant 8 : index
    %c0_7 = arith.constant 0 : index
    %6 = vector.load %arg9[%c8, %c0_7] : memref<64x128xf32, #tpu.memory_space<vmem>>, vector<48x128xf32>
    tpu.vector_store %arg9[%c8, %c0_7], %5 {strides = array<i32>} : memref<64x128xf32, #tpu.memory_space<vmem>>, vector<48x128xf32>,
    %c32_i32 = arith.constant 32 : i32
    %7 = arith.muli %arg1, %c32_i32 : i32
    %c6_i32 = arith.constant 6 : i32
    %8 = arith.subi %7, %c6_i32 : i32
    %9 = tpu.iota {dimensions = array<i32: 0>} : vector<48x1xi32>
    %10 = vector.broadcast %8 : i32 to vector<48x1xi32>
    %11 = arith.addi %9, %10 : vector<48x1xi32>
    %c0_i32 = arith.constant 0 : i32
    %12 = vector.broadcast %c0_i32 : i32 to vector<48x1xi32>
    %13 = arith.cmpi sge, %11, %12 : vector<48x1xi32>
    %c56_i32 = arith.constant 56 : i32
    %14 = vector.broadcast %c56_i32 : i32 to vector<48x1xi32>
    %15 = arith.cmpi slt, %11, %14 : vector<48x1xi32>
    %16 = arith.andi %13, %15 : vector<48x1xi1>
    %17 = arith.extui %16 : vector<48x1xi1> to vector<48x1xi32>
    %18 = arith.sitofp %17 : vector<48x1xi32> to vector<48x1xf32>
    %c0_8 = arith.constant 0 : index
    %c0_9 = arith.constant 0 : index
    %c0_10 = arith.constant 0 : index
    %19 = vector.load %arg3[%c0_8, %c0_9, %c0_10] : memref<1x3x128xf32, #tpu.memory_space<vmem>>, vector<1x3x128xf32>
    %20 = vector.shape_cast %19 : vector<1x3x128xf32> to vector<3x128xf32>
    %c0_11 = arith.constant 0 : index
    %c0_12 = arith.constant 0 : index
    %21 = vector.load %arg5[%c0_11, %c0_12] : memref<3x256xf32, #tpu.memory_space<vmem>>, vector<3x256xf32>
    %c6 = arith.constant 6 : index
    %c0_13 = arith.constant 0 : index
    %22 = vector.load %arg9[%c6, %c0_13] : memref<64x128xf32, #tpu.memory_space<vmem>>, vector<48x128xf32>
    %23 = arith.truncf %22 : vector<48x128xf32> to vector<48x128xbf16>
    %c0_14 = arith.constant 0 : index
    %c0_15 = arith.constant 0 : index
    %c0_16 = arith.constant 0 : index
    %c0_17 = arith.constant 0 : index
    %24 = vector.load %arg4[%c0_14, %c0_15, %c0_16, %c0_17] : memref<3x5x128x256xbf16, #tpu.memory_space<vmem>>, vector<1x1x128x256xbf16>
    %25 = vector.shape_cast %24 : vector<1x1x128x256xbf16> to vector<128x256xbf16>
    %cst_18 = arith.constant dense<0.000000e+00> : vector<48x256xf32>
    %26 = tpu.matmul %23, %25, %cst_18 {dimension_numbers = #tpu.dot_dimension_numbers<[1], [0], [0], [1], [0, 0, 1, 1], [], []>} : vector<48x128xbf16>, vector<128x256xbf16>, vector<48x256xf32> -> vector<48x256xf32>
    %c7 = arith.constant 7 : index
    %c0_19 = arith.constant 0 : index
    %27 = vector.load %arg9[%c7, %c0_19] : memref<64x128xf32, #tpu.memory_space<vmem>>, vector<48x128xf32>
    %28 = arith.truncf %27 : vector<48x128xf32> to vector<48x128xbf16>
    %c0_20 = arith.constant 0 : index
    %c1 = arith.constant 1 : index
    %c0_21 = arith.constant 0 : index
    %c0_22 = arith.constant 0 : index
    %29 = vector.load %arg4[%c0_20, %c1, %c0_21, %c0_22] : memref<3x5x128x256xbf16, #tpu.memory_space<vmem>>, vector<1x1x128x256xbf16>
    %30 = vector.shape_cast %29 : vector<1x1x128x256xbf16> to vector<128x256xbf16>
    %cst_23 = arith.constant dense<0.000000e+00> : vector<48x256xf32>
    %31 = tpu.matmul %28, %30, %cst_23 {dimension_numbers = #tpu.dot_dimension_numbers<[1], [0], [0], [1], [0, 0, 1, 1], [], []>} : vector<48x128xbf16>, vector<128x256xbf16>, vector<48x256xf32> -> vector<48x256xf32>
    %32 = arith.addf %26, %31 : vector<48x256xf32>
    %c8_24 = arith.constant 8 : index
    %c0_25 = arith.constant 0 : index
    %33 = vector.load %arg9[%c8_24, %c0_25] : memref<64x128xf32, #tpu.memory_space<vmem>>, vector<48x128xf32>
    %34 = arith.truncf %33 : vector<48x128xf32> to vector<48x128xbf16>
    %c0_26 = arith.constant 0 : index
    %c2 = arith.constant 2 : index
    %c0_27 = arith.constant 0 : index
    %c0_28 = arith.constant 0 : index
    %35 = vector.load %arg4[%c0_26, %c2, %c0_27, %c0_28] : memref<3x5x128x256xbf16, #tpu.memory_space<vmem>>, vector<1x1x128x256xbf16>
    %36 = vector.shape_cast %35 : vector<1x1x128x256xbf16> to vector<128x256xbf16>
    %cst_29 = arith.constant dense<0.000000e+00> : vector<48x256xf32>
    %37 = tpu.matmul %34, %36, %cst_29 {dimension_numbers = #tpu.dot_dimension_numbers<[1], [0], [0], [1], [0, 0, 1, 1], [], []>} : vector<48x128xbf16>, vector<128x256xbf16>, vector<48x256xf32> -> vector<48x256xf32>
    %38 = arith.addf %32, %37 : vector<48x256xf32>
    %c9 = arith.constant 9 : index
    %c0_30 = arith.constant 0 : index
    %39 = vector.load %arg9[%c9, %c0_30] : memref<64x128xf32, #tpu.memory_space<vmem>>, vector<48x128xf32>
    %40 = arith.truncf %39 : vector<48x128xf32> to vector<48x128xbf16>
    %c0_31 = arith.constant 0 : index
    %c3 = arith.constant 3 : index
    %c0_32 = arith.constant 0 : index
    %c0_33 = arith.constant 0 : index
    %41 = vector.load %arg4[%c0_31, %c3, %c0_32, %c0_33] : memref<3x5x128x256xbf16, #tpu.memory_space<vmem>>, vector<1x1x128x256xbf16>
    %42 = vector.shape_cast %41 : vector<1x1x128x256xbf16> to vector<128x256xbf16>
    %cst_34 = arith.constant dense<0.000000e+00> : vector<48x256xf32>
    %43 = tpu.matmul %40, %42, %cst_34 {dimension_numbers = #tpu.dot_dimension_numbers<[1], [0], [0], [1], [0, 0, 1, 1], [], []>} : vector<48x128xbf16>, vector<128x256xbf16>, vector<48x256xf32> -> vector<48x256xf32>
    %44 = arith.addf %38, %43 : vector<48x256xf32>
    %c10 = arith.constant 10 : index
    %c0_35 = arith.constant 0 : index
    %45 = vector.load %arg9[%c10, %c0_35] : memref<64x128xf32, #tpu.memory_space<vmem>>, vector<48x128xf32>
    %46 = arith.truncf %45 : vector<48x128xf32> to vector<48x128xbf16>
    %c0_36 = arith.constant 0 : index
    %c4 = arith.constant 4 : index
    %c0_37 = arith.constant 0 : index
    %c0_38 = arith.constant 0 : index
    %47 = vector.load %arg4[%c0_36, %c4, %c0_37, %c0_38] : memref<3x5x128x256xbf16, #tpu.memory_space<vmem>>, vector<1x1x128x256xbf16>
    %48 = vector.shape_cast %47 : vector<1x1x128x256xbf16> to vector<128x256xbf16>
    %cst_39 = arith.constant dense<0.000000e+00> : vector<48x256xf32>
    %49 = tpu.matmul %46, %48, %cst_39 {dimension_numbers = #tpu.dot_dimension_numbers<[1], [0], [0], [1], [0, 0, 1, 1], [], []>} : vector<48x128xbf16>, vector<128x256xbf16>, vector<48x256xf32> -> vector<48x256xf32>
    %50 = arith.addf %44, %49 : vector<48x256xf32>
    %51 = vector.extract_strided_slice %21 {offsets = [0, 0], sizes = [1, 256], strides = [1, 1]} : vector<3x256xf32> to vector<1x256xf32>
    %52 = vector.broadcast %51 : vector<1x256xf32> to vector<48x256xf32>
    %53 = arith.addf %50, %52 : vector<48x256xf32>
    %54 = vector.extract_strided_slice %53 {offsets = [0, 0], sizes = [48, 128], strides = [1, 1]} : vector<48x256xf32> to vector<48x128xf32>
    %55 = vector.extract_strided_slice %53 {offsets = [0, 128], sizes = [48, 128], strides = [1, 1]} : vector<48x256xf32> to vector<48x128xf32>
    %56 = vector.extract_strided_slice %20 {offsets = [0, 0], sizes = [1, 128], strides = [1, 1]} : vector<3x128xf32> to vector<1x128xf32>
    %57 = vector.broadcast %56 : vector<1x128xf32> to vector<48x128xf32>
    %58 = arith.addf %54, %57 : vector<48x128xf32>
    %59 = arith.negf %55 : vector<48x128xf32>
    %60 = math.exp %59 : vector<48x128xf32>
    %cst_40 = arith.constant 1.000000e+00 : f32
    %61 = vector.broadcast %cst_40 : f32 to vector<48x128xf32>
    %62 = arith.addf %61, %60 : vector<48x128xf32>
    %63 = arith.divf %61, %62 : vector<48x128xf32>
    %64 = arith.mulf %58, %63 : vector<48x128xf32>
    %65 = arith.addf %64, %33 : vector<48x128xf32>
    %cst_41 = arith.constant 0.707106769 : f32
    %66 = vector.broadcast %cst_41 : f32 to vector<48x128xf32>
    %67 = arith.mulf %65, %66 : vector<48x128xf32>
    %68 = vector.broadcast %18 : vector<48x1xf32> to vector<48x128xf32>
    %69 = arith.mulf %67, %68 : vector<48x128xf32>
    %c8_42 = arith.constant 8 : index
    %c0_43 = arith.constant 0 : index
    %70 = vector.load %arg9[%c8_42, %c0_43] : memref<64x128xf32, #tpu.memory_space<vmem>>, vector<48x128xf32>
    tpu.vector_store %arg9[%c8_42, %c0_43], %69 {strides = array<i32>} : memref<64x128xf32, #tpu.memory_space<vmem>>, vector<48x128xf32>,
    %c6_44 = arith.constant 6 : index
    %c0_45 = arith.constant 0 : index
    %71 = vector.load %arg9[%c6_44, %c0_45] : memref<64x128xf32, #tpu.memory_space<vmem>>, vector<48x128xf32>
    %72 = arith.truncf %71 : vector<48x128xf32> to vector<48x128xbf16>
    %c1_46 = arith.constant 1 : index
    %c0_47 = arith.constant 0 : index
    %c0_48 = arith.constant 0 : index
    %c0_49 = arith.constant 0 : index
    %73 = vector.load %arg4[%c1_46, %c0_47, %c0_48, %c0_49] : memref<3x5x128x256xbf16, #tpu.memory_space<vmem>>, vector<1x1x128x256xbf16>
    %74 = vector.shape_cast %73 : vector<1x1x128x256xbf16> to vector<128x256xbf16>
    %cst_50 = arith.constant dense<0.000000e+00> : vector<48x256xf32>
    %75 = tpu.matmul %72, %74, %cst_50 {dimension_numbers = #tpu.dot_dimension_numbers<[1], [0], [0], [1], [0, 0, 1, 1], [], []>} : vector<48x128xbf16>, vector<128x256xbf16>, vector<48x256xf32> -> vector<48x256xf32>
    %c7_51 = arith.constant 7 : index
    %c0_52 = arith.constant 0 : index
    %76 = vector.load %arg9[%c7_51, %c0_52] : memref<64x128xf32, #tpu.memory_space<vmem>>, vector<48x128xf32>
    %77 = arith.truncf %76 : vector<48x128xf32> to vector<48x128xbf16>
    %c1_53 = arith.constant 1 : index
    %c1_54 = arith.constant 1 : index
    %c0_55 = arith.constant 0 : index
    %c0_56 = arith.constant 0 : index
    %78 = vector.load %arg4[%c1_53, %c1_54, %c0_55, %c0_56] : memref<3x5x128x256xbf16, #tpu.memory_space<vmem>>, vector<1x1x128x256xbf16>
    %79 = vector.shape_cast %78 : vector<1x1x128x256xbf16> to vector<128x256xbf16>
    %cst_57 = arith.constant dense<0.000000e+00> : vector<48x256xf32>
    %80 = tpu.matmul %77, %79, %cst_57 {dimension_numbers = #tpu.dot_dimension_numbers<[1], [0], [0], [1], [0, 0, 1, 1], [], []>} : vector<48x128xbf16>, vector<128x256xbf16>, vector<48x256xf32> -> vector<48x256xf32>
    %81 = arith.addf %75, %80 : vector<48x256xf32>
    %c8_58 = arith.constant 8 : index
    %c0_59 = arith.constant 0 : index
    %82 = vector.load %arg9[%c8_58, %c0_59] : memref<64x128xf32, #tpu.memory_space<vmem>>, vector<48x128xf32>
    %83 = arith.truncf %82 : vector<48x128xf32> to vector<48x128xbf16>
    %c1_60 = arith.constant 1 : index
    %c2_61 = arith.constant 2 : index
    %c0_62 = arith.constant 0 : index
    %c0_63 = arith.constant 0 : index
    %84 = vector.load %arg4[%c1_60, %c2_61, %c0_62, %c0_63] : memref<3x5x128x256xbf16, #tpu.memory_space<vmem>>, vector<1x1x128x256xbf16>
    %85 = vector.shape_cast %84 : vector<1x1x128x256xbf16> to vector<128x256xbf16>
    %cst_64 = arith.constant dense<0.000000e+00> : vector<48x256xf32>
    %86 = tpu.matmul %83, %85, %cst_64 {dimension_numbers = #tpu.dot_dimension_numbers<[1], [0], [0], [1], [0, 0, 1, 1], [], []>} : vector<48x128xbf16>, vector<128x256xbf16>, vector<48x256xf32> -> vector<48x256xf32>
    %87 = arith.addf %81, %86 : vector<48x256xf32>
    %c9_65 = arith.constant 9 : index
    %c0_66 = arith.constant 0 : index
    %88 = vector.load %arg9[%c9_65, %c0_66] : memref<64x128xf32, #tpu.memory_space<vmem>>, vector<48x128xf32>
    %89 = arith.truncf %88 : vector<48x128xf32> to vector<48x128xbf16>
    %c1_67 = arith.constant 1 : index
    %c3_68 = arith.constant 3 : index
    %c0_69 = arith.constant 0 : index
    %c0_70 = arith.constant 0 : index
    %90 = vector.load %arg4[%c1_67, %c3_68, %c0_69, %c0_70] : memref<3x5x128x256xbf16, #tpu.memory_space<vmem>>, vector<1x1x128x256xbf16>
    %91 = vector.shape_cast %90 : vector<1x1x128x256xbf16> to vector<128x256xbf16>
    %cst_71 = arith.constant dense<0.000000e+00> : vector<48x256xf32>
    %92 = tpu.matmul %89, %91, %cst_71 {dimension_numbers = #tpu.dot_dimension_numbers<[1], [0], [0], [1], [0, 0, 1, 1], [], []>} : vector<48x128xbf16>, vector<128x256xbf16>, vector<48x256xf32> -> vector<48x256xf32>
    %93 = arith.addf %87, %92 : vector<48x256xf32>
    %c10_72 = arith.constant 10 : index
    %c0_73 = arith.constant 0 : index
    %94 = vector.load %arg9[%c10_72, %c0_73] : memref<64x128xf32, #tpu.memory_space<vmem>>, vector<48x128xf32>
    %95 = arith.truncf %94 : vector<48x128xf32> to vector<48x128xbf16>
    %c1_74 = arith.constant 1 : index
    %c4_75 = arith.constant 4 : index
    %c0_76 = arith.constant 0 : index
    %c0_77 = arith.constant 0 : index
    %96 = vector.load %arg4[%c1_74, %c4_75, %c0_76, %c0_77] : memref<3x5x128x256xbf16, #tpu.memory_space<vmem>>, vector<1x1x128x256xbf16>
    %97 = vector.shape_cast %96 : vector<1x1x128x256xbf16> to vector<128x256xbf16>
    %cst_78 = arith.constant dense<0.000000e+00> : vector<48x256xf32>
    %98 = tpu.matmul %95, %97, %cst_78 {dimension_numbers = #tpu.dot_dimension_numbers<[1], [0], [0], [1], [0, 0, 1, 1], [], []>} : vector<48x128xbf16>, vector<128x256xbf16>, vector<48x256xf32> -> vector<48x256xf32>
    %99 = arith.addf %93, %98 : vector<48x256xf32>
    %100 = vector.extract_strided_slice %21 {offsets = [1, 0], sizes = [1, 256], strides = [1, 1]} : vector<3x256xf32> to vector<1x256xf32>
    %101 = vector.broadcast %100 : vector<1x256xf32> to vector<48x256xf32>
    %102 = arith.addf %99, %101 : vector<48x256xf32>
    %103 = vector.extract_strided_slice %102 {offsets = [0, 0], sizes = [48, 128], strides = [1, 1]} : vector<48x256xf32> to vector<48x128xf32>
    %104 = vector.extract_strided_slice %102 {offsets = [0, 128], sizes = [48, 128], strides = [1, 1]} : vector<48x256xf32> to vector<48x128xf32>
    %105 = vector.extract_strided_slice %20 {offsets = [1, 0], sizes = [1, 128], strides = [1, 1]} : vector<3x128xf32> to vector<1x128xf32>
    %106 = vector.broadcast %105 : vector<1x128xf32> to vector<48x128xf32>
    %107 = arith.addf %103, %106 : vector<48x128xf32>
    %108 = arith.negf %104 : vector<48x128xf32>
    %109 = math.exp %108 : vector<48x128xf32>
    %cst_79 = arith.constant 1.000000e+00 : f32
    %110 = vector.broadcast %cst_79 : f32 to vector<48x128xf32>
    %111 = arith.addf %110, %109 : vector<48x128xf32>
    %112 = arith.divf %110, %111 : vector<48x128xf32>
    %113 = arith.mulf %107, %112 : vector<48x128xf32>
    %114 = arith.addf %113, %82 : vector<48x128xf32>
    %cst_80 = arith.constant 0.707106769 : f32
    %115 = vector.broadcast %cst_80 : f32 to vector<48x128xf32>
    %116 = arith.mulf %114, %115 : vector<48x128xf32>
    %117 = vector.broadcast %18 : vector<48x1xf32> to vector<48x128xf32>
    %118 = arith.mulf %116, %117 : vector<48x128xf32>
    %c8_81 = arith.constant 8 : index
    %c0_82 = arith.constant 0 : index
    %119 = vector.load %arg9[%c8_81, %c0_82] : memref<64x128xf32, #tpu.memory_space<vmem>>, vector<48x128xf32>
    tpu.vector_store %arg9[%c8_81, %c0_82], %118 {strides = array<i32>} : memref<64x128xf32, #tpu.memory_space<vmem>>, vector<48x128xf32>,
    %c6_83 = arith.constant 6 : index
    %c0_84 = arith.constant 0 : index
    %120 = vector.load %arg9[%c6_83, %c0_84] : memref<64x128xf32, #tpu.memory_space<vmem>>, vector<48x128xf32>
    %121 = arith.truncf %120 : vector<48x128xf32> to vector<48x128xbf16>
    %c2_85 = arith.constant 2 : index
    %c0_86 = arith.constant 0 : index
    %c0_87 = arith.constant 0 : index
    %c0_88 = arith.constant 0 : index
    %122 = vector.load %arg4[%c2_85, %c0_86, %c0_87, %c0_88] : memref<3x5x128x256xbf16, #tpu.memory_space<vmem>>, vector<1x1x128x256xbf16>
    %123 = vector.shape_cast %122 : vector<1x1x128x256xbf16> to vector<128x256xbf16>
    %cst_89 = arith.constant dense<0.000000e+00> : vector<48x256xf32>
    %124 = tpu.matmul %121, %123, %cst_89 {dimension_numbers = #tpu.dot_dimension_numbers<[1], [0], [0], [1], [0, 0, 1, 1], [], []>} : vector<48x128xbf16>, vector<128x256xbf16>, vector<48x256xf32> -> vector<48x256xf32>
    %c7_90 = arith.constant 7 : index
    %c0_91 = arith.constant 0 : index
    %125 = vector.load %arg9[%c7_90, %c0_91] : memref<64x128xf32, #tpu.memory_space<vmem>>, vector<48x128xf32>
    %126 = arith.truncf %125 : vector<48x128xf32> to vector<48x128xbf16>
    %c2_92 = arith.constant 2 : index
    %c1_93 = arith.constant 1 : index
    %c0_94 = arith.constant 0 : index
    %c0_95 = arith.constant 0 : index
    %127 = vector.load %arg4[%c2_92, %c1_93, %c0_94, %c0_95] : memref<3x5x128x256xbf16, #tpu.memory_space<vmem>>, vector<1x1x128x256xbf16>
    %128 = vector.shape_cast %127 : vector<1x1x128x256xbf16> to vector<128x256xbf16>
    %cst_96 = arith.constant dense<0.000000e+00> : vector<48x256xf32>
    %129 = tpu.matmul %126, %128, %cst_96 {dimension_numbers = #tpu.dot_dimension_numbers<[1], [0], [0], [1], [0, 0, 1, 1], [], []>} : vector<48x128xbf16>, vector<128x256xbf16>, vector<48x256xf32> -> vector<48x256xf32>
    %130 = arith.addf %124, %129 : vector<48x256xf32>
    %c8_97 = arith.constant 8 : index
    %c0_98 = arith.constant 0 : index
    %131 = vector.load %arg9[%c8_97, %c0_98] : memref<64x128xf32, #tpu.memory_space<vmem>>, vector<48x128xf32>
    %132 = arith.truncf %131 : vector<48x128xf32> to vector<48x128xbf16>
    %c2_99 = arith.constant 2 : index
    %c2_100 = arith.constant 2 : index
    %c0_101 = arith.constant 0 : index
    %c0_102 = arith.constant 0 : index
    %133 = vector.load %arg4[%c2_99, %c2_100, %c0_101, %c0_102] : memref<3x5x128x256xbf16, #tpu.memory_space<vmem>>, vector<1x1x128x256xbf16>
    %134 = vector.shape_cast %133 : vector<1x1x128x256xbf16> to vector<128x256xbf16>
    %cst_103 = arith.constant dense<0.000000e+00> : vector<48x256xf32>
    %135 = tpu.matmul %132, %134, %cst_103 {dimension_numbers = #tpu.dot_dimension_numbers<[1], [0], [0], [1], [0, 0, 1, 1], [], []>} : vector<48x128xbf16>, vector<128x256xbf16>, vector<48x256xf32> -> vector<48x256xf32>
    %136 = arith.addf %130, %135 : vector<48x256xf32>
    %c9_104 = arith.constant 9 : index
    %c0_105 = arith.constant 0 : index
    %137 = vector.load %arg9[%c9_104, %c0_105] : memref<64x128xf32, #tpu.memory_space<vmem>>, vector<48x128xf32>
    %138 = arith.truncf %137 : vector<48x128xf32> to vector<48x128xbf16>
    %c2_106 = arith.constant 2 : index
    %c3_107 = arith.constant 3 : index
    %c0_108 = arith.constant 0 : index
    %c0_109 = arith.constant 0 : index
    %139 = vector.load %arg4[%c2_106, %c3_107, %c0_108, %c0_109] : memref<3x5x128x256xbf16, #tpu.memory_space<vmem>>, vector<1x1x128x256xbf16>
    %140 = vector.shape_cast %139 : vector<1x1x128x256xbf16> to vector<128x256xbf16>
    %cst_110 = arith.constant dense<0.000000e+00> : vector<48x256xf32>
    %141 = tpu.matmul %138, %140, %cst_110 {dimension_numbers = #tpu.dot_dimension_numbers<[1], [0], [0], [1], [0, 0, 1, 1], [], []>} : vector<48x128xbf16>, vector<128x256xbf16>, vector<48x256xf32> -> vector<48x256xf32>
    %142 = arith.addf %136, %141 : vector<48x256xf32>
    %c10_111 = arith.constant 10 : index
    %c0_112 = arith.constant 0 : index
    %143 = vector.load %arg9[%c10_111, %c0_112] : memref<64x128xf32, #tpu.memory_space<vmem>>, vector<48x128xf32>
    %144 = arith.truncf %143 : vector<48x128xf32> to vector<48x128xbf16>
    %c2_113 = arith.constant 2 : index
    %c4_114 = arith.constant 4 : index
    %c0_115 = arith.constant 0 : index
    %c0_116 = arith.constant 0 : index
    %145 = vector.load %arg4[%c2_113, %c4_114, %c0_115, %c0_116] : memref<3x5x128x256xbf16, #tpu.memory_space<vmem>>, vector<1x1x128x256xbf16>
    %146 = vector.shape_cast %145 : vector<1x1x128x256xbf16> to vector<128x256xbf16>
    %cst_117 = arith.constant dense<0.000000e+00> : vector<48x256xf32>
    %147 = tpu.matmul %144, %146, %cst_117 {dimension_numbers = #tpu.dot_dimension_numbers<[1], [0], [0], [1], [0, 0, 1, 1], [], []>} : vector<48x128xbf16>, vector<128x256xbf16>, vector<48x256xf32> -> vector<48x256xf32>
    %148 = arith.addf %142, %147 : vector<48x256xf32>
    %149 = vector.extract_strided_slice %21 {offsets = [2, 0], sizes = [1, 256], strides = [1, 1]} : vector<3x256xf32> to vector<1x256xf32>
    %150 = vector.broadcast %149 : vector<1x256xf32> to vector<48x256xf32>
    %151 = arith.addf %148, %150 : vector<48x256xf32>
    %152 = vector.extract_strided_slice %151 {offsets = [0, 0], sizes = [48, 128], strides = [1, 1]} : vector<48x256xf32> to vector<48x128xf32>
    %153 = vector.extract_strided_slice %151 {offsets = [0, 128], sizes = [48, 128], strides = [1, 1]} : vector<48x256xf32> to vector<48x128xf32>
    %154 = vector.extract_strided_slice %20 {offsets = [2, 0], sizes = [1, 128], strides = [1, 1]} : vector<3x128xf32> to vector<1x128xf32>
    %155 = vector.broadcast %154 : vector<1x128xf32> to vector<48x128xf32>
    %156 = arith.addf %152, %155 : vector<48x128xf32>
    %157 = arith.negf %153 : vector<48x128xf32>
    %158 = math.exp %157 : vector<48x128xf32>
    %cst_118 = arith.constant 1.000000e+00 : f32
    %159 = vector.broadcast %cst_118 : f32 to vector<48x128xf32>
    %160 = arith.addf %159, %158 : vector<48x128xf32>
    %161 = arith.divf %159, %160 : vector<48x128xf32>
    %162 = arith.mulf %156, %161 : vector<48x128xf32>
    %163 = arith.addf %162, %131 : vector<48x128xf32>
    %cst_119 = arith.constant 0.707106769 : f32
    %164 = vector.broadcast %cst_119 : f32 to vector<48x128xf32>
    %165 = arith.mulf %163, %164 : vector<48x128xf32>
    %166 = vector.extract_strided_slice %165 {offsets = [6, 0], sizes = [32, 128], strides = [1, 1]} : vector<48x128xf32> to vector<32x128xf32>
    %167 = arith.truncf %166 : vector<32x128xf32> to vector<32x128xbf16>
    %c0_120 = arith.constant 0 : index
    %c0_121 = arith.constant 0 : index
    %168 = vector.load %arg6[%c0_120, %c0_121] : memref<128x128xbf16, #tpu.memory_space<vmem>>, vector<128x128xbf16>
    %cst_122 = arith.constant dense<0.000000e+00> : vector<32x128xf32>
    %169 = tpu.matmul %167, %168, %cst_122 {dimension_numbers = #tpu.dot_dimension_numbers<[1], [0], [0], [1], [0, 0, 1, 1], [], []>} : vector<32x128xbf16>, vector<128x128xbf16>, vector<32x128xf32> -> vector<32x128xf32>
    %c0_123 = arith.constant 0 : index
    %c0_124 = arith.constant 0 : index
    %170 = vector.load %arg7[%c0_123, %c0_124] : memref<1x128xf32, #tpu.memory_space<vmem>>, vector<1x128xf32>
    %171 = vector.broadcast %170 : vector<1x128xf32> to vector<32x128xf32>
    %172 = arith.addf %169, %171 : vector<32x128xf32>
    %cst_125 = arith.constant 1.000000e-07 : f32
    %173 = vector.broadcast %cst_125 : f32 to vector<32x128xf32>
    %174 = arith.maximumf %172, %173 : vector<32x128xf32>
    %175 = math.log %174 : vector<32x128xf32>
    %cst_126 = arith.constant 1.400000e+00 : f32
    %176 = vector.broadcast %cst_126 : f32 to vector<32x128xf32>
    %177 = arith.mulf %176, %175 : vector<32x128xf32>
    %178 = math.exp %177 : vector<32x128xf32>
    %c0_127 = arith.constant 0 : index
    %c0_128 = arith.constant 0 : index
    %c0_129 = arith.constant 0 : index
    %179 = vector.load %arg8[%c0_127, %c0_128, %c0_129] : memref<1x32x128xf32, #tpu.memory_space<vmem>>, vector<1x32x128xf32>
    %180 = vector.shape_cast %179 : vector<1x32x128xf32> to vector<32x128xf32>
    %181 = vector.shape_cast %178 : vector<32x128xf32> to vector<1x32x128xf32>
    tpu.vector_store %arg8[%c0_127, %c0_128, %c0_129], %181 {strides = array<i32>} : memref<1x32x128xf32, #tpu.memory_space<vmem>>, vector<1x32x128xf32>,
    return
  }
  func.func @transform_0(%arg0: i32, %arg1: i32) -> (i32, i32, i32, i32) {
    %c0_i32 = arith.constant 0 : i32
    %c0_i32_0 = arith.constant 0 : i32
    %c0_i32_1 = arith.constant 0 : i32
    return %arg0, %arg1, %c0_i32, %c0_i32_0 : i32, i32, i32, i32
  }
  func.func @transform_1(%arg0: i32, %arg1: i32) -> (i32, i32, i32) {
    %c0_i32 = arith.constant 0 : i32
    %c0_i32_0 = arith.constant 0 : i32
    %c0_i32_1 = arith.constant 0 : i32
    return %arg0, %c0_i32, %c0_i32_0 : i32, i32, i32
  }
  func.func @transform_2(%arg0: i32, %arg1: i32) -> (i32, i32, i32, i32) {
    %c0_i32 = arith.constant 0 : i32
    %c0_i32_0 = arith.constant 0 : i32
    %c0_i32_1 = arith.constant 0 : i32
    %c0_i32_2 = arith.constant 0 : i32
    %c0_i32_3 = arith.constant 0 : i32
    return %c0_i32, %c0_i32_0, %c0_i32_1, %c0_i32_2 : i32, i32, i32, i32
  }
  func.func @transform_3(%arg0: i32, %arg1: i32) -> (i32, i32) {
    %c0_i32 = arith.constant 0 : i32
    %c0_i32_0 = arith.constant 0 : i32
    %c0_i32_1 = arith.constant 0 : i32
    return %c0_i32, %c0_i32_0 : i32, i32
  }
  func.func @transform_4(%arg0: i32, %arg1: i32) -> (i32, i32) {
    %c0_i32 = arith.constant 0 : i32
    %c0_i32_0 = arith.constant 0 : i32
    %c0_i32_1 = arith.constant 0 : i32
    return %c0_i32, %c0_i32_0 : i32, i32
  }
  func.func @transform_5(%arg0: i32, %arg1: i32) -> (i32, i32) {
    %c0_i32 = arith.constant 0 : i32
    %c0_i32_0 = arith.constant 0 : i32
    %c0_i32_1 = arith.constant 0 : i32
    return %c0_i32, %c0_i32_0 : i32, i32
  }
  func.func @transform_6(%arg0: i32, %arg1: i32) -> (i32, i32, i32) {
    %c0_i32 = arith.constant 0 : i32
    %c0_i32_0 = arith.constant 0 : i32
    return %arg0, %arg1, %c0_i32 : i32, i32, i32
  }
}

module attributes {stable_mosaic.version = 11 : i64} {
  func.func @converter_kernel(%arg0: i32, %arg1: i32, %arg2: memref<1x1x48x128xf32, #tpu.memory_space<vmem>>, %arg3: memref<1x3x128xf32, #tpu.memory_space<vmem>>, %arg4: memref<3x5x128x256xbf16, #tpu.memory_space<vmem>>, %arg5: memref<3x256xf32, #tpu.memory_space<vmem>>, %arg6: memref<128x128xbf16, #tpu.memory_space<vmem>>, %arg7: memref<1x128xf32, #tpu.memory_space<vmem>>, %arg8: memref<1x32x128xf32, #tpu.memory_space<vmem>>, %arg9: memref<64x128xf32, #tpu.memory_space<vmem>>) attributes {dimension_semantics = [#tpu.dimension_semantics<parallel>, #tpu.dimension_semantics<parallel>], iteration_bounds = array<i64: 2, 2>, scalar_prefetch = 0 : i64, scratch_operands = 1 : i64, tpu.core_type = #tpu.core_type<tc>, window_params = [{transform_indices = @transform_0, window_bounds = array<i64: 1, 1, 48, 128>}, {transform_indices = @transform_1, window_bounds = array<i64: 1, 3, 128>}, {pipeline_mode = #tpu.pipeline_mode<synchronous>, transform_indices = @transform_2, window_bounds = array<i64: 3, 5, 128, 256>}, {pipeline_mode = #tpu.pipeline_mode<synchronous>, transform_indices = @transform_3, window_bounds = array<i64: 3, 256>}, {pipeline_mode = #tpu.pipeline_mode<synchronous>, transform_indices = @transform_4, window_bounds = array<i64: 128, 128>}, {pipeline_mode = #tpu.pipeline_mode<synchronous>, transform_indices = @transform_5, window_bounds = array<i64: 1, 128>}, {transform_indices = @transform_6, window_bounds = array<i64: 1, 32, 128>}]} {
    %cst = arith.constant 0.000000e+00 : f32
    %0 = vector.broadcast %cst : f32 to vector<8x128xf32>
    %c0 = arith.constant 0 : index
    %c0_0 = arith.constant 0 : index
    %1 = vector.load %arg9[%c0, %c0_0] : memref<64x128xf32, #tpu.memory_space<vmem>>, vector<8x128xf32>
    tpu.vector_store %arg9[%c0, %c0_0], %0 {strides = array<i32>} : memref<64x128xf32, #tpu.memory_space<vmem>>, vector<8x128xf32>,
    %cst_1 = arith.constant 0.000000e+00 : f32
    %2 = vector.broadcast %cst_1 : f32 to vector<8x128xf32>
    %c56 = arith.constant 56 : index
    %c0_2 = arith.constant 0 : index
    %3 = vector.load %arg9[%c56, %c0_2] : memref<64x128xf32, #tpu.memory_space<vmem>>, vector<8x128xf32>
    tpu.vector_store %arg9[%c56, %c0_2], %2 {strides = array<i32>} : memref<64x128xf32, #tpu.memory_space<vmem>>, vector<8x128xf32>,
    %c0_3 = arith.constant 0 : index
    %c0_4 = arith.constant 0 : index
    %c0_5 = arith.constant 0 : index
    %c0_6 = arith.constant 0 : index
    %4 = vector.load %arg2[%c0_3, %c0_4, %c0_5, %c0_6] : memref<1x1x48x128xf32, #tpu.memory_space<vmem>>, vector<1x1x48x128xf32>
    %5 = vector.shape_cast %4 : vector<1x1x48x128xf32> to vector<48x128xf32>
    %c8 = arith.constant 8 : index
    %c0_7 = arith.constant 0 : index
    %6 = vector.load %arg9[%c8, %c0_7] : memref<64x128xf32, #tpu.memory_space<vmem>>, vector<48x128xf32>
    tpu.vector_store %arg9[%c8, %c0_7], %5 {strides = array<i32>} : memref<64x128xf32, #tpu.memory_space<vmem>>, vector<48x128xf32>,
    %c32_i32 = arith.constant 32 : i32
    %7 = arith.muli %arg1, %c32_i32 : i32
    %c6_i32 = arith.constant 6 : i32
    %8 = arith.subi %7, %c6_i32 : i32
    %9 = tpu.iota {dimensions = array<i32: 0>} : vector<48x1xi32>
    %10 = vector.broadcast %8 : i32 to vector<48x1xi32>
    %11 = arith.addi %9, %10 : vector<48x1xi32>
    %c0_i32 = arith.constant 0 : i32
    %12 = vector.broadcast %c0_i32 : i32 to vector<48x1xi32>
    %13 = arith.cmpi sge, %11, %12 : vector<48x1xi32>
    %c56_i32 = arith.constant 56 : i32
    %14 = vector.broadcast %c56_i32 : i32 to vector<48x1xi32>
    %15 = arith.cmpi slt, %11, %14 : vector<48x1xi32>
    %16 = arith.andi %13, %15 : vector<48x1xi1>
    %17 = arith.extui %16 : vector<48x1xi1> to vector<48x1xi32>
    %18 = arith.sitofp %17 : vector<48x1xi32> to vector<48x1xf32>
    %c0_8 = arith.constant 0 : index
    %c0_9 = arith.constant 0 : index
    %c0_10 = arith.constant 0 : index
    %19 = vector.load %arg3[%c0_8, %c0_9, %c0_10] : memref<1x3x128xf32, #tpu.memory_space<vmem>>, vector<1x3x128xf32>
    %20 = vector.shape_cast %19 : vector<1x3x128xf32> to vector<3x128xf32>
    %c0_11 = arith.constant 0 : index
    %c0_12 = arith.constant 0 : index
    %21 = vector.load %arg5[%c0_11, %c0_12] : memref<3x256xf32, #tpu.memory_space<vmem>>, vector<3x256xf32>
    %c6 = arith.constant 6 : index
    %c0_13 = arith.constant 0 : index
    %22 = vector.load %arg9[%c6, %c0_13] : memref<64x128xf32, #tpu.memory_space<vmem>>, vector<48x128xf32>
    %23 = arith.truncf %22 : vector<48x128xf32> to vector<48x128xbf16>
    %c0_14 = arith.constant 0 : index
    %c0_15 = arith.constant 0 : index
    %c0_16 = arith.constant 0 : index
    %c0_17 = arith.constant 0 : index
    %24 = vector.load %arg4[%c0_14, %c0_15, %c0_16, %c0_17] : memref<3x5x128x256xbf16, #tpu.memory_space<vmem>>, vector<1x1x128x256xbf16>
    %25 = vector.shape_cast %24 : vector<1x1x128x256xbf16> to vector<128x256xbf16>
    %cst_18 = arith.constant dense<0.000000e+00> : vector<48x256xf32>
    %26 = tpu.matmul %23, %25, %cst_18 {dimension_numbers = #tpu.dot_dimension_numbers<[1], [0], [0], [1], [0, 0, 1, 1], [], []>} : vector<48x128xbf16>, vector<128x256xbf16>, vector<48x256xf32> -> vector<48x256xf32>
    %c7 = arith.constant 7 : index
    %c0_19 = arith.constant 0 : index
    %27 = vector.load %arg9[%c7, %c0_19] : memref<64x128xf32, #tpu.memory_space<vmem>>, vector<48x128xf32>
    %28 = arith.truncf %27 : vector<48x128xf32> to vector<48x128xbf16>
    %c0_20 = arith.constant 0 : index
    %c1 = arith.constant 1 : index
    %c0_21 = arith.constant 0 : index
    %c0_22 = arith.constant 0 : index
    %29 = vector.load %arg4[%c0_20, %c1, %c0_21, %c0_22] : memref<3x5x128x256xbf16, #tpu.memory_space<vmem>>, vector<1x1x128x256xbf16>
    %30 = vector.shape_cast %29 : vector<1x1x128x256xbf16> to vector<128x256xbf16>
    %cst_23 = arith.constant dense<0.000000e+00> : vector<48x256xf32>
    %31 = tpu.matmul %28, %30, %cst_23 {dimension_numbers = #tpu.dot_dimension_numbers<[1], [0], [0], [1], [0, 0, 1, 1], [], []>} : vector<48x128xbf16>, vector<128x256xbf16>, vector<48x256xf32> -> vector<48x256xf32>
    %32 = arith.addf %26, %31 : vector<48x256xf32>
    %c8_24 = arith.constant 8 : index
    %c0_25 = arith.constant 0 : index
    %33 = vector.load %arg9[%c8_24, %c0_25] : memref<64x128xf32, #tpu.memory_space<vmem>>, vector<48x128xf32>
    %34 = arith.truncf %33 : vector<48x128xf32> to vector<48x128xbf16>
    %c0_26 = arith.constant 0 : index
    %c2 = arith.constant 2 : index
    %c0_27 = arith.constant 0 : index
    %c0_28 = arith.constant 0 : index
    %35 = vector.load %arg4[%c0_26, %c2, %c0_27, %c0_28] : memref<3x5x128x256xbf16, #tpu.memory_space<vmem>>, vector<1x1x128x256xbf16>
    %36 = vector.shape_cast %35 : vector<1x1x128x256xbf16> to vector<128x256xbf16>
    %cst_29 = arith.constant dense<0.000000e+00> : vector<48x256xf32>
    %37 = tpu.matmul %34, %36, %cst_29 {dimension_numbers = #tpu.dot_dimension_numbers<[1], [0], [0], [1], [0, 0, 1, 1], [], []>} : vector<48x128xbf16>, vector<128x256xbf16>, vector<48x256xf32> -> vector<48x256xf32>
    %38 = arith.addf %32, %37 : vector<48x256xf32>
    %c9 = arith.constant 9 : index
    %c0_30 = arith.constant 0 : index
    %39 = vector.load %arg9[%c9, %c0_30] : memref<64x128xf32, #tpu.memory_space<vmem>>, vector<48x128xf32>
    %40 = arith.truncf %39 : vector<48x128xf32> to vector<48x128xbf16>
    %c0_31 = arith.constant 0 : index
    %c3 = arith.constant 3 : index
    %c0_32 = arith.constant 0 : index
    %c0_33 = arith.constant 0 : index
    %41 = vector.load %arg4[%c0_31, %c3, %c0_32, %c0_33] : memref<3x5x128x256xbf16, #tpu.memory_space<vmem>>, vector<1x1x128x256xbf16>
    %42 = vector.shape_cast %41 : vector<1x1x128x256xbf16> to vector<128x256xbf16>
    %cst_34 = arith.constant dense<0.000000e+00> : vector<48x256xf32>
    %43 = tpu.matmul %40, %42, %cst_34 {dimension_numbers = #tpu.dot_dimension_numbers<[1], [0], [0], [1], [0, 0, 1, 1], [], []>} : vector<48x128xbf16>, vector<128x256xbf16>, vector<48x256xf32> -> vector<48x256xf32>
    %44 = arith.addf %38, %43 : vector<48x256xf32>
    %c10 = arith.constant 10 : index
    %c0_35 = arith.constant 0 : index
    %45 = vector.load %arg9[%c10, %c0_35] : memref<64x128xf32, #tpu.memory_space<vmem>>, vector<48x128xf32>
    %46 = arith.truncf %45 : vector<48x128xf32> to vector<48x128xbf16>
    %c0_36 = arith.constant 0 : index
    %c4 = arith.constant 4 : index
    %c0_37 = arith.constant 0 : index
    %c0_38 = arith.constant 0 : index
    %47 = vector.load %arg4[%c0_36, %c4, %c0_37, %c0_38] : memref<3x5x128x256xbf16, #tpu.memory_space<vmem>>, vector<1x1x128x256xbf16>
    %48 = vector.shape_cast %47 : vector<1x1x128x256xbf16> to vector<128x256xbf16>
    %cst_39 = arith.constant dense<0.000000e+00> : vector<48x256xf32>
    %49 = tpu.matmul %46, %48, %cst_39 {dimension_numbers = #tpu.dot_dimension_numbers<[1], [0], [0], [1], [0, 0, 1, 1], [], []>} : vector<48x128xbf16>, vector<128x256xbf16>, vector<48x256xf32> -> vector<48x256xf32>
    %50 = arith.addf %44, %49 : vector<48x256xf32>
    %51 = vector.extract_strided_slice %21 {offsets = [0, 0], sizes = [1, 256], strides = [1, 1]} : vector<3x256xf32> to vector<1x256xf32>
    %52 = vector.broadcast %51 : vector<1x256xf32> to vector<48x256xf32>
    %53 = arith.addf %50, %52 : vector<48x256xf32>
    %54 = vector.extract_strided_slice %53 {offsets = [0, 0], sizes = [48, 128], strides = [1, 1]} : vector<48x256xf32> to vector<48x128xf32>
    %55 = vector.extract_strided_slice %53 {offsets = [0, 128], sizes = [48, 128], strides = [1, 1]} : vector<48x256xf32> to vector<48x128xf32>
    %56 = vector.extract_strided_slice %20 {offsets = [0, 0], sizes = [1, 128], strides = [1, 1]} : vector<3x128xf32> to vector<1x128xf32>
    %57 = vector.broadcast %56 : vector<1x128xf32> to vector<48x128xf32>
    %58 = arith.addf %54, %57 : vector<48x128xf32>
    %59 = arith.negf %55 : vector<48x128xf32>
    %60 = math.exp %59 : vector<48x128xf32>
    %cst_40 = arith.constant 1.000000e+00 : f32
    %61 = vector.broadcast %cst_40 : f32 to vector<48x128xf32>
    %62 = arith.addf %61, %60 : vector<48x128xf32>
    %63 = arith.divf %61, %62 : vector<48x128xf32>
    %64 = arith.mulf %58, %63 : vector<48x128xf32>
    %65 = arith.addf %64, %33 : vector<48x128xf32>
    %cst_41 = arith.constant 0.707106769 : f32
    %66 = vector.broadcast %cst_41 : f32 to vector<48x128xf32>
    %67 = arith.mulf %65, %66 : vector<48x128xf32>
    %68 = vector.broadcast %18 : vector<48x1xf32> to vector<48x128xf32>
    %69 = arith.mulf %67, %68 : vector<48x128xf32>
    %c8_42 = arith.constant 8 : index
    %c0_43 = arith.constant 0 : index
    %70 = vector.load %arg9[%c8_42, %c0_43] : memref<64x128xf32, #tpu.memory_space<vmem>>, vector<48x128xf32>
    tpu.vector_store %arg9[%c8_42, %c0_43], %69 {strides = array<i32>} : memref<64x128xf32, #tpu.memory_space<vmem>>, vector<48x128xf32>,
    %c6_44 = arith.constant 6 : index
    %c0_45 = arith.constant 0 : index
    %71 = vector.load %arg9[%c6_44, %c0_45] : memref<64x128xf32, #tpu.memory_space<vmem>>, vector<48x128xf32>
    %72 = arith.truncf %71 : vector<48x128xf32> to vector<48x128xbf16>
    %c1_46 = arith.constant 1 : index
    %c0_47 = arith.constant 0 : index
    %c0_48 = arith.constant 0 : index
    %c0_49 = arith.constant 0 : index
    %73 = vector.load %arg4[%c1_46, %c0_47, %c0_48, %c0_49] : memref<3x5x128x256xbf16, #tpu.memory_space<vmem>>, vector<1x1x128x256xbf16>
    %74 = vector.shape_cast %73 : vector<1x1x128x256xbf16> to vector<128x256xbf16>
    %cst_50 = arith.constant dense<0.000000e+00> : vector<48x256xf32>
    %75 = tpu.matmul %72, %74, %cst_50 {dimension_numbers = #tpu.dot_dimension_numbers<[1], [0], [0], [1], [0, 0, 1, 1], [], []>} : vector<48x128xbf16>, vector<128x256xbf16>, vector<48x256xf32> -> vector<48x256xf32>
    %c7_51 = arith.constant 7 : index
    %c0_52 = arith.constant 0 : index
    %76 = vector.load %arg9[%c7_51, %c0_52] : memref<64x128xf32, #tpu.memory_space<vmem>>, vector<48x128xf32>
    %77 = arith.truncf %76 : vector<48x128xf32> to vector<48x128xbf16>
    %c1_53 = arith.constant 1 : index
    %c1_54 = arith.constant 1 : index
    %c0_55 = arith.constant 0 : index
    %c0_56 = arith.constant 0 : index
    %78 = vector.load %arg4[%c1_53, %c1_54, %c0_55, %c0_56] : memref<3x5x128x256xbf16, #tpu.memory_space<vmem>>, vector<1x1x128x256xbf16>
    %79 = vector.shape_cast %78 : vector<1x1x128x256xbf16> to vector<128x256xbf16>
    %cst_57 = arith.constant dense<0.000000e+00> : vector<48x256xf32>
    %80 = tpu.matmul %77, %79, %cst_57 {dimension_numbers = #tpu.dot_dimension_numbers<[1], [0], [0], [1], [0, 0, 1, 1], [], []>} : vector<48x128xbf16>, vector<128x256xbf16>, vector<48x256xf32> -> vector<48x256xf32>
    %81 = arith.addf %75, %80 : vector<48x256xf32>
    %c8_58 = arith.constant 8 : index
    %c0_59 = arith.constant 0 : index
    %82 = vector.load %arg9[%c8_58, %c0_59] : memref<64x128xf32, #tpu.memory_space<vmem>>, vector<48x128xf32>
    %83 = arith.truncf %82 : vector<48x128xf32> to vector<48x128xbf16>
    %c1_60 = arith.constant 1 : index
    %c2_61 = arith.constant 2 : index
    %c0_62 = arith.constant 0 : index
    %c0_63 = arith.constant 0 : index
    %84 = vector.load %arg4[%c1_60, %c2_61, %c0_62, %c0_63] : memref<3x5x128x256xbf16, #tpu.memory_space<vmem>>, vector<1x1x128x256xbf16>
    %85 = vector.shape_cast %84 : vector<1x1x128x256xbf16> to vector<128x256xbf16>
    %cst_64 = arith.constant dense<0.000000e+00> : vector<48x256xf32>
    %86 = tpu.matmul %83, %85, %cst_64 {dimension_numbers = #tpu.dot_dimension_numbers<[1], [0], [0], [1], [0, 0, 1, 1], [], []>} : vector<48x128xbf16>, vector<128x256xbf16>, vector<48x256xf32> -> vector<48x256xf32>
    %87 = arith.addf %81, %86 : vector<48x256xf32>
    %c9_65 = arith.constant 9 : index
    %c0_66 = arith.constant 0 : index
    %88 = vector.load %arg9[%c9_65, %c0_66] : memref<64x128xf32, #tpu.memory_space<vmem>>, vector<48x128xf32>
    %89 = arith.truncf %88 : vector<48x128xf32> to vector<48x128xbf16>
    %c1_67 = arith.constant 1 : index
    %c3_68 = arith.constant 3 : index
    %c0_69 = arith.constant 0 : index
    %c0_70 = arith.constant 0 : index
    %90 = vector.load %arg4[%c1_67, %c3_68, %c0_69, %c0_70] : memref<3x5x128x256xbf16, #tpu.memory_space<vmem>>, vector<1x1x128x256xbf16>
    %91 = vector.shape_cast %90 : vector<1x1x128x256xbf16> to vector<128x256xbf16>
    %cst_71 = arith.constant dense<0.000000e+00> : vector<48x256xf32>
    %92 = tpu.matmul %89, %91, %cst_71 {dimension_numbers = #tpu.dot_dimension_numbers<[1], [0], [0], [1], [0, 0, 1, 1], [], []>} : vector<48x128xbf16>, vector<128x256xbf16>, vector<48x256xf32> -> vector<48x256xf32>
    %93 = arith.addf %87, %92 : vector<48x256xf32>
    %c10_72 = arith.constant 10 : index
    %c0_73 = arith.constant 0 : index
    %94 = vector.load %arg9[%c10_72, %c0_73] : memref<64x128xf32, #tpu.memory_space<vmem>>, vector<48x128xf32>
    %95 = arith.truncf %94 : vector<48x128xf32> to vector<48x128xbf16>
    %c1_74 = arith.constant 1 : index
    %c4_75 = arith.constant 4 : index
    %c0_76 = arith.constant 0 : index
    %c0_77 = arith.constant 0 : index
    %96 = vector.load %arg4[%c1_74, %c4_75, %c0_76, %c0_77] : memref<3x5x128x256xbf16, #tpu.memory_space<vmem>>, vector<1x1x128x256xbf16>
    %97 = vector.shape_cast %96 : vector<1x1x128x256xbf16> to vector<128x256xbf16>
    %cst_78 = arith.constant dense<0.000000e+00> : vector<48x256xf32>
    %98 = tpu.matmul %95, %97, %cst_78 {dimension_numbers = #tpu.dot_dimension_numbers<[1], [0], [0], [1], [0, 0, 1, 1], [], []>} : vector<48x128xbf16>, vector<128x256xbf16>, vector<48x256xf32> -> vector<48x256xf32>
    %99 = arith.addf %93, %98 : vector<48x256xf32>
    %100 = vector.extract_strided_slice %21 {offsets = [1, 0], sizes = [1, 256], strides = [1, 1]} : vector<3x256xf32> to vector<1x256xf32>
    %101 = vector.broadcast %100 : vector<1x256xf32> to vector<48x256xf32>
    %102 = arith.addf %99, %101 : vector<48x256xf32>
    %103 = vector.extract_strided_slice %102 {offsets = [0, 0], sizes = [48, 128], strides = [1, 1]} : vector<48x256xf32> to vector<48x128xf32>
    %104 = vector.extract_strided_slice %102 {offsets = [0, 128], sizes = [48, 128], strides = [1, 1]} : vector<48x256xf32> to vector<48x128xf32>
    %105 = vector.extract_strided_slice %20 {offsets = [1, 0], sizes = [1, 128], strides = [1, 1]} : vector<3x128xf32> to vector<1x128xf32>
    %106 = vector.broadcast %105 : vector<1x128xf32> to vector<48x128xf32>
    %107 = arith.addf %103, %106 : vector<48x128xf32>
    %108 = arith.negf %104 : vector<48x128xf32>
    %109 = math.exp %108 : vector<48x128xf32>
    %cst_79 = arith.constant 1.000000e+00 : f32
    %110 = vector.broadcast %cst_79 : f32 to vector<48x128xf32>
    %111 = arith.addf %110, %109 : vector<48x128xf32>
    %112 = arith.divf %110, %111 : vector<48x128xf32>
    %113 = arith.mulf %107, %112 : vector<48x128xf32>
    %114 = arith.addf %113, %82 : vector<48x128xf32>
    %cst_80 = arith.constant 0.707106769 : f32
    %115 = vector.broadcast %cst_80 : f32 to vector<48x128xf32>
    %116 = arith.mulf %114, %115 : vector<48x128xf32>
    %117 = vector.broadcast %18 : vector<48x1xf32> to vector<48x128xf32>
    %118 = arith.mulf %116, %117 : vector<48x128xf32>
    %c8_81 = arith.constant 8 : index
    %c0_82 = arith.constant 0 : index
    %119 = vector.load %arg9[%c8_81, %c0_82] : memref<64x128xf32, #tpu.memory_space<vmem>>, vector<48x128xf32>
    tpu.vector_store %arg9[%c8_81, %c0_82], %118 {strides = array<i32>} : memref<64x128xf32, #tpu.memory_space<vmem>>, vector<48x128xf32>,
    %c6_83 = arith.constant 6 : index
    %c0_84 = arith.constant 0 : index
    %120 = vector.load %arg9[%c6_83, %c0_84] : memref<64x128xf32, #tpu.memory_space<vmem>>, vector<48x128xf32>
    %121 = arith.truncf %120 : vector<48x128xf32> to vector<48x128xbf16>
    %c2_85 = arith.constant 2 : index
    %c0_86 = arith.constant 0 : index
    %c0_87 = arith.constant 0 : index
    %c0_88 = arith.constant 0 : index
    %122 = vector.load %arg4[%c2_85, %c0_86, %c0_87, %c0_88] : memref<3x5x128x256xbf16, #tpu.memory_space<vmem>>, vector<1x1x128x256xbf16>
    %123 = vector.shape_cast %122 : vector<1x1x128x256xbf16> to vector<128x256xbf16>
    %cst_89 = arith.constant dense<0.000000e+00> : vector<48x256xf32>
    %124 = tpu.matmul %121, %123, %cst_89 {dimension_numbers = #tpu.dot_dimension_numbers<[1], [0], [0], [1], [0, 0, 1, 1], [], []>} : vector<48x128xbf16>, vector<128x256xbf16>, vector<48x256xf32> -> vector<48x256xf32>
    %c7_90 = arith.constant 7 : index
    %c0_91 = arith.constant 0 : index
    %125 = vector.load %arg9[%c7_90, %c0_91] : memref<64x128xf32, #tpu.memory_space<vmem>>, vector<48x128xf32>
    %126 = arith.truncf %125 : vector<48x128xf32> to vector<48x128xbf16>
    %c2_92 = arith.constant 2 : index
    %c1_93 = arith.constant 1 : index
    %c0_94 = arith.constant 0 : index
    %c0_95 = arith.constant 0 : index
    %127 = vector.load %arg4[%c2_92, %c1_93, %c0_94, %c0_95] : memref<3x5x128x256xbf16, #tpu.memory_space<vmem>>, vector<1x1x128x256xbf16>
    %128 = vector.shape_cast %127 : vector<1x1x128x256xbf16> to vector<128x256xbf16>
    %cst_96 = arith.constant dense<0.000000e+00> : vector<48x256xf32>
    %129 = tpu.matmul %126, %128, %cst_96 {dimension_numbers = #tpu.dot_dimension_numbers<[1], [0], [0], [1], [0, 0, 1, 1], [], []>} : vector<48x128xbf16>, vector<128x256xbf16>, vector<48x256xf32> -> vector<48x256xf32>
    %130 = arith.addf %124, %129 : vector<48x256xf32>
    %c8_97 = arith.constant 8 : index
    %c0_98 = arith.constant 0 : index
    %131 = vector.load %arg9[%c8_97, %c0_98] : memref<64x128xf32, #tpu.memory_space<vmem>>, vector<48x128xf32>
    %132 = arith.truncf %131 : vector<48x128xf32> to vector<48x128xbf16>
    %c2_99 = arith.constant 2 : index
    %c2_100 = arith.constant 2 : index
    %c0_101 = arith.constant 0 : index
    %c0_102 = arith.constant 0 : index
    %133 = vector.load %arg4[%c2_99, %c2_100, %c0_101, %c0_102] : memref<3x5x128x256xbf16, #tpu.memory_space<vmem>>, vector<1x1x128x256xbf16>
    %134 = vector.shape_cast %133 : vector<1x1x128x256xbf16> to vector<128x256xbf16>
    %cst_103 = arith.constant dense<0.000000e+00> : vector<48x256xf32>
    %135 = tpu.matmul %132, %134, %cst_103 {dimension_numbers = #tpu.dot_dimension_numbers<[1], [0], [0], [1], [0, 0, 1, 1], [], []>} : vector<48x128xbf16>, vector<128x256xbf16>, vector<48x256xf32> -> vector<48x256xf32>
    %136 = arith.addf %130, %135 : vector<48x256xf32>
    %c9_104 = arith.constant 9 : index
    %c0_105 = arith.constant 0 : index
    %137 = vector.load %arg9[%c9_104, %c0_105] : memref<64x128xf32, #tpu.memory_space<vmem>>, vector<48x128xf32>
    %138 = arith.truncf %137 : vector<48x128xf32> to vector<48x128xbf16>
    %c2_106 = arith.constant 2 : index
    %c3_107 = arith.constant 3 : index
    %c0_108 = arith.constant 0 : index
    %c0_109 = arith.constant 0 : index
    %139 = vector.load %arg4[%c2_106, %c3_107, %c0_108, %c0_109] : memref<3x5x128x256xbf16, #tpu.memory_space<vmem>>, vector<1x1x128x256xbf16>
    %140 = vector.shape_cast %139 : vector<1x1x128x256xbf16> to vector<128x256xbf16>
    %cst_110 = arith.constant dense<0.000000e+00> : vector<48x256xf32>
    %141 = tpu.matmul %138, %140, %cst_110 {dimension_numbers = #tpu.dot_dimension_numbers<[1], [0], [0], [1], [0, 0, 1, 1], [], []>} : vector<48x128xbf16>, vector<128x256xbf16>, vector<48x256xf32> -> vector<48x256xf32>
    %142 = arith.addf %136, %141 : vector<48x256xf32>
    %c10_111 = arith.constant 10 : index
    %c0_112 = arith.constant 0 : index
    %143 = vector.load %arg9[%c10_111, %c0_112] : memref<64x128xf32, #tpu.memory_space<vmem>>, vector<48x128xf32>
    %144 = arith.truncf %143 : vector<48x128xf32> to vector<48x128xbf16>
    %c2_113 = arith.constant 2 : index
    %c4_114 = arith.constant 4 : index
    %c0_115 = arith.constant 0 : index
    %c0_116 = arith.constant 0 : index
    %145 = vector.load %arg4[%c2_113, %c4_114, %c0_115, %c0_116] : memref<3x5x128x256xbf16, #tpu.memory_space<vmem>>, vector<1x1x128x256xbf16>
    %146 = vector.shape_cast %145 : vector<1x1x128x256xbf16> to vector<128x256xbf16>
    %cst_117 = arith.constant dense<0.000000e+00> : vector<48x256xf32>
    %147 = tpu.matmul %144, %146, %cst_117 {dimension_numbers = #tpu.dot_dimension_numbers<[1], [0], [0], [1], [0, 0, 1, 1], [], []>} : vector<48x128xbf16>, vector<128x256xbf16>, vector<48x256xf32> -> vector<48x256xf32>
    %148 = arith.addf %142, %147 : vector<48x256xf32>
    %149 = vector.extract_strided_slice %21 {offsets = [2, 0], sizes = [1, 256], strides = [1, 1]} : vector<3x256xf32> to vector<1x256xf32>
    %150 = vector.broadcast %149 : vector<1x256xf32> to vector<48x256xf32>
    %151 = arith.addf %148, %150 : vector<48x256xf32>
    %152 = vector.extract_strided_slice %151 {offsets = [0, 0], sizes = [48, 128], strides = [1, 1]} : vector<48x256xf32> to vector<48x128xf32>
    %153 = vector.extract_strided_slice %151 {offsets = [0, 128], sizes = [48, 128], strides = [1, 1]} : vector<48x256xf32> to vector<48x128xf32>
    %154 = vector.extract_strided_slice %20 {offsets = [2, 0], sizes = [1, 128], strides = [1, 1]} : vector<3x128xf32> to vector<1x128xf32>
    %155 = vector.broadcast %154 : vector<1x128xf32> to vector<48x128xf32>
    %156 = arith.addf %152, %155 : vector<48x128xf32>
    %157 = arith.negf %153 : vector<48x128xf32>
    %158 = math.exp %157 : vector<48x128xf32>
    %cst_118 = arith.constant 1.000000e+00 : f32
    %159 = vector.broadcast %cst_118 : f32 to vector<48x128xf32>
    %160 = arith.addf %159, %158 : vector<48x128xf32>
    %161 = arith.divf %159, %160 : vector<48x128xf32>
    %162 = arith.mulf %156, %161 : vector<48x128xf32>
    %163 = arith.addf %162, %131 : vector<48x128xf32>
    %cst_119 = arith.constant 0.707106769 : f32
    %164 = vector.broadcast %cst_119 : f32 to vector<48x128xf32>
    %165 = arith.mulf %163, %164 : vector<48x128xf32>
    %166 = vector.extract_strided_slice %165 {offsets = [6, 0], sizes = [32, 128], strides = [1, 1]} : vector<48x128xf32> to vector<32x128xf32>
    %167 = arith.truncf %166 : vector<32x128xf32> to vector<32x128xbf16>
    %c0_120 = arith.constant 0 : index
    %c0_121 = arith.constant 0 : index
    %168 = vector.load %arg6[%c0_120, %c0_121] : memref<128x128xbf16, #tpu.memory_space<vmem>>, vector<128x128xbf16>
    %cst_122 = arith.constant dense<0.000000e+00> : vector<32x128xf32>
    %169 = tpu.matmul %167, %168, %cst_122 {dimension_numbers = #tpu.dot_dimension_numbers<[1], [0], [0], [1], [0, 0, 1, 1], [], []>} : vector<32x128xbf16>, vector<128x128xbf16>, vector<32x128xf32> -> vector<32x128xf32>
    %c0_123 = arith.constant 0 : index
    %c0_124 = arith.constant 0 : index
    %170 = vector.load %arg7[%c0_123, %c0_124] : memref<1x128xf32, #tpu.memory_space<vmem>>, vector<1x128xf32>
    %171 = vector.broadcast %170 : vector<1x128xf32> to vector<32x128xf32>
    %172 = arith.addf %169, %171 : vector<32x128xf32>
    %cst_125 = arith.constant 1.000000e-07 : f32
    %173 = vector.broadcast %cst_125 : f32 to vector<32x128xf32>
    %174 = arith.maximumf %172, %173 : vector<32x128xf32>
    %175 = math.log %174 : vector<32x128xf32>
    %cst_126 = arith.constant 1.400000e+00 : f32
    %176 = vector.broadcast %cst_126 : f32 to vector<32x128xf32>
    %177 = arith.mulf %176, %175 : vector<32x128xf32>
    %178 = math.exp %177 : vector<32x128xf32>
    %c0_127 = arith.constant 0 : index
    %c0_128 = arith.constant 0 : index
    %c0_129 = arith.constant 0 : index
    %179 = vector.load %arg8[%c0_127, %c0_128, %c0_129] : memref<1x32x128xf32, #tpu.memory_space<vmem>>, vector<1x32x128xf32>
    %180 = vector.shape_cast %179 : vector<1x32x128xf32> to vector<32x128xf32>
    %181 = vector.shape_cast %178 : vector<32x128xf32> to vector<1x32x128xf32>
    tpu.vector_store %arg8[%c0_127, %c0_128, %c0_129], %181 {strides = array<i32>} : memref<1x32x128xf32, #tpu.memory_space<vmem>>, vector<1x32x128xf32>,
    return
  }
  func.func @transform_0(%arg0: i32, %arg1: i32) -> (i32, i32, i32, i32) {
    %c0_i32 = arith.constant 0 : i32
    %c0_i32_0 = arith.constant 0 : i32
    %c0_i32_1 = arith.constant 0 : i32
    return %arg0, %arg1, %c0_i32, %c0_i32_0 : i32, i32, i32, i32
  }
  func.func @transform_1(%arg0: i32, %arg1: i32) -> (i32, i32, i32) {
    %c0_i32 = arith.constant 0 : i32
    %c0_i32_0 = arith.constant 0 : i32
    %c0_i32_1 = arith.constant 0 : i32
    return %arg0, %c0_i32, %c0_i32_0 : i32, i32, i32
  }
  func.func @transform_2(%arg0: i32, %arg1: i32) -> (i32, i32, i32, i32) {
    %c0_i32 = arith.constant 0 : i32
    %c0_i32_0 = arith.constant 0 : i32
    %c0_i32_1 = arith.constant 0 : i32
    %c0_i32_2 = arith.constant 0 : i32
    %c0_i32_3 = arith.constant 0 : i32
    return %c0_i32, %c0_i32_0, %c0_i32_1, %c0_i32_2 : i32, i32, i32, i32
  }
  func.func @transform_3(%arg0: i32, %arg1: i32) -> (i32, i32) {
    %c0_i32 = arith.constant 0 : i32
    %c0_i32_0 = arith.constant 0 : i32
    %c0_i32_1 = arith.constant 0 : i32
    return %c0_i32, %c0_i32_0 : i32, i32
  }
  func.func @transform_4(%arg0: i32, %arg1: i32) -> (i32, i32) {
    %c0_i32 = arith.constant 0 : i32
    %c0_i32_0 = arith.constant 0 : i32
    %c0_i32_1 = arith.constant 0 : i32
    return %c0_i32, %c0_i32_0 : i32, i32
  }
  func.func @transform_5(%arg0: i32, %arg1: i32) -> (i32, i32) {
    %c0_i32 = arith.constant 0 : i32
    %c0_i32_0 = arith.constant 0 : i32
    %c0_i32_1 = arith.constant 0 : i32
    return %c0_i32, %c0_i32_0 : i32, i32
  }
  func.func @transform_6(%arg0: i32, %arg1: i32) -> (i32, i32, i32) {
    %c0_i32 = arith.constant 0 : i32
    %c0_i32_0 = arith.constant 0 : i32
    return %arg0, %arg1, %c0_i32 : i32, i32, i32
  }
}

</mosaic_0001>

<bundles_post_ra>
// kernel: tpu_custom_call.1
= control target key start
LH: loop header
LB: loop body
LE: loop exit
PB: predicated region body
PF: predicated region fallthrough
CT: control target
= control target key end

     0   :  { %s5451_s0 = inlined_call_operand.hbm [shape: f32[2,2,48,128], index: 0, kind: input, shape index: {}]   ;;  %s5452_s1 = inlined_call_operand.vmem [shape: f32[2,3,128], index: 1, kind: input, shape index: {}]   ;;  %s5453_s2 = inlined_call_operand.hbm [shape: bf16[3,5,128,256], index: 2, kind: input, shape index: {}]   ;;  %s5454_s3 = inlined_call_operand.vmem [shape: f32[3,256], index: 3, kind: input, shape index: {}]   ;;  %s5455_s4 = inlined_call_operand.hbm [shape: bf16[128,128], index: 4, kind: input, shape index: {}]   ;;  %s5456_s5 = inlined_call_operand.vmem [shape: f32[1,128], index: 5, kind: input, shape index: {}]   ;;  %s5457_s6 = inlined_call_operand.hbm [shape: f32[2,64,128], index: 6, kind: output, shape index: {}]  }
   0x1   :  { %5482 = sst [smem:[#allocation29_spill]] %s5453_s2 }
   0x2   :  { %5483 = sst [smem:[#allocation30_spill]] %s5455_s4 }
   0x3   :  { %5484 = sst [smem:[#allocation31_spill]] %s5457_s6 }
   0x4   :  { %11 = vsyncpa [#allocation4], 0 }
   0x5   :  { %13 = vsyncpa [#allocation4 + $0x1], 0 }
   0x6   :  { %14 = vsyncpa [#allocation7], 0 }
   0x7   :  { %15 = vsyncpa [#allocation5], 0 }
   0x8   :  { %17 = vsyncpa [#allocation5 + $0x1], 0  ;;  %s4741_s21 = smov 0   ;;  %s4743_s22 = smov 0  }
   0x9   :  { %s4745_s23 = smov 0   ;;  %s4747_s24 = smov 0  }
   0xa   :  { %s4749_s25 = smov 0   ;;  %s4751_s26 = smov 0  }
   0xb   :  { %s4753_s27 = smov 0   ;;  %s4755_s28 = smov 0  }
   0xc LB: > { %5485 = sst [smem:[#allocation13_spill]] %s4664_s21  ;;  %s3618_s29 = sadd.s32 4294967295, %s4692_s28   ;;  %s4692_s28 = sphi %s4755_s28, %s23_s28   ;;  %s4688_s27 = sphi %s4753_s27, %s5540_s27   ;;  %s4684_s26 = sphi %s4751_s26, %s5539_s26   ;;  %s4680_s25 = sphi %s4749_s25, %s5538_s25   ;;  %s4676_s24 = sphi %s4747_s24, %s5537_s24   ;;  %s4672_s23 = sphi %s4745_s23, %s5536_s23   ;;  %s4668_s22 = sphi %s4743_s22, %s5535_s22   ;;  %s4664_s21 = sphi %s4741_s21, %s5534_s21  }
   0xd   : > { %5486 = sst [smem:[#allocation14_spill]] %s4692_s28  ;;  %s3619_s30 = sadd.s32 4294967294, %s4692_s28  }
   0xe   : > { %p57_p0 = scmp.ne.s32.totalorder %s4668_s22, %s4664_s21  ;;  %p4785_p1 = scmp.eq.s32.totalorder %s3618_s29, 0 }
   0xf   : > { %p4789_p2 = scmp.eq.s32.totalorder %s3618_s29, 3  ;;  %p199_p3 = scmp.eq.s32.totalorder %s3619_s30, 3 }
  0x10   : > { %p4795_p4 = por %p4785_p1, %p57_p0  ;;  %p3620_p5 = scmp.ge.s32.totalorder %s4692_s28, 1 }
  0x11   : > { %p4800_p6 = por %p199_p3, %p57_p0  ;;  %p206_p7 = scmp.lt.s32.totalorder %s4692_s28, 5 }
  0x12   : > { %s4694_s12 = smov [#allocation6]   ;;  %s4695_s15 = smov [#allocation8]  }
  0x13   : > { %s5490_s10 = scalar_select %p4800_p6, 1, 0 }
  0x14   : > { %p4805_p8 = pnand %p3620_p5, %p206_p7  ;;  %s218_s13 = sshll.u32 %s4694_s12, 4  ;;  %s219_s13 = int_to_ptr.vmem [resolvable:$true] %s218_s13 }
  0x15   : > { %5491 = sst [smem:[#allocation15_spill]] %s5490_s10  ;;  %s234_s16 = sshll.u32 %s4695_s15, 4  ;;  %s235_s16 = int_to_ptr.vmem [resolvable:$true] %s234_s16 }
  0x16   : > { %p3956_p9 = pneg %p4805_p8  ;;  %s4523_s17 = scalar_lea.vmem %s219_s13, 30720 }
  0x17   : > { %p4524_p12 = scmp.ne.s32.totalorder %s219_s13, %s4523_s17  ;;  %p4531_p3 = scmp.lt.s32.totalorder %s219_s13, %s219_s13 }
  0x18   : > { %p4813_p10 = pnand %p3956_p9, %p4785_p1  ;;  %p4532_p5 = scmp.lt.s32.totalorder %s4523_s17, %s4523_s17 }
  0x1a   : > { %p4514_p11 = pneg %p4813_p10  ;;  %p4533_p7 = por %p4532_p5, %p4531_p3 }
  0x1c   : > { %p4526_p13 = pnand %p4524_p12, %p4514_p11 }
  0x1e   : > { %p4527_p0 = pneg %p4526_p13 }
  0x20   : > { %p4534_p9 = pnand %p4533_p7, %p4527_p0 }
  0x22   : > { %4537 = shalt.err (!%p4534_p9)
}
  0x23   : > { %s5458_s18 = smov 128   ;;  %s5459_s19 = smov 8  }
  0x24   : > { %s5494_s2 = sld [smem:[#allocation29_spill]]  ;;  %s4549_s30 = scalar_lea.vmem %s235_s16, 1024 }
  0x25   : > { %p4550_p12 = scmp.ne.s32.totalorder %s235_s16, %s4549_s30  ;;  %p4557_p0 = scmp.lt.s32.totalorder %s235_s16, %s235_s16 }
  0x26   : > { %p4558_p5 = scmp.lt.s32.totalorder %s4549_s30, %s4549_s30 }
  0x27   : > { %p4552_p13 = pnand %p4550_p12, %p4514_p11 }
  0x28   : > { %p4559_p7 = por %p4558_p5, %p4557_p0 }
  0x29   : > { %p4553_p3 = pneg %p4552_p13 }
  0x2a   : > { %3959 = dma.hbm_to_vmem [thread:$0]  (!%p4813_p10), %s5494_s2, 30720, %s219_s13, [#allocation7], %s5458_s18, %s5458_s18, %s5459_s19  }
  0x2b   : > { %p4560_p9 = pnand %p4559_p7, %p4553_p3 }
  0x2d   : > { %4563 = shalt.err (!%p4560_p9)
}
  0x2e   : > { %s4698_s12 = smov 64   ;;  %s4699_s13 = smov 4  }
  0x2f   : > { %s5495_s4 = sld [smem:[#allocation30_spill]]  ;;  %s32_s20 = sadd.s32 1, %s4684_s26 }
  0x30   : > { %s35_s29 = sadd.s32 1, %s4688_s27  ;;  %p33_p11 = scmp.ge.s32.totalorder %s32_s20, 2 }
  0x31   : > { %s44_s30 = sadd.s32 1, %s4672_s23  ;;  %p51_p12 = scmp.ne.s32.totalorder %s4672_s23, %s4668_s22 }
  0x32   : > { %p52_p13 = scmp.eq.s32.totalorder %s4692_s28, 0  ;;  %s5542_s20 = smov (%p33_p11, %s32_s20), 0 }
  0x33   : > { %5496 = sst [smem:[#allocation16_spill]] %s5542_s20  ;;  %s5544_s29 = smov (!%p33_p11, %s35_s29), %s4688_s27 }
  0x34   : > { %s40_s18 = ssub.s32 %s4684_s26, %s5542_s20  ;;  %p4849_p3 = por %p52_p13, %p51_p12 }
  0x35   : > { %3962 = dma.hbm_to_vmem [thread:$0]  (!%p4813_p10), %s5495_s4, 1024, %s235_s16, [#allocation7], %s4698_s12, %s4698_s12, %s4699_s13  }
  0x36   : > { %p37_p10 = scmp.ge.s32.totalorder %s5544_s29, 2  ;;  %p4855_p0 = por %p4789_p2, %p51_p12 }
  0x37   : > { %p3973_p5 = scmp.lt.s32.totalorder %s4692_s28, 4  ;;  %s251_s12 = sand.u32 1, %s4672_s23  }
  0x38   : > { %s5498_s16 = scalar_select %p4855_p0, 1, 0 }
  0x39   : > { %s5546_s29 = smov (%p37_p10, %s5544_s29), 0  ;;  %s3940_s13 = smul.u32 48, %s251_s12 }
  0x3a   : > { %5499 = sst [smem:[#allocation17_spill]] %s5498_s16  ;;  %s39_s15 = ssub.s32 %s4688_s27, %s5546_s29 }
  0x3b   : > { %5500 = sst [smem:[#allocation18_spill]] %s5546_s29  ;;  %s3941_s17 = smul.u32 6, %s4684_s26 }
  0x3c   : > { %s41_s19 = sor.u32 %s40_s18, %s39_s15  ;;  %s3942_s2 = smul.u32 12, %s4688_s27 }
  0x3d   : > { %p42_p7 = scmp.eq.s32.totalorder %s41_s19, 0  ;;  %s255_s4 = scalar_lea.vmem [#allocation3], %s3940_s13 }
  0x3e   : > { %s264_s20 = sshll.u32 %s255_s4, 4  ;;  %p4869_p9 = pnand %p3973_p5, %p4849_p3  ;;  %s265_s20 = int_to_ptr.vmem [resolvable:$true] %s264_s20 }
  0x3f   : > { %s4874_s10 = scalar_select %p42_p7, %s4672_s23, %s44_s30  }
  0x40   : > { %s261_s21 = sadd.s32 %s3942_s2, %s3941_s17  ;;  %s252_s18 = scalar_lea.sflag [#allocation4], %s251_s12 }
  0x41   : > { %s3624_s28 = sshll.u32 %s261_s21, 7  ;;  %p4566_p2 = pneg %p4869_p9 }
  0x42   : > { %s263_s29 = scalar_lea.hbm %s5451_s0, %s3624_s28  ;;  %s4577_s19 = scalar_lea.vmem %s265_s20, 768 }
  0x43   : > { %p4578_p11 = scmp.ne.s32.totalorder %s265_s20, %s4577_s19  ;;  %s4700_s4 = smov [#allocation3]  }
  0x44   : > { %s4582_s14 = sshll.u32 %s4700_s4, 4  ;;  %s4583_s14 = int_to_ptr.vmem [resolvable:$false] %s4582_s14 }
  0x45   : > { %p4580_p12 = pnand %p4578_p11, %p4566_p2  ;;  %s4584_s13 = scalar_lea.vmem %s4583_s14, 1536 }
  0x46   : > { %p4585_p3 = scmp.lt.s32.totalorder %s265_s20, %s4583_s14  ;;  %p4586_p10 = scmp.lt.s32.totalorder %s4584_s13, %s4577_s19 }
  0x47   : > { %p4581_p13 = pneg %p4580_p12 }
  0x48   : > { %p4587_p5 = por %p4586_p10, %p4585_p3 }
  0x4a   : > { %p4588_p7 = pnand %p4587_p5, %p4581_p13 }
  0x4c   : > { %4591 = shalt.err (!%p4588_p7)
}
  0x4d   : > { %s5502_s2 = smov 8   ;;  %s5503_s6 = smov 128  }
  0x4e   : > { %3966 = dma.hbm_to_vmem [thread:$0]  (!%p4869_p9), %s263_s29, 768, %s265_s20, %s252_s18, %s5503_s6, %s5503_s6, %s5502_s2  }
  0x4f   : > { %283 = sbr.rel (%p4805_p8) target bundleno = 1335 (0x537), region = 44 }
  0x54   : > { %s4889_s21 = sand.u32 1, %s4668_s22  }
  0x55   : > { %s3943_s28 = smul.u32 48, %s4889_s21  ;;  %s286_s30 = scalar_lea.sflag [#allocation4], %s4889_s21 }
  0x57   : > { %s4893_s16 = scalar_lea.vmem [#allocation3], %s3943_s28 }
  0x58   : > { %4651 = dma.done.wait (%p4795_p4), %s286_s30, 768  }
  0x59   : > { %4653 = vsyncadd (%p4795_p4), %s286_s30, 4294966528 }
  0x5a   : > { %4655 = dma.done.wait (%p4785_p1), [#allocation7], 31744  }
  0x5b   : > { %4657 = vsyncadd (%p4785_p1), [#allocation7], 4294935552  ;;  %v5469_v0 = vmov 0   ;;  %v4702_v1 = vmov 0.0   ;;  %v4051_v2 = vld [vmem:[#allocation6 + $0xf4] ss:$8 sps:$4 sm:$0xff]  }
  0x5c   : > { %561 = vmatprep.mubr.bf16.mxu0 %v5469_v0  ;;  %704 = vmatprep.mubr.bf16.mxu1 %v5469_v0  ;;  %336 = vst [vmem:[#allocation2] sm:$0xff] %v4702_v1  ;;  %337 = vst [vmem:[#allocation2 + $0x38] sm:$0xff] %v4702_v1  ;;  %v4053_v3 = vld [vmem:[#allocation6 + $0x74] ss:$8 sps:$4 sm:$0xff]   ;;  %v4055_v4 = vld [vmem:[#allocation6 + $0xf0] ss:$8 sps:$4 sm:$0xff]  }
  0x5d   : > { %529 = vmatprep.subr.bf16.mxu0 %v4051_v2  ;;  %v4056_v5 = vld [vmem:[#allocation6 + $0x70] ss:$8 sps:$4 sm:$0xff]   ;;  %672 = vmatprep.subr.bf16.mxu1 %v4053_v3  ;;  %v4057_v6 = vld [vmem:[#allocation6 + $0xe4] ss:$8 sps:$4 sm:$0xff]   ;;  %v4061_v8 = vld [vmem:[#allocation6 + $0xe0] ss:$8 sps:$4 sm:$0xff]  }
  0x5e   : > { %530 = vmatpush1.bf16.msra.mxu0 %v4055_v4  ;;  %673 = vmatpush1.bf16.msra.mxu1 %v4056_v5  ;;  %v4059_v7 = vld [vmem:[#allocation6 + $0x64] ss:$8 sps:$4 sm:$0xff]   ;;  %v4062_v9 = vld [vmem:[#allocation6 + $0x60] ss:$8 sps:$4 sm:$0xff]   ;;  %v4063_v10 = vld [vmem:[#allocation6 + $0xd4] ss:$8 sps:$4 sm:$0xff]  }
  0x5f   : > { %531 = vmatprep.subr.bf16.mxu0 %v4057_v6  ;;  %674 = vmatprep.subr.bf16.mxu1 %v4059_v7  ;;  %v4065_v11 = vld [vmem:[#allocation6 + $0x54] ss:$8 sps:$4 sm:$0xff]   ;;  %v4067_v12 = vld [vmem:[#allocation6 + $0xd0] ss:$8 sps:$4 sm:$0xff]   ;;  %v4069_v14 = vld [vmem:[#allocation6 + $0xc4] ss:$8 sps:$4 sm:$0xff]  }
  0x60   : > { %v4068_v13 = vld [vmem:[#allocation6 + $0x50] ss:$8 sps:$4 sm:$0xff]   ;;  %v4071_v15 = vld [vmem:[#allocation6 + $0x44] ss:$8 sps:$4 sm:$0xff]   ;;  %v4073_v16 = vld [vmem:[#allocation6 + $0xc0] ss:$8 sps:$4 sm:$0xff]  }
  0x61   : > { %v4074_v17 = vld [vmem:[#allocation6 + $0x40] ss:$8 sps:$4 sm:$0xff]   ;;  %v4075_v18 = vld [vmem:[#allocation6 + $0xb4] ss:$8 sps:$4 sm:$0xff]   ;;  %v4079_v20 = vld [vmem:[#allocation6 + $0xb0] ss:$8 sps:$4 sm:$0xff]  }
  0x62   : > { %532 = vmatpush1.bf16.msra.mxu0 %v4061_v8  ;;  %675 = vmatpush1.bf16.msra.mxu1 %v4062_v9  ;;  %v4077_v19 = vld [vmem:[#allocation6 + $0x34] ss:$8 sps:$4 sm:$0xff]   ;;  %v4080_v21 = vld [vmem:[#allocation6 + $0x30] ss:$8 sps:$4 sm:$0xff]   ;;  %v4081_v22 = vld [vmem:[#allocation6 + $0xa4] ss:$8 sps:$4 sm:$0xff]  }
  0x63   : > { %533 = vmatprep.subr.bf16.mxu0 %v4063_v10  ;;  %676 = vmatprep.subr.bf16.mxu1 %v4065_v11  ;;  %v4083_v23 = vld [vmem:[#allocation6 + $0x24] ss:$8 sps:$4 sm:$0xff]   ;;  %v4085_v24 = vld [vmem:[#allocation6 + $0xa0] ss:$8 sps:$4 sm:$0xff]   ;;  %v4087_v26 = vld [vmem:[#allocation6 + $0x94] ss:$8 sps:$4 sm:$0xff]  }
  0x64   : > { %v4086_v25 = vld [vmem:[#allocation6 + $0x20] ss:$8 sps:$4 sm:$0xff]   ;;  %v4089_v27 = vld [vmem:[#allocation6 + $0x14] ss:$8 sps:$4 sm:$0xff]   ;;  %v4091_v30 = vld [vmem:[#allocation6 + $0x90] ss:$8 sps:$4 sm:$0xff]  }
  0x65   : > { %v4906_v28 = vld [vmem:[%s4893_s16] sm:$0xff]  ;;  %v4909_v29 = vld [vmem:[%s4893_s16 + $0x8] sm:$0xff]  ;;  %v4914_v46 = vld [vmem:[%s4893_s16 + $0x10] sm:$0xff]  ;;  %p330_p1 = scmp.lt.s32.totalorder %s4680_s25, 1  ;;  %s3630_s29 = sshll.u32 %s4676_s24, 5 }
  0x66   : > { %534 = vmatpush1.bf16.msra.mxu0 %v4067_v12  ;;  %677 = vmatpush1.bf16.msra.mxu1 %v4068_v13  ;;  %344 = vst [vmem:[#allocation2 + $0x8] sm:$0xff] %v4906_v28  ;;  %345 = vst [vmem:[#allocation2 + $0x10] sm:$0xff] %v4909_v29  ;;  %v4092_v31 = vld [vmem:[#allocation6 + $0x10] ss:$8 sps:$4 sm:$0xff]   ;;  %v4093_v32 = vld [vmem:[#allocation6 + $0x84] ss:$8 sps:$4 sm:$0xff]  }
  0x67   : > { %535 = vmatprep.subr.bf16.mxu0 %v4069_v14  ;;  %678 = vmatprep.subr.bf16.mxu1 %v4071_v15  ;;  %v4095_v33 = vld [vmem:[#allocation6 + $0x4] ss:$8 sps:$4 sm:$0xff]   ;;  %v4097_v34 = vld [vmem:[#allocation6 + $0x80] ss:$8 sps:$4 sm:$0xff]   ;;  %v4101_v36 = vld [vmem:[#allocation6 + $0x174] ss:$8 sps:$4 sm:$0xff]  }
  0x68   : > { %v4098_v35 = vld [vmem:[#allocation6] ss:$8 sps:$4 sm:$0xff]   ;;  %v4104_v37 = vld [vmem:[#allocation6 + $0x1f4] ss:$8 sps:$4 sm:$0xff]   ;;  %v4099_v42 = vld [vmem:[#allocation6 + $0x170] ss:$8 sps:$4 sm:$0xff]  }
  0x69   : > { %v4102_v45 = vld [vmem:[#allocation6 + $0x1f0] ss:$8 sps:$4 sm:$0xff]   ;;  %v4107_v48 = vld [vmem:[#allocation6 + $0x164] ss:$8 sps:$4 sm:$0xff]   ;;  %346 = vst [vmem:[#allocation2 + $0x18] sm:$0xff] %v4914_v46  ;;  %s331_s11 = scalar_select %p330_p1, %s4680_s25, 1 }
  0x6a   : > { %536 = vmatpush1.bf16.msra.mxu0 %v4073_v16  ;;  %679 = vmatpush1.bf16.msra.mxu1 %v4074_v17  ;;  %v4917_v47 = vld [vmem:[%s4893_s16 + $0x18] sm:$0xff]  ;;  %v4922_v54 = vld [vmem:[%s4893_s16 + $0x20] sm:$0xff]  ;;  %v4925_v55 = vld [vmem:[%s4893_s16 + $0x28] sm:$0xff]  ;;  %s3631_s8 = sadd.s32 4294967290, %s3630_s29  ;;  %s3628_s13 = sshll.u32 %s4889_s21, 5 }
  0x6b   : > { %537 = vmatprep.subr.bf16.mxu0 %v4075_v18  ;;  %680 = vmatprep.subr.bf16.mxu1 %v4077_v19  ;;  %347 = vst [vmem:[#allocation2 + $0x20] sm:$0xff] %v4917_v47  ;;  %v4110_v49 = vld [vmem:[#allocation6 + $0x1e4] ss:$8 sps:$4 sm:$0xff]   ;;  %v4105_v50 = vld [vmem:[#allocation6 + $0x160] ss:$8 sps:$4 sm:$0xff]   ;;  %348 = vst [vmem:[#allocation2 + $0x28] sm:$0xff] %v4922_v54 }
  0x6c   : > { %v4108_v51 = vld [vmem:[#allocation6 + $0x1e0] ss:$8 sps:$4 sm:$0xff]   ;;  %v4113_v52 = vld [vmem:[#allocation6 + $0x154] ss:$8 sps:$4 sm:$0xff]   ;;  %v4111_v56 = vld [vmem:[#allocation6 + $0x150] ss:$8 sps:$4 sm:$0xff]  }
  0x6d   : > { %v423_v38 = vld [vmem:[#allocation2 + $0x7] sm:$0xff]  ;;  %v424_v39 = vld [vmem:[#allocation2 + $0xf] sm:$0xff]  ;;  %349 = vst [vmem:[#allocation2 + $0x30] sm:$0xff] %v4925_v55  ;;  %s3629_s20 = sshll.u32 %s331_s11, 2  ;;  %s3905_s2 = sshll.u32 %s4676_s24, 2 }
  0x6e   : > { %538 = vmatpush1.bf16.msra.mxu0 %v4079_v20  ;;  %681 = vmatpush1.bf16.msra.mxu1 %v4080_v21  ;;  %v398_v40 = vld [vmem:[#allocation2 + $0x6] sm:$0xff]  ;;  %v399_v41 = vld [vmem:[#allocation2 + $0xe] sm:$0xff]  ;;  %v429_v43 = vpack.c.bf16 %v424_v39, %v423_v38  ;;  %s5039_s17 = scalar_lea.vmem %s5452_s1, %s3629_s20  ;;  %s3906_s6 = sshll.u32 %s4680_s25, 3 }
  0x6f   : > { %539 = vmatprep.subr.bf16.mxu0 %v4081_v22  ;;  %682 = vmatprep.subr.bf16.mxu1 %v4083_v23  ;;  %v404_v44 = vpack.c.bf16 %v399_v41, %v398_v40  ;;  %v4116_v53 = vld [vmem:[#allocation6 + $0x1d4] ss:$8 sps:$4 sm:$0xff]   ;;  %v4114_v60 = vld [vmem:[#allocation6 + $0x1d0] ss:$8 sps:$4 sm:$0xff]   ;;  %v4119_v1 = vld [vmem:[#allocation6 + $0x144] ss:$8 sps:$4 sm:$0xff]   ;;  %s3494_s28 = sadd.s32 %s3906_s6, %s3905_s2 }
  0x70   : > { %v425_v57 = vld [vmem:[#allocation2 + $0x17] sm:$0xff]  ;;  %v4122_v2 = vld [vmem:[#allocation6 + $0x1c4] ss:$8 sps:$4 sm:$0xff]   ;;  %v4117_v3 = vld [vmem:[#allocation6 + $0x140] ss:$8 sps:$4 sm:$0xff]   ;;  %s329_s16 = scalar_lea.vmem [#allocation9], %s3628_s13 }
  0x71   : > { %v400_v59 = vld [vmem:[#allocation2 + $0x16] sm:$0xff]  ;;  %v4120_v4 = vld [vmem:[#allocation6 + $0x1c0] ss:$8 sps:$4 sm:$0xff]   ;;  %v4131_v15 = vld [vmem:[#allocation6 + $0x124] ss:$8 sps:$4 sm:$0xff]   ;;  %s3907_s7 = sshll.u32 %s3494_s28, 7 }
  0x72   : > { %540 = vmatpush1.bf16.msra.mxu0 %v4085_v24  ;;  %683 = vmatpush1.bf16.msra.mxu1 %v4086_v25  ;;  %v426_v58 = vld [vmem:[#allocation2 + $0x1f] sm:$0xff]  ;;  %v427_v7 = vld [vmem:[#allocation2 + $0x27] sm:$0xff]  ;;  %v4123_v13 = vld [vmem:[#allocation6 + $0x130] ss:$8 sps:$4 sm:$0xff]   ;;  %s3497_s9 = sshll.u32 %s329_s16, 4  ;;  %s5528_s29 = sld [smem:[#allocation31_spill]]  ;;  %s5398_s9 = int_to_ptr.vmem [resolvable:$true] %s3497_s9 }
  0x73   : > { %541 = vmatprep.subr.bf16.mxu0 %v4087_v26  ;;  %684 = vmatprep.subr.bf16.mxu1 %v4089_v27  ;;  %v430_v61 = vpack.c.bf16 %v426_v58, %v425_v57  ;;  %v401_v62 = vld [vmem:[#allocation2 + $0x1e] sm:$0xff]  ;;  %v402_v9 = vld [vmem:[#allocation2 + $0x26] sm:$0xff]  ;;  %v4126_v14 = vld [vmem:[#allocation6 + $0x1b0] ss:$8 sps:$4 sm:$0xff]   ;;  %s3482_s24 = scalar_lea.sflag [#allocation5], %s4889_s21  ;;  %s4592_s25 = scalar_lea.vmem %s5398_s9, 512 }
  0x74   : > { %v405_v63 = vpack.c.bf16 %v401_v62, %v400_v59  ;;  %v4125_v5 = vld [vmem:[#allocation6 + $0x134] ss:$8 sps:$4 sm:$0xff]   ;;  %v4134_v16 = vld [vmem:[#allocation6 + $0x1a4] ss:$8 sps:$4 sm:$0xff]   ;;  %v4129_v17 = vld [vmem:[#allocation6 + $0x120] ss:$8 sps:$4 sm:$0xff]   ;;  %p4593_p4 = scmp.ne.s32.totalorder %s5398_s9, %s4592_s25 }
  0x75   : > { %v4128_v6 = vld [vmem:[#allocation6 + $0x1b4] ss:$8 sps:$4 sm:$0xff]   ;;  %v4132_v18 = vld [vmem:[#allocation6 + $0x1a0] ss:$8 sps:$4 sm:$0xff]   ;;  %v4135_v21 = vld [vmem:[#allocation6 + $0x110] ss:$8 sps:$4 sm:$0xff]  }
  0x76   : > { %542 = vmatpush1.bf16.msra.mxu0 %v4091_v30  ;;  %685 = vmatpush1.bf16.msra.mxu1 %v4092_v31  ;;  %v428_v8 = vld [vmem:[#allocation2 + $0x2f] sm:$0xff]  ;;  %v4141_v25 = vld [vmem:[#allocation6 + $0x100] ss:$8 sps:$4 sm:$0xff]   ;;  %p4594_p8 = pnand %p4593_p4, %p4855_p0  ;;  %s4703_s15 = smov [#allocation9]  }
  0x77   : > { %543 = vmatprep.subr.bf16.mxu0 %v4093_v32  ;;  %686 = vmatprep.subr.bf16.mxu1 %v4095_v33  ;;  %v403_v10 = vld [vmem:[#allocation2 + $0x2e] sm:$0xff]  ;;  %v431_v11 = vpack.c.bf16 %v428_v8, %v427_v7  ;;  %v4144_v26 = vld [vmem:[#allocation6 + $0x180] ss:$8 sps:$4 sm:$0xff]   ;;  %v741_v33 = vpack.c.bf16 %v4909_v29, %v4906_v28  ;;  %v742_v28 = vpack.c.bf16 %v4917_v47, %v4914_v46 }
  0x78   : > { %v406_v12 = vpack.c.bf16 %v403_v10, %v402_v9  ;;  %v4137_v19 = vld [vmem:[#allocation6 + $0x114] ss:$8 sps:$4 sm:$0xff]   ;;  %v4138_v22 = vld [vmem:[#allocation6 + $0x190] ss:$8 sps:$4 sm:$0xff]   ;;  %v4143_v23 = vld [vmem:[#allocation6 + $0x104] ss:$8 sps:$4 sm:$0xff]   ;;  %v743_v46 = vpack.c.bf16 %v4925_v55, %v4922_v54  ;;  %s5396_s12 = scalar_lea.hbm %s5528_s29, %s3907_s7  ;;  %p4595_p9 = pneg %p4594_p8 }
  0x79   : > { %v4140_v20 = vld [vmem:[#allocation6 + $0x194] ss:$8 sps:$4 sm:$0xff]   ;;  %v4146_v24 = vld [vmem:[#allocation6 + $0x184] ss:$8 sps:$4 sm:$0xff]   ;;  %v4147_v32 = vld [vmem:[#allocation6 + $0x270] ss:$8 sps:$4 sm:$0xff]  }
  0x7a   : > { %544 = vmatpush1.bf16.msra.mxu0 %v4097_v34  ;;  %687 = vmatpush1.bf16.msra.mxu1 %v4098_v35  ;;  %v916_v27 = vld [vmem:[#allocation2 + $0x9] sm:$0xff]  ;;  %v917_v30 = vld [vmem:[#allocation2 + $0x11] sm:$0xff]  ;;  %v919_v38 = vld [vmem:[#allocation2 + $0x21] sm:$0xff] }
  0x7b   : > { %841 = vmatprep.subr.bf16.mxu0 %v4101_v36  ;;  %1022 = vmatprep.subr.bf16.mxu1 %v4104_v37  ;;  %v4149_v31 = vld [vmem:[#allocation6 + $0x274] ss:$8 sps:$4 sm:$0xff]   ;;  %v922_v34 = vpack.c.bf16 %v917_v30, %v916_v27  ;;  %v4152_v35 = vld [vmem:[#allocation6 + $0x264] ss:$8 sps:$4 sm:$0xff]   ;;  %v4150_v36 = vld [vmem:[#allocation6 + $0x260] ss:$8 sps:$4 sm:$0xff]  }
  0x7c   : > { %v918_v37 = vld [vmem:[#allocation2 + $0x19] sm:$0xff]  ;;  %v4158_v41 = vld [vmem:[#allocation6 + $0x244] ss:$8 sps:$4 sm:$0xff]  }
  0x7d   : > { %562 = vmatmul.mubr.bf16.vlgmr.msra.gmra.mxu0 %v429_v43  ;;  %705 = vmatmul.mubr.bf16.vlgmr.msra.gmra.mxu1 %v404_v44  ;;  %v4155_v39 = vld [vmem:[#allocation6 + $0x254] ss:$8 sps:$4 sm:$0xff]   ;;  %v4153_v40 = vld [vmem:[#allocation6 + $0x250] ss:$8 sps:$4 sm:$0xff]   ;;  %v923_v29 = vpack.c.bf16 %v919_v38, %v918_v37  ;;  %v1100_v59 = vld [vmem:[#allocation2 + $0x22] sm:$0xff] }
  0x7e   : > { %842 = vmatpush1.bf16.msra.mxu0 %v4099_v42  ;;  %1023 = vmatpush1.bf16.msra.mxu1 %v4102_v45  ;;  %v4156_v42 = vld [vmem:[#allocation6 + $0x240] ss:$8 sps:$4 sm:$0xff]   ;;  %v921_v44 = vld [vmem:[#allocation2 + $0x31] sm:$0xff] }
  0x7f   : > { %843 = vmatprep.subr.bf16.mxu0 %v4107_v48  ;;  %1024 = vmatprep.subr.bf16.mxu1 %v4110_v49  ;;  %v920_v43 = vld [vmem:[#allocation2 + $0x29] sm:$0xff]  ;;  %v4161_v45 = vld [vmem:[#allocation6 + $0x234] ss:$8 sps:$4 sm:$0xff]  }
  0x80   : > { %571 = vmatprep.mubr.bf16.mxu0 %v5469_v0  ;;  %714 = vmatprep.mubr.bf16.mxu1 %v5469_v0  ;;  %v4159_v48 = vld [vmem:[#allocation6 + $0x230] ss:$8 sps:$4 sm:$0xff]   ;;  %v924_v47 = vpack.c.bf16 %v921_v44, %v920_v43  ;;  %v4164_v49 = vld [vmem:[#allocation6 + $0x224] ss:$8 sps:$4 sm:$0xff]   ;;  %v4177_v7 = vld [vmem:[#allocation6 + $0x360] ss:$8 sps:$4 sm:$0xff]  }
  0x81   : > { %v1097_v54 = vld [vmem:[#allocation2 + $0xa] sm:$0xff]  ;;  %v1098_v55 = vld [vmem:[#allocation2 + $0x12] sm:$0xff]  ;;  %v1099_v58 = vld [vmem:[#allocation2 + $0x1a] sm:$0xff] }
  0x82   : > { %844 = vmatpush1.bf16.msra.mxu0 %v4105_v50  ;;  %1025 = vmatpush1.bf16.msra.mxu1 %v4108_v51  ;;  %v4162_v50 = vld [vmem:[#allocation6 + $0x220] ss:$8 sps:$4 sm:$0xff]   ;;  %v4167_v51 = vld [vmem:[#allocation6 + $0x214] ss:$8 sps:$4 sm:$0xff]   ;;  %v1103_v57 = vpack.c.bf16 %v1098_v55, %v1097_v54  ;;  %v4207_v27 = vld [vmem:[#allocation6 + $0x310] ss:$8 sps:$4 sm:$0xff]  }
  0x83   : > { %845 = vmatprep.subr.bf16.mxu0 %v4113_v52  ;;  %1026 = vmatprep.subr.bf16.mxu1 %v4116_v53  ;;  %v4165_v52 = vld [vmem:[#allocation6 + $0x210] ss:$8 sps:$4 sm:$0xff]   ;;  %v4170_v53 = vld [vmem:[#allocation6 + $0x204] ss:$8 sps:$4 sm:$0xff]   ;;  %v4180_v8 = vld [vmem:[#allocation6 + $0x2e0] ss:$8 sps:$4 sm:$0xff]  }
  0x84   : > { %v1102_v62 = vld [vmem:[#allocation2 + $0x32] sm:$0xff] }
  0x85   : > { %572 = vmatmul.mubr.bf16.gmra.mxu0 %v430_v61  ;;  %715 = vmatmul.mubr.bf16.gmra.mxu1 %v405_v63  ;;  %v1101_v61 = vld [vmem:[#allocation2 + $0x2a] sm:$0xff]  ;;  %v4185_v9 = vld [vmem:[#allocation6 + $0x354] ss:$8 sps:$4 sm:$0xff]  }
  0x86   : > { %846 = vmatpush1.bf16.msra.mxu0 %v4111_v56  ;;  %1027 = vmatpush1.bf16.msra.mxu1 %v4114_v60  ;;  %v4168_v56 = vld [vmem:[#allocation6 + $0x200] ss:$8 sps:$4 sm:$0xff]   ;;  %v1104_v60 = vpack.c.bf16 %v1100_v59, %v1099_v58  ;;  %v1105_v63 = vpack.c.bf16 %v1102_v62, %v1101_v61  ;;  %v4188_v10 = vld [vmem:[#allocation6 + $0x2d4] ss:$8 sps:$4 sm:$0xff]   ;;  %v4210_v30 = vld [vmem:[#allocation6 + $0x290] ss:$8 sps:$4 sm:$0xff]  }
  0x87   : > { %847 = vmatprep.subr.bf16.mxu0 %v4119_v1  ;;  %1028 = vmatprep.subr.bf16.mxu1 %v4122_v2  ;;  %v4173_v1 = vld [vmem:[#allocation6 + $0x374] ss:$8 sps:$4 sm:$0xff]  }
  0x88   : > { %581 = vmatprep.mubr.bf16.mxu0 %v5469_v0  ;;  %724 = vmatprep.mubr.bf16.mxu1 %v5469_v0  ;;  %v4176_v2 = vld [vmem:[#allocation6 + $0x2f4] ss:$8 sps:$4 sm:$0xff]  }
  0x8a   : > { %848 = vmatpush1.bf16.msra.mxu0 %v4117_v3  ;;  %1029 = vmatpush1.bf16.msra.mxu1 %v4120_v4  ;;  %v4171_v3 = vld [vmem:[#allocation6 + $0x370] ss:$8 sps:$4 sm:$0xff]  }
  0x8b   : > { %849 = vmatprep.subr.bf16.mxu0 %v4125_v5  ;;  %1030 = vmatprep.subr.bf16.mxu1 %v4128_v6  ;;  %v4174_v4 = vld [vmem:[#allocation6 + $0x2f0] ss:$8 sps:$4 sm:$0xff]   ;;  %v4179_v5 = vld [vmem:[#allocation6 + $0x364] ss:$8 sps:$4 sm:$0xff]  }
  0x8c   : > { %v4182_v6 = vld [vmem:[#allocation6 + $0x2e4] ss:$8 sps:$4 sm:$0xff]  }
  0x8d   : > { %582 = vmatmul.mubr.bf16.gmra.mxu0 %v431_v11  ;;  %725 = vmatmul.mubr.bf16.gmra.mxu1 %v406_v12  ;;  %v4183_v11 = vld [vmem:[#allocation6 + $0x350] ss:$8 sps:$4 sm:$0xff]  }
  0x8e   : > { %850 = vmatpush1.bf16.msra.mxu0 %v4123_v13  ;;  %1031 = vmatpush1.bf16.msra.mxu1 %v4126_v14  ;;  %v4186_v12 = vld [vmem:[#allocation6 + $0x2d0] ss:$8 sps:$4 sm:$0xff]   ;;  %v4191_v13 = vld [vmem:[#allocation6 + $0x344] ss:$8 sps:$4 sm:$0xff]  }
  0x8f   : > { %851 = vmatprep.subr.bf16.mxu0 %v4131_v15  ;;  %1032 = vmatprep.subr.bf16.mxu1 %v4134_v16  ;;  %v4194_v14 = vld [vmem:[#allocation6 + $0x2c4] ss:$8 sps:$4 sm:$0xff]   ;;  %v4189_v15 = vld [vmem:[#allocation6 + $0x340] ss:$8 sps:$4 sm:$0xff]  }
  0x90   : > { %873 = vmatprep.mubr.bf16.mxu0 %v5469_v0  ;;  %1054 = vmatprep.mubr.bf16.mxu1 %v5469_v0  ;;  %v4192_v16 = vld [vmem:[#allocation6 + $0x2c0] ss:$8 sps:$4 sm:$0xff]  }
  0x92   : > { %852 = vmatpush1.bf16.msra.mxu0 %v4129_v17  ;;  %1033 = vmatpush1.bf16.msra.mxu1 %v4132_v18  ;;  %v4197_v17 = vld [vmem:[#allocation6 + $0x334] ss:$8 sps:$4 sm:$0xff]  }
  0x93   : > { %853 = vmatprep.subr.bf16.mxu0 %v4137_v19  ;;  %1034 = vmatprep.subr.bf16.mxu1 %v4140_v20  ;;  %v4200_v18 = vld [vmem:[#allocation6 + $0x2b4] ss:$8 sps:$4 sm:$0xff]   ;;  %v4195_v19 = vld [vmem:[#allocation6 + $0x330] ss:$8 sps:$4 sm:$0xff]  }
  0x94   : > { %v4198_v20 = vld [vmem:[#allocation6 + $0x2b0] ss:$8 sps:$4 sm:$0xff]  }
  0x96   : > { %854 = vmatpush1.bf16.msra.mxu0 %v4135_v21  ;;  %1035 = vmatpush1.bf16.msra.mxu1 %v4138_v22  ;;  %v4203_v21 = vld [vmem:[#allocation6 + $0x324] ss:$8 sps:$4 sm:$0xff]  }
  0x97   : > { %855 = vmatprep.subr.bf16.mxu0 %v4143_v23  ;;  %1036 = vmatprep.subr.bf16.mxu1 %v4146_v24  ;;  %v4206_v22 = vld [vmem:[#allocation6 + $0x2a4] ss:$8 sps:$4 sm:$0xff]   ;;  %v4201_v23 = vld [vmem:[#allocation6 + $0x320] ss:$8 sps:$4 sm:$0xff]  }
  0x98   : > { %v4204_v24 = vld [vmem:[#allocation6 + $0x2a0] ss:$8 sps:$4 sm:$0xff]  }
  0x9a   : > { %856 = vmatpush1.bf16.msra.mxu0 %v4141_v25  ;;  %1037 = vmatpush1.bf16.msra.mxu1 %v4144_v26  ;;  %v4209_v25 = vld [vmem:[#allocation6 + $0x314] ss:$8 sps:$4 sm:$0xff]  }
  0x9b   : > { %1203 = vmatprep.subr.bf16.mxu0 %v4149_v31  ;;  %1517 = vmatprep.subr.bf16.mxu1 %v4173_v1  ;;  %v4212_v26 = vld [vmem:[#allocation6 + $0x294] ss:$8 sps:$4 sm:$0xff]   ;;  %v4215_v31 = vld [vmem:[#allocation6 + $0x304] ss:$8 sps:$4 sm:$0xff]  }
  0x9d   : > { %874 = vmatmul.mubr.bf16.vlgmr.msra.gmra.mxu0 %v741_v33  ;;  %1055 = vmatmul.mubr.bf16.vlgmr.msra.gmra.mxu1 %v922_v34  ;;  %v4213_v33 = vld [vmem:[#allocation6 + $0x300] ss:$8 sps:$4 sm:$0xff]  }
  0x9e   : > { %1204 = vmatpush1.bf16.msra.mxu0 %v4147_v32  ;;  %883 = vmatprep.mubr.bf16.mxu0 %v5469_v0  ;;  %v4218_v32 = vld [vmem:[#allocation6 + $0x284] ss:$8 sps:$4 sm:$0xff]   ;;  %v4216_v34 = vld [vmem:[#allocation6 + $0x280] ss:$8 sps:$4 sm:$0xff]  }
  0x9f   : > { %1205 = vmatprep.subr.bf16.mxu0 %v4152_v35  ;;  %1064 = vmatprep.mubr.bf16.mxu1 %v5469_v0  ;;  %v4221_v35 = vld [vmem:[#allocation6 + $0x3f4] ss:$8 sps:$4 sm:$0xff]  }
  0xa0   : > { %1518 = vmatpush1.bf16.msra.mxu1 %v4171_v3 }
  0xa1   : > { %1519 = vmatprep.subr.bf16.mxu1 %v4179_v5 }
  0xa2   : > { %1206 = vmatpush1.bf16.msra.mxu0 %v4150_v36  ;;  %v4224_v36 = vld [vmem:[#allocation6 + $0x474] ss:$8 sps:$4 sm:$0xff]  }
  0xa3   : > { %1207 = vmatprep.subr.bf16.mxu0 %v4155_v39 }
  0xa4   : > { %1520 = vmatpush1.bf16.msra.mxu1 %v4177_v7 }
  0xa5   : > { %884 = vmatmul.mubr.bf16.gmra.mxu0 %v742_v28  ;;  %1065 = vmatmul.mubr.bf16.gmra.mxu1 %v923_v29 }
  0xa6   : > { %1208 = vmatpush1.bf16.msra.mxu0 %v4153_v40  ;;  %893 = vmatprep.mubr.bf16.mxu0 %v5469_v0 }
  0xa7   : > { %1209 = vmatprep.subr.bf16.mxu0 %v4158_v41  ;;  %1074 = vmatprep.mubr.bf16.mxu1 %v5469_v0 }
  0xa8   : > { %1521 = vmatprep.subr.bf16.mxu1 %v4185_v9  ;;  %v352_v9 = vlaneseq }
  0xa9   : > { %1522 = vmatpush1.bf16.msra.mxu1 %v4183_v11 }
  0xaa   : > { %1210 = vmatpush1.bf16.msra.mxu0 %v4156_v42  ;;  %1523 = vmatprep.subr.bf16.mxu1 %v4191_v13 }
  0xab   : > { %1211 = vmatprep.subr.bf16.mxu0 %v4161_v45 }
  0xad   : > { %894 = vmatmul.mubr.bf16.gmra.mxu0 %v743_v46  ;;  %1075 = vmatmul.mubr.bf16.gmra.mxu1 %v924_v47 }
  0xae   : > { %1212 = vmatpush1.bf16.msra.mxu0 %v4159_v48  ;;  %1235 = vmatprep.mubr.bf16.mxu0 %v5469_v0 }
  0xaf   : > { %1213 = vmatprep.subr.bf16.mxu0 %v4164_v49  ;;  %1549 = vmatprep.mubr.bf16.mxu1 %v5469_v0 }
  0xb0   : > { %1524 = vmatpush1.bf16.msra.mxu1 %v4189_v15 }
  0xb1   : > { %1525 = vmatprep.subr.bf16.mxu1 %v4197_v17  ;;  %v5000_v17 = vld [vmem:[%s5454_s3] sm:$0x77] }
  0xb2   : > { %1214 = vmatpush1.bf16.msra.mxu0 %v4162_v50 }
  0xb3   : > { %1215 = vmatprep.subr.bf16.mxu0 %v4167_v51 }
  0xb4   : > { %1526 = vmatpush1.bf16.msra.mxu1 %v4195_v19 }
  0xb5   : > { %1527 = vmatprep.subr.bf16.mxu1 %v4203_v21 }
  0xb6   : > { %1216 = vmatpush1.bf16.msra.mxu0 %v4165_v52 }
  0xb7   : > { %1217 = vmatprep.subr.bf16.mxu0 %v4170_v53 }
  0xb8   : > { %1528 = vmatpush1.bf16.msra.mxu1 %v4201_v23 }
  0xb9   : > { %1529 = vmatprep.subr.bf16.mxu1 %v4209_v25 }
  0xba   : > { %1218 = vmatpush1.bf16.msra.mxu0 %v4168_v56 }
  0xbb   : > { %1660 = vmatprep.subr.bf16.mxu0 %v4176_v2 }
  0xbc   : > { %1530 = vmatpush1.bf16.msra.mxu1 %v4207_v27 }
  0xbd   : > { %1236 = vmatmul.mubr.bf16.vlgmr.msra.gmra.mxu0 %v1103_v57  ;;  %1531 = vmatprep.subr.bf16.mxu1 %v4215_v31 }
  0xbe   : > { %1245 = vmatprep.mubr.bf16.mxu0 %v5469_v0  ;;  %1661 = vmatpush1.bf16.msra.mxu0 %v4174_v4 }
  0xbf   : > { %1662 = vmatprep.subr.bf16.mxu0 %v4182_v6 }
  0xc0   : > { %1532 = vmatpush1.bf16.msra.mxu1 %v4213_v33 }
  0xc1   : > { %1829 = vmatprep.subr.bf16.mxu1 %v4221_v35 }
  0xc2   : > { %1663 = vmatpush1.bf16.msra.mxu0 %v4180_v8 }
  0xc3   : > { %1664 = vmatprep.subr.bf16.mxu0 %v4188_v10 }
  0xc5   : > { %1246 = vmatmul.mubr.bf16.gmra.mxu0 %v1104_v60 }
  0xc6   : > { %1255 = vmatprep.mubr.bf16.mxu0 %v5469_v0  ;;  %1665 = vmatpush1.bf16.msra.mxu0 %v4186_v12  ;;  %v4992_v12 = vshrl.u32 %v352_v9, 7 }
  0xc7   : > { %1666 = vmatprep.subr.bf16.mxu0 %v4194_v14 }
  0xc8   : > { %5504 = vst [vmem:[#allocation19_spill] sm:$0xff] %v4992_v12  ;;  %v1285_v13 = vsub.s32 4, %v4992_v12  ;;  %v5006_v23 = vsub.s32 0, %v4992_v12 }
  0xca   : > { %1667 = vmatpush1.bf16.msra.mxu0 %v4192_v16  ;;  %v1286_v19 = vrot.slane %v5000_v17, %v1285_v13 }
  0xcb   : > { %1668 = vmatprep.subr.bf16.mxu0 %v4200_v18 }
  0xcc   : > { %v1296_v27 = vrot.slane %v1286_v19, %v5006_v23 }
  0xcd   : > { %1256 = vmatmul.mubr.bf16.gmra.mxu0 %v1105_v63 }
  0xce   : > { %1692 = vmatprep.mubr.bf16.mxu0 %v5469_v0  ;;  %1669 = vmatpush1.bf16.msra.mxu0 %v4198_v20 }
  0xcf   : > { %1670 = vmatprep.subr.bf16.mxu0 %v4206_v22 }
  0xd2   : > { %1671 = vmatpush1.bf16.msra.mxu0 %v4204_v24 }
  0xd3   : > { %1672 = vmatprep.subr.bf16.mxu0 %v4212_v26 }
  0xd6   : > { %1673 = vmatpush1.bf16.msra.mxu0 %v4210_v30 }
  0xd7   : > { %1674 = vmatprep.subr.bf16.mxu0 %v4218_v32 }
  0xda   : > { %1675 = vmatpush1.bf16.msra.mxu0 %v4216_v34 }
  0xdb   : > { %2010 = vmatprep.subr.bf16.mxu0 %v4224_v36 }
 0x13d   : > { %v4950_v37 = vpop.f32.mrf.mxu0  ;;  %v4952_v38 = vpop.f32.mrf.mxu1 }
 0x13f   : > { %v565_v39 = vpop.f32.mrf.mxu0  ;;  %v708_v40 = vpop.f32.mrf.mxu1 }
 0x140   : > { %v709_v16 = vadd.f32 %v708_v40, %v565_v39 }
 0x141   : > { %v4954_v28 = vpop.f32.mrf.mxu0  ;;  %v4956_v29 = vpop.f32.mrf.mxu1 }
 0x143   : > { %v569_v41 = vpop.f32.mrf.mxu0  ;;  %v712_v42 = vpop.f32.mrf.mxu1 }
 0x144   : > { %v713_v22 = vadd.f32 %v712_v42, %v569_v41 }
 0x145   : > { %v4958_v43 = vpop.f32.mrf.mxu0  ;;  %v4960_v44 = vpop.f32.mrf.mxu1 }
 0x147   : > { %v575_v45 = vpop.f32.mrf.mxu0  ;;  %v718_v48 = vpop.f32.mrf.mxu1 }
 0x148   : > { %v719_v32 = vadd.f32 %v718_v48, %v575_v45 }
 0x149   : > { %v4962_v46 = vpop.f32.mrf.mxu0  ;;  %v4964_v49 = vpop.f32.mrf.mxu1 }
 0x14b   : > { %v579_v47 = vpop.f32.mrf.mxu0  ;;  %v722_v51 = vpop.f32.mrf.mxu1 }
 0x14c   : > { %v723_v42 = vadd.f32 %v722_v51, %v579_v47 }
 0x14d   : > { %v4966_v50 = vpop.f32.mrf.mxu0  ;;  %v4968_v53 = vpop.f32.mrf.mxu1 }
 0x14f   : > { %v585_v52 = vpop.f32.mrf.mxu0  ;;  %v728_v54 = vpop.f32.mrf.mxu1 }
 0x151   : > { %v4970_v56 = vpop.f32.mrf.mxu0  ;;  %v4974_v57 = vpop.f32.mrf.mxu1 }
 0x153   : > { %v4972_v55 = vpop.f32.mrf.mxu0  ;;  %v732_v60 = vpop.f32.mrf.mxu1 }
 0x15d   : > { %v4976_v58 = vpop.f32.mrf.mxu0  ;;  %v4980_v62 = vpop.f32.mrf.mxu1 }
 0x15f   : > { %v877_v59 = vpop.f32.mrf.mxu0  ;;  %v1058_v2 = vpop.f32.mrf.mxu1 }
 0x160   : > { %v905_v18 = vadd.f32 %v877_v59, %v709_v16 }
 0x161   : > { %v4978_v61 = vpop.f32.mrf.mxu0  ;;  %v4986_v5 = vpop.f32.mrf.mxu1 }
 0x162   : > { %v1086_v25 = vadd.f32 %v1058_v2, %v905_v18  ;;  %v729_v18 = vadd.f32 %v728_v54, %v585_v52 }
 0x163   : > { %v881_v63 = vpop.f32.mrf.mxu0  ;;  %v1062_v7 = vpop.f32.mrf.mxu1 }
 0x164   : > { %v907_v26 = vadd.f32 %v881_v63, %v713_v22 }
 0x165   : > { %v4982_v1 = vpop.f32.mrf.mxu0  ;;  %v4990_v10 = vpop.f32.mrf.mxu1 }
 0x166   : > { %v1088_v35 = vadd.f32 %v1062_v7, %v907_v26 }
 0x167   : > { %v887_v3 = vpop.f32.mrf.mxu0  ;;  %v1068_v14 = vpop.f32.mrf.mxu1 }
 0x168   : > { %v909_v36 = vadd.f32 %v887_v3, %v719_v32 }
 0x169   : > { %v4984_v4 = vpop.f32.mrf.mxu0  ;;  %v5003_v20 = vpop.f32.mrf.mxu1 }
 0x16a   : > { %v1090_v63 = vadd.f32 %v1068_v14, %v909_v36 }
 0x16b   : > { %v891_v6 = vpop.f32.mrf.mxu0  ;;  %v1072_v30 = vpop.f32.mrf.mxu1 }
 0x16c   : > { %v911_v2 = vadd.f32 %v891_v6, %v723_v42  ;;  %v733_v6 = vadd.f32 %v732_v60, %v4972_v55  ;;  %v707_v55 = vadd.f32 %v4952_v38, %v4950_v37 }
 0x16d   : > { %v4988_v8 = vpop.f32.mrf.mxu0  ;;  %v5013_v40 = vpop.f32.mrf.mxu1 }
 0x16e   : > { %v1092_v22 = vadd.f32 %v1072_v30, %v911_v2 }
 0x16f   : > { %v897_v11 = vpop.f32.mrf.mxu0  ;;  %v1078_v45 = vpop.f32.mrf.mxu1 }
 0x171   : > { %v4995_v15 = vpop.f32.mrf.mxu0  ;;  %v5019_v51 = vpop.f32.mrf.mxu1 }
 0x173   : > { %v901_v21 = vpop.f32.mrf.mxu0  ;;  %v1082_v30 = vpop.f32.mrf.mxu1 }
 0x174   : > { %v915_v54 = vadd.f32 %v901_v21, %v733_v6  ;;  %v904_v21 = vadd.f32 %v4976_v58, %v707_v55 }
 0x176   : > { %v1096_v60 = vadd.f32 %v1082_v30, %v915_v54  ;;  %v1085_v58 = vadd.f32 %v4980_v62, %v904_v21  ;;  %v727_v30 = vadd.f32 %v4968_v53, %v4966_v50  ;;  %v5085_v21 = vld [vmem:[#allocation2] sm:$0xff] }
 0x178   : > { %v912_v55 = vadd.f32 %v4988_v8, %v727_v30  ;;  %v4254_v30 = vld [vmem:[#allocation6 + $0x424] ss:$8 sps:$4 sm:$0xff]  }
 0x17d   : > { %v5008_v24 = vpop.f32.mrf.mxu0 }
 0x17f   : > { %v1239_v31 = vpop.f32.mrf.mxu0 }
 0x180   : > { %v1267_v33 = vadd.f32 %v1239_v31, %v1086_v25  ;;  %v913_v25 = vadd.f32 %v897_v11, %v729_v18 }
 0x181   : > { %v5011_v34 = vpop.f32.mrf.mxu0 }
 0x182   : > { %v1298_v39 = vadd.f32 %v1296_v27, %v1267_v33  ;;  %v1094_v52 = vadd.f32 %v1078_v45, %v913_v25  ;;  %v711_v45 = vadd.f32 %v4956_v29, %v4954_v28  ;;  %v717_v28 = vadd.f32 %v4960_v44, %v4958_v43  ;;  %v5049_v29 = vld [vmem:[%s5039_s17] sm:$0x7] }
 0x183   : > { %v1243_v41 = vpop.f32.mrf.mxu0  ;;  %v354_v44 = vadd.s32 8, %v4992_v12 }
 0x184   : > { %v3718_v59 = vmul.f32 -1.442695, %v1298_v39  ;;  %v1269_v9 = vadd.f32 %v1243_v41, %v1088_v35 }
 0x185   : > { %v5015_v13 = vpop.f32.mrf.mxu0 }
 0x186   : > { %4419 = vpow2.f32 %v3718_v59  ;;  %v1300_v16 = vadd.f32 %v1296_v27, %v1269_v9 }
 0x187   : > { %v1249_v48 = vpop.f32.mrf.mxu0 }
 0x188   : > { %v3719_v19 = vmul.f32 -1.442695, %v1300_v16  ;;  %v1271_v7 = vadd.f32 %v1249_v48, %v1090_v63  ;;  %v1282_v16 = vrot.slane %v5000_v17, %v5006_v23  ;;  %v906_v48 = vadd.f32 %v4978_v61, %v711_v45 }
 0x189   : > { %v5017_v3 = vpop.f32.mrf.mxu0  ;;  %v908_v61 = vadd.f32 %v4982_v1, %v717_v28  ;;  %v355_v1 = vadd.s32 16, %v4992_v12 }
 0x18a   : > { %4421 = vpow2.f32 %v3719_v19  ;;  %v1302_v47 = vadd.f32 %v1296_v27, %v1271_v7  ;;  %v5044_v7 = vrot.slane %v1282_v16, %v5006_v23  ;;  %v1087_v62 = vadd.f32 %v4986_v5, %v906_v48 }
 0x18b   : > { %v1253_v26 = vpop.f32.mrf.mxu0  ;;  %v1093_v16 = vadd.f32 %v5013_v40, %v912_v55 }
 0x18c   : > { %v3720_v14 = vmul.f32 -1.442695, %v1302_v47  ;;  %v1273_v31 = vadd.f32 %v1253_v26, %v1092_v22  ;;  %v5052_v22 = vstv %s3631_s8  ;;  %v5058_v26 = vrot.slane %v5049_v29, %v5006_v23 }
 0x18d   : > { %v5023_v32 = vpop.f32.mrf.mxu0  ;;  %v360_v43 = vadd.s32 %v5052_v22, %v4992_v12  ;;  %v361_v54 = vadd.s32 %v5052_v22, %v354_v44  ;;  %v358_v44 = vadd.s32 40, %v4992_v12 }
 0x18e   : > { %4423 = vpow2.f32 %v3720_v14  ;;  %v1304_v33 = vadd.f32 %v1296_v27, %v1273_v31  ;;  %v1268_v14 = vadd.f32 %v5011_v34, %v1087_v62  ;;  %v1089_v31 = vadd.f32 %v4990_v10, %v908_v61 }
 0x18f   : > { %v1259_v11 = vpop.f32.mrf.mxu0  ;;  %vm366_vm0 = vcmp.ge.s32.totalorder %v360_v43, 0  ;;  %vm372_vm1 = vcmp.lt.s32.totalorder %v360_v43, 56  ;;  %v362_v10 = vadd.s32 %v5052_v22, %v355_v1  ;;  %vm367_vm3 = vcmp.ge.s32.totalorder %v361_v54, 0 }
 0x190   : > { %v3721_v35 = vmul.f32 -1.442695, %v1304_v33  ;;  %v1275_v36 = vadd.f32 %v1259_v11, %v1094_v52  ;;  %vm378_vm2 = vmand %vm366_vm0, %vm372_vm1  ;;  %vm373_vm4 = vcmp.lt.s32.totalorder %v361_v54, 56  ;;  %v1274_v40 = vadd.f32 %v5023_v32, %v1093_v16 }
 0x191   : > { %v5026_v39 = vpop.f32.mrf.mxu0  ;;  %vm368_vm5 = vcmp.ge.s32.totalorder %v362_v10, 0  ;;  %vm379_vm6 = vmand %vm367_vm3, %vm373_vm4  ;;  %vm374_vm7 = vcmp.lt.s32.totalorder %v362_v10, 56  ;;  %v365_v54 = vadd.s32 %v5052_v22, %v358_v44  ;;  %v4237_v44 = vld [vmem:[#allocation6 + $0x3c0] ss:$8 sps:$4 sm:$0xff]  }
 0x192   : > { %4425 = vpow2.f32 %v3721_v35  ;;  %v1306_v41 = vadd.f32 %v1296_v27, %v1275_v36  ;;  %v356_v36 = vadd.s32 24, %v4992_v12  ;;  %v5102_v28 = vsel %vm379_vm6, 1.0, %v5085_v21  ;;  %vm380_vm8 = vmand %vm368_vm5, %vm374_vm7 }
 0x193   : > { %v4420_v42 = vpop.eup %4419  ;;  %v1263_v59 = vpop.f32.mrf.mxu0  ;;  %5505 = vst [vmem:[#allocation20_spill] sm:$0xff] %v5102_v28  ;;  %vm371_vm15 = vcmp.ge.s32.totalorder %v365_v54, 0  ;;  %vm377_vm0 = vcmp.lt.s32.totalorder %v365_v54, 56 }
 0x194   : > { %v1337_v9 = vadd.f32 1.0, %v4420_v42  ;;  %v3722_v63 = vmul.f32 -1.442695, %v1306_v41  ;;  %v1277_v2 = vadd.f32 %v1263_v59, %v1096_v60  ;;  %vm383_vm1 = vmand %vm371_vm15, %vm377_vm0 }
 0x196   : > { %4427 = vrcp.f32 %v1337_v9  ;;  %v1308_v37 = vadd.f32 %v1296_v27, %v1277_v2  ;;  %v1266_v27 = vadd.f32 %v5008_v24, %v1085_v58  ;;  %v721_v24 = vadd.f32 %v4964_v49, %v4962_v46 }
 0x197   : > { %v4422_v38 = vpop.eup %4421  ;;  %4429 = vpow2.f32 %v3722_v63  ;;  %v1299_v46 = vadd.f32 %v5044_v7, %v1268_v14  ;;  %v1270_v49 = vadd.f32 %v5015_v13, %v1089_v31  ;;  %v4503_v13 = vld [vmem:[#allocation2 + $0x8] sm:$0xff]  ;;  %v5088_v9 = vsel %vm378_vm2, 1.0, %v5085_v21 }
 0x198   : > { %v1338_v18 = vadd.f32 1.0, %v4422_v38  ;;  %v3723_v19 = vmul.f32 -1.442695, %v1308_v37  ;;  %v1297_v6 = vadd.f32 %v5044_v7, %v1266_v27  ;;  %v910_v23 = vadd.f32 %v4984_v4, %v721_v24  ;;  %v4505_v38 = vld [vmem:[#allocation2 + $0x10] sm:$0xff] }
 0x199   : > { %v1314_v42 = vadd.f32 %v5058_v26, %v1299_v46  ;;  %v1301_v50 = vadd.f32 %v5044_v7, %v1270_v49  ;;  %v1305_v14 = vadd.f32 %v5044_v7, %v1274_v40  ;;  %vm3348_vm2 = vcmask 1044480  }
 0x19a   : > { %4431 = vrcp.f32 %v1338_v18  ;;  %v1313_v33 = vadd.f32 %v5058_v26, %v1297_v6  ;;  %v1091_v4 = vadd.f32 %v5003_v20, %v910_v23  ;;  %v731_v20 = vadd.f32 %v4974_v57, %v4970_v56  ;;  %v4507_v23 = vld [vmem:[#allocation2 + $0x20] sm:$0xff] }
 0x19b   : > { %v4424_v25 = vpop.eup %4423  ;;  %4433 = vpow2.f32 %v3723_v19  ;;  %v357_v57 = vadd.s32 32, %v4992_v12  ;;  %v1315_v48 = vadd.f32 %v5058_v26, %v1301_v50  ;;  %v5116_v6 = vsel %vm380_vm8, 1.0, %v5085_v21 }
 0x19c   : > { %v1339_v47 = vadd.f32 1.0, %v4424_v25  ;;  %v1272_v53 = vadd.f32 %v5017_v3, %v1091_v4  ;;  %v363_v3 = vadd.s32 %v5052_v22, %v356_v36  ;;  %v914_v56 = vadd.f32 %v4995_v15, %v731_v20  ;;  %5506 = vst [vmem:[#allocation21_spill] sm:$0xff] %v5116_v6  ;;  %v4508_v36 = vld [vmem:[#allocation2 + $0x28] sm:$0xff] }
 0x19d   : > { %v364_v62 = vadd.s32 %v5052_v22, %v357_v57  ;;  %v1317_v46 = vadd.f32 %v5058_v26, %v1305_v14  ;;  %v4222_v22 = vld [vmem:[#allocation6 + $0x470] ss:$8 sps:$4 sm:$0xff]   ;;  %v4227_v20 = vld [vmem:[#allocation6 + $0x3e4] ss:$8 sps:$4 sm:$0xff]   ;;  %v4228_v57 = vld [vmem:[#allocation6 + $0x460] ss:$8 sps:$4 sm:$0xff]  }
 0x19e   : > { %4435 = vrcp.f32 %v1339_v47  ;;  %v1303_v18 = vadd.f32 %v5044_v7, %v1272_v53  ;;  %v1095_v25 = vadd.f32 %v5019_v51, %v914_v56  ;;  %vm369_vm9 = vcmp.ge.s32.totalorder %v363_v3, 0  ;;  %v4506_v47 = vld [vmem:[#allocation2 + $0x18] sm:$0xff]  ;;  %v4225_v56 = vld [vmem:[#allocation6 + $0x3e0] ss:$8 sps:$4 sm:$0xff]  }
 0x19f   : > { %v4426_v5 = vpop.eup %4425  ;;  %vm375_vm10 = vcmp.lt.s32.totalorder %v363_v3, 56  ;;  %vm370_vm12 = vcmp.ge.s32.totalorder %v364_v62, 0  ;;  %vm376_vm13 = vcmp.lt.s32.totalorder %v364_v62, 56  ;;  %v4509_v3 = vld [vmem:[#allocation2 + $0x30] sm:$0xff] }
 0x1a0   : > { %v1340_v52 = vadd.f32 1.0, %v4426_v5  ;;  %v1316_v32 = vadd.f32 %v5058_v26, %v1303_v18  ;;  %v1276_v51 = vadd.f32 %v5026_v39, %v1095_v25  ;;  %vm381_vm11 = vmand %vm369_vm9, %vm375_vm10  ;;  %v4231_v18 = vld [vmem:[#allocation6 + $0x3d0] ss:$8 sps:$4 sm:$0xff]   ;;  %v4245_v14 = vld [vmem:[#allocation6 + $0x3b4] ss:$8 sps:$4 sm:$0xff]  }
 0x1a1   : > { %vm5131_vm14 = vmand %vm370_vm12, %vm376_vm13 }
 0x1a2   : > { %4437 = vrcp.f32 %v1340_v52  ;;  %v1307_v39 = vadd.f32 %v5044_v7, %v1276_v51  ;;  %v5143_v50 = vsel %vm5131_vm14, 1.0, %v5085_v21  ;;  %v4248_v51 = vld [vmem:[#allocation6 + $0x434] ss:$8 sps:$4 sm:$0xff]  }
 0x1a3   : > { %v4428_v34 = vpop.eup %4427  ;;  %5512 = vst [vmem:[#allocation25_spill] sm:$0xff] %v5143_v50 }
 0x1a4   : > { %v4430_v11 = vpop.eup %4429  ;;  %v1355_v35 = vmul.f32 %v4428_v34, %v1313_v33  ;;  %v5126_v33 = vsel %vm381_vm11, 1.0, %v5085_v21  ;;  %v1318_v7 = vadd.f32 %v5058_v26, %v1307_v39 }
 0x1a5   : > { %v1341_v60 = vadd.f32 1.0, %v4430_v11  ;;  %5508 = vst [vmem:[#allocation23_spill] sm:$0xff] %v5126_v33  ;;  %v4219_v11 = vld [vmem:[#allocation6 + $0x3f0] ss:$8 sps:$4 sm:$0xff]  }
 0x1a6   : > { %v1361_v41 = vadd.f32 %v4503_v13, %v1355_v35 }
 0x1a7   : > { %v4432_v59 = vpop.eup %4431  ;;  %4439 = vrcp.f32 %v1341_v60 }
 0x1a8   : > { %v4434_v8 = vpop.eup %4433  ;;  %v1367_v63 = vmul.f32 0.70710677, %v1361_v41  ;;  %v1356_v2 = vmul.f32 %v4432_v59, %v1314_v42 }
 0x1a9   : > { %v1342_v45 = vadd.f32 1.0, %v4434_v8  ;;  %v4230_v8 = vld [vmem:[#allocation6 + $0x464] ss:$8 sps:$4 sm:$0xff]  }
 0x1aa   : > { %v5097_v37 = vmul.f32 %v5088_v9, %v1367_v63  ;;  %v1362_v58 = vadd.f32 %v4505_v38, %v1356_v2  ;;  %v4233_v38 = vld [vmem:[#allocation6 + $0x3d4] ss:$8 sps:$4 sm:$0xff]  }
 0x1ab   : > { %v4436_v19 = vpop.eup %4435  ;;  %4441 = vrcp.f32 %v1342_v45  ;;  %v5151_v45 = vsel %vm383_vm1, 1.0, %v5085_v21 }
 0x1ac   : > { %1379 = vst [vmem:[#allocation2 + $0x8] sm:$0xff] %v5097_v37  ;;  %v1368_v15 = vmul.f32 0.70710677, %v1362_v58  ;;  %v1357_v27 = vmul.f32 %v4436_v19, %v1315_v48  ;;  %5514 = vst [vmem:[#allocation27_spill] sm:$0xff] %v5151_v45  ;;  %v4236_v58 = vld [vmem:[#allocation6 + $0x454] ss:$8 sps:$4 sm:$0xff]  }
 0x1ad   : > { %v4234_v19 = vld [vmem:[#allocation6 + $0x450] ss:$8 sps:$4 sm:$0xff]  }
 0x1ae   : > { %v5111_v61 = vmul.f32 %v5102_v28, %v1368_v15  ;;  %v1363_v43 = vadd.f32 %v4506_v47, %v1357_v27 }
 0x1af   : > { %v4438_v24 = vpop.eup %4437 }
 0x1b0   : > { %1380 = vst [vmem:[#allocation2 + $0x10] sm:$0xff] %v5111_v61  ;;  %v1369_v5 = vmul.f32 0.70710677, %v1363_v43  ;;  %v1358_v1 = vmul.f32 %v4438_v24, %v1316_v32  ;;  %v4239_v43 = vld [vmem:[#allocation6 + $0x3c4] ss:$8 sps:$4 sm:$0xff]  }
 0x1b1   : > { %v4242_v32 = vld [vmem:[#allocation6 + $0x444] ss:$8 sps:$4 sm:$0xff]   ;;  %v4240_v24 = vld [vmem:[#allocation6 + $0x440] ss:$8 sps:$4 sm:$0xff]  }
 0x1b2   : > { %v5122_v31 = vmul.f32 %v5116_v6, %v1369_v5  ;;  %v1364_v52 = vadd.f32 %v4507_v23, %v1358_v1  ;;  %v4243_v5 = vld [vmem:[#allocation6 + $0x3b0] ss:$8 sps:$4 sm:$0xff]  }
 0x1b3   : > { %v1411_v35 = vld [vmem:[#allocation2 + $0x7] sm:$0xff]  ;;  %v4246_v1 = vld [vmem:[#allocation6 + $0x430] ss:$8 sps:$4 sm:$0xff]  }
 0x1b4   : > { %5507 = vst [vmem:[#allocation22_spill] sm:$0xff] %v5122_v31  ;;  %v4440_v49 = vpop.eup %4439  ;;  %1381 = vst [vmem:[#allocation2 + $0x18] sm:$0xff] %v5122_v31  ;;  %v1370_v34 = vmul.f32 0.70710677, %v1364_v52  ;;  %v1385_v13 = vld [vmem:[#allocation2 + $0x6] sm:$0xff] }
 0x1b5   : > { %v1359_v10 = vmul.f32 %v4440_v49, %v1317_v46 }
 0x1b6   : > { %v5136_v4 = vmul.f32 %v5126_v33, %v1370_v34  ;;  %v4251_v34 = vld [vmem:[#allocation6 + $0x3a4] ss:$8 sps:$4 sm:$0xff]  }
 0x1b7   : > { %v1365_v55 = vadd.f32 %v4508_v36, %v1359_v10  ;;  %v1412_v60 = vld [vmem:[#allocation2 + $0xf] sm:$0xff]  ;;  %v4249_v10 = vld [vmem:[#allocation6 + $0x3a0] ss:$8 sps:$4 sm:$0xff]  }
 0x1b8   : > { %5511 = vst [vmem:[#allocation24_spill] sm:$0xff] %v5136_v4  ;;  %v1386_v41 = vld [vmem:[#allocation2 + $0xe] sm:$0xff]  ;;  %v4442_v42 = vpop.eup %4441  ;;  %1382 = vst [vmem:[#allocation2 + $0x20] sm:$0xff] %v5136_v4  ;;  %v1417_v53 = vpack.c.bf16 %v1412_v60, %v1411_v35 }
 0x1b9   : > { %v1391_v59 = vpack.c.bf16 %v1386_v41, %v1385_v13  ;;  %v1371_v63 = vmul.f32 0.70710677, %v1365_v55  ;;  %v1360_v26 = vmul.f32 %v4442_v42, %v1318_v7  ;;  %v4260_v35 = vld [vmem:[#allocation6 + $0x414] ss:$8 sps:$4 sm:$0xff]   ;;  %v4255_v36 = vld [vmem:[#allocation6 + $0x390] ss:$8 sps:$4 sm:$0xff]  }
 0x1ba   : > { %1550 = vmatmul.mubr.bf16.vlgmr.msra.gmra.mxu1 %v1417_v53  ;;  %v4258_v55 = vld [vmem:[#allocation6 + $0x410] ss:$8 sps:$4 sm:$0xff]   ;;  %v4263_v7 = vld [vmem:[#allocation6 + $0x384] ss:$8 sps:$4 sm:$0xff]   ;;  %v4261_v13 = vld [vmem:[#allocation6 + $0x380] ss:$8 sps:$4 sm:$0xff]  }
 0x1bb   : > { %1693 = vmatmul.mubr.bf16.vlgmr.msra.gmra.mxu0 %v1391_v59  ;;  %v5148_v2 = vmul.f32 %v5143_v50, %v1371_v63  ;;  %v1366_v16 = vadd.f32 %v4509_v3, %v1360_v26  ;;  %1830 = vmatpush1.bf16.msra.mxu1 %v4219_v11  ;;  %v1413_v40 = vld [vmem:[#allocation2 + $0x17] sm:$0xff]  ;;  %v4252_v11 = vld [vmem:[#allocation6 + $0x420] ss:$8 sps:$4 sm:$0xff]   ;;  %v4266_v60 = vld [vmem:[#allocation6 + $0x404] ss:$8 sps:$4 sm:$0xff]  }
 0x1bc   : > { %2011 = vmatpush1.bf16.msra.mxu0 %v4222_v22  ;;  %1831 = vmatprep.subr.bf16.mxu1 %v4227_v20  ;;  %v1387_v27 = vld [vmem:[#allocation2 + $0x16] sm:$0xff]  ;;  %v4264_v41 = vld [vmem:[#allocation6 + $0x400] ss:$8 sps:$4 sm:$0xff]   ;;  %v4272_v26 = vld [vmem:[#allocation6 + $0x4e4] ss:$8 sps:$4 sm:$0xff]  }
 0x1bd   : > { %5513 = vst [vmem:[#allocation26_spill] sm:$0xff] %v5148_v2  ;;  %2012 = vmatprep.subr.bf16.mxu0 %v4230_v8  ;;  %1383 = vst [vmem:[#allocation2 + $0x28] sm:$0xff] %v5148_v2  ;;  %v1372_v48 = vmul.f32 0.70710677, %v1366_v16  ;;  %1559 = vmatprep.mubr.bf16.mxu1 %v5469_v0  ;;  %v4257_v22 = vld [vmem:[#allocation6 + $0x394] ss:$8 sps:$4 sm:$0xff]   ;;  %v1729_v8 = vpack.c.bf16 %v5111_v61, %v5097_v37 }
 0x1be   : > { %1702 = vmatprep.mubr.bf16.mxu0 %v5469_v0  ;;  %v4269_v42 = vld [vmem:[#allocation6 + $0x4f4] ss:$8 sps:$4 sm:$0xff]   ;;  %v1904_v59 = vld [vmem:[#allocation2 + $0x9] sm:$0xff] }
 0x1bf   : > { %v5157_v15 = vmul.f32 %v5151_v45, %v1372_v48  ;;  %1832 = vmatpush1.bf16.msra.mxu1 %v4225_v56  ;;  %v1414_v21 = vld [vmem:[#allocation2 + $0x1f] sm:$0xff]  ;;  %v1905_v53 = vld [vmem:[#allocation2 + $0x11] sm:$0xff] }
 0x1c0   : > { %2013 = vmatpush1.bf16.msra.mxu0 %v4228_v57  ;;  %v1388_v25 = vld [vmem:[#allocation2 + $0x1e] sm:$0xff]  ;;  %1833 = vmatprep.subr.bf16.mxu1 %v4233_v38  ;;  %v1418_v62 = vpack.c.bf16 %v1414_v21, %v1413_v40  ;;  %v4267_v20 = vld [vmem:[#allocation6 + $0x4f0] ss:$8 sps:$4 sm:$0xff]   ;;  %v1910_v63 = vpack.c.bf16 %v1905_v53, %v1904_v59 }
 0x1c1   : > { %5515 = vst [vmem:[#allocation28_spill] sm:$0xff] %v5157_v15  ;;  %2014 = vmatprep.subr.bf16.mxu0 %v4236_v58  ;;  %v1392_v47 = vpack.c.bf16 %v1388_v25, %v1387_v27  ;;  %1384 = vst [vmem:[#allocation2 + $0x30] sm:$0xff] %v5157_v15  ;;  %v4270_v3 = vld [vmem:[#allocation6 + $0x4e0] ss:$8 sps:$4 sm:$0xff]   ;;  %v4275_v16 = vld [vmem:[#allocation6 + $0x4d4] ss:$8 sps:$4 sm:$0xff]   ;;  %v1730_v58 = vpack.c.bf16 %v5136_v4, %v5122_v31 }
 0x1c2   : > { %1560 = vmatmul.mubr.bf16.gmra.mxu1 %v1418_v62  ;;  %v1906_v57 = vld [vmem:[#allocation2 + $0x19] sm:$0xff]  ;;  %v1731_v62 = vpack.c.bf16 %v5157_v15, %v5148_v2  ;;  %v4311_v53 = vld [vmem:[#allocation6 + $0x5c4] ss:$8 sps:$4 sm:$0xff]  }
 0x1c3   : > { %1703 = vmatmul.mubr.bf16.gmra.mxu0 %v1392_v47  ;;  %1834 = vmatpush1.bf16.msra.mxu1 %v4231_v18  ;;  %v4273_v38 = vld [vmem:[#allocation6 + $0x4d0] ss:$8 sps:$4 sm:$0xff]   ;;  %v4278_v18 = vld [vmem:[#allocation6 + $0x4c4] ss:$8 sps:$4 sm:$0xff]   ;;  %v4281_v40 = vld [vmem:[#allocation6 + $0x4b4] ss:$8 sps:$4 sm:$0xff]  }
 0x1c4   : > { %2015 = vmatpush1.bf16.msra.mxu0 %v4234_v19  ;;  %1835 = vmatprep.subr.bf16.mxu1 %v4239_v43  ;;  %v1415_v23 = vld [vmem:[#allocation2 + $0x27] sm:$0xff]  ;;  %v4279_v25 = vld [vmem:[#allocation6 + $0x4b0] ss:$8 sps:$4 sm:$0xff]  }
 0x1c5   : > { %2016 = vmatprep.subr.bf16.mxu0 %v4242_v32  ;;  %1569 = vmatprep.mubr.bf16.mxu1 %v5469_v0  ;;  %v1389_v54 = vld [vmem:[#allocation2 + $0x26] sm:$0xff] }
 0x1c6   : > { %1712 = vmatprep.mubr.bf16.mxu0 %v5469_v0  ;;  %v1907_v56 = vld [vmem:[#allocation2 + $0x21] sm:$0xff] }
 0x1c7   : > { %1836 = vmatpush1.bf16.msra.mxu1 %v4237_v44  ;;  %v1911_v48 = vpack.c.bf16 %v1907_v56, %v1906_v57  ;;  %v4276_v19 = vld [vmem:[#allocation6 + $0x4c0] ss:$8 sps:$4 sm:$0xff]   ;;  %v4284_v43 = vld [vmem:[#allocation6 + $0x4a4] ss:$8 sps:$4 sm:$0xff]   ;;  %v4287_v44 = vld [vmem:[#allocation6 + $0x494] ss:$8 sps:$4 sm:$0xff]  }
 0x1c8   : > { %2017 = vmatpush1.bf16.msra.mxu0 %v4240_v24  ;;  %1837 = vmatprep.subr.bf16.mxu1 %v4245_v14  ;;  %v1416_v52 = vld [vmem:[#allocation2 + $0x2f] sm:$0xff]  ;;  %v4282_v32 = vld [vmem:[#allocation6 + $0x4a0] ss:$8 sps:$4 sm:$0xff]  }
 0x1c9   : > { %2018 = vmatprep.subr.bf16.mxu0 %v4248_v51  ;;  %v1390_v46 = vld [vmem:[#allocation2 + $0x2e] sm:$0xff]  ;;  %v1419_v39 = vpack.c.bf16 %v1416_v52, %v1415_v23  ;;  %v4288_v51 = vld [vmem:[#allocation6 + $0x480] ss:$8 sps:$4 sm:$0xff]  }
 0x1ca   : > { %v1393_v49 = vpack.c.bf16 %v1390_v46, %v1389_v54  ;;  %v1908_v21 = vld [vmem:[#allocation2 + $0x29] sm:$0xff]  ;;  %v1909_v27 = vld [vmem:[#allocation2 + $0x31] sm:$0xff]  ;;  %v2087_v54 = vld [vmem:[#allocation2 + $0x1a] sm:$0xff] }
 0x1cb   : > { %1570 = vmatmul.mubr.bf16.gmra.mxu1 %v1419_v39  ;;  %v1912_v47 = vpack.c.bf16 %v1909_v27, %v1908_v21  ;;  %v4285_v24 = vld [vmem:[#allocation6 + $0x490] ss:$8 sps:$4 sm:$0xff]   ;;  %v4290_v14 = vld [vmem:[#allocation6 + $0x484] ss:$8 sps:$4 sm:$0xff]  }
 0x1cc   : > { %1713 = vmatmul.mubr.bf16.gmra.mxu0 %v1393_v49  ;;  %1838 = vmatpush1.bf16.msra.mxu1 %v4243_v5  ;;  %v2086_v5 = vld [vmem:[#allocation2 + $0x12] sm:$0xff]  ;;  %v2088_v52 = vld [vmem:[#allocation2 + $0x22] sm:$0xff]  ;;  %v2089_v39 = vld [vmem:[#allocation2 + $0x2a] sm:$0xff] }
 0x1cd   : > { %2019 = vmatpush1.bf16.msra.mxu0 %v4246_v1  ;;  %1839 = vmatprep.subr.bf16.mxu1 %v4251_v34  ;;  %v2085_v1 = vld [vmem:[#allocation2 + $0xa] sm:$0xff]  ;;  %v2092_v46 = vpack.c.bf16 %v2088_v52, %v2087_v54  ;;  %v2090_v49 = vld [vmem:[#allocation2 + $0x32] sm:$0xff] }
 0x1ce   : > { %2020 = vmatprep.subr.bf16.mxu0 %v4254_v30  ;;  %1861 = vmatprep.mubr.bf16.mxu1 %v5469_v0  ;;  %v2091_v23 = vpack.c.bf16 %v2086_v5, %v2085_v1  ;;  %v2093_v34 = vpack.c.bf16 %v2090_v49, %v2089_v39  ;;  %v4293_v30 = vld [vmem:[#allocation6 + $0x5f4] ss:$8 sps:$4 sm:$0xff]   ;;  %v4314_v59 = vld [vmem:[#allocation6 + $0x544] ss:$8 sps:$4 sm:$0xff]  }
 0x1cf   : > { %2042 = vmatprep.mubr.bf16.mxu0 %v5469_v0  ;;  %v4323_v56 = vld [vmem:[#allocation6 + $0x5a4] ss:$8 sps:$4 sm:$0xff]  }
 0x1d0   : > { %1840 = vmatpush1.bf16.msra.mxu1 %v4249_v10  ;;  %v4296_v10 = vld [vmem:[#allocation6 + $0x574] ss:$8 sps:$4 sm:$0xff]   ;;  %v4326_v57 = vld [vmem:[#allocation6 + $0x524] ss:$8 sps:$4 sm:$0xff]  }
 0x1d1   : > { %2021 = vmatpush1.bf16.msra.mxu0 %v4252_v11  ;;  %1841 = vmatprep.subr.bf16.mxu1 %v4257_v22  ;;  %v4291_v11 = vld [vmem:[#allocation6 + $0x5f0] ss:$8 sps:$4 sm:$0xff]   ;;  %v4335_v21 = vld [vmem:[#allocation6 + $0x584] ss:$8 sps:$4 sm:$0xff]  }
 0x1d2   : > { %2022 = vmatprep.subr.bf16.mxu0 %v4260_v35  ;;  %v4294_v22 = vld [vmem:[#allocation6 + $0x570] ss:$8 sps:$4 sm:$0xff]   ;;  %v4299_v35 = vld [vmem:[#allocation6 + $0x5e4] ss:$8 sps:$4 sm:$0xff]  }
 0x1d3   : > { %v4338_v27 = vld [vmem:[#allocation6 + $0x504] ss:$8 sps:$4 sm:$0xff]  }
 0x1d4   : > { %1842 = vmatpush1.bf16.msra.mxu1 %v4255_v36  ;;  %v4302_v36 = vld [vmem:[#allocation6 + $0x564] ss:$8 sps:$4 sm:$0xff]  }
 0x1d5   : > { %2023 = vmatpush1.bf16.msra.mxu0 %v4258_v55  ;;  %1843 = vmatprep.subr.bf16.mxu1 %v4263_v7  ;;  %v4297_v55 = vld [vmem:[#allocation6 + $0x5e0] ss:$8 sps:$4 sm:$0xff]  }
 0x1d6   : > { %2024 = vmatprep.subr.bf16.mxu0 %v4266_v60  ;;  %v4300_v7 = vld [vmem:[#allocation6 + $0x560] ss:$8 sps:$4 sm:$0xff]   ;;  %v4305_v60 = vld [vmem:[#allocation6 + $0x5d4] ss:$8 sps:$4 sm:$0xff]  }
 0x1d8   : > { %1844 = vmatpush1.bf16.msra.mxu1 %v4261_v13  ;;  %v4308_v13 = vld [vmem:[#allocation6 + $0x554] ss:$8 sps:$4 sm:$0xff]  }
 0x1d9   : > { %2025 = vmatpush1.bf16.msra.mxu0 %v4264_v41  ;;  %2191 = vmatprep.subr.bf16.mxu1 %v4269_v42  ;;  %v4303_v41 = vld [vmem:[#allocation6 + $0x5d0] ss:$8 sps:$4 sm:$0xff]  }
 0x1da   : > { %2504 = vmatprep.subr.bf16.mxu0 %v4293_v30  ;;  %v4306_v42 = vld [vmem:[#allocation6 + $0x550] ss:$8 sps:$4 sm:$0xff]  }
 0x1db   : > { %1862 = vmatmul.mubr.bf16.vlgmr.msra.gmra.mxu1 %v1729_v8  ;;  %v4312_v8 = vld [vmem:[#allocation6 + $0x540] ss:$8 sps:$4 sm:$0xff]  }
 0x1dc   : > { %2043 = vmatmul.mubr.bf16.vlgmr.msra.gmra.mxu0 %v1910_v63  ;;  %2192 = vmatpush1.bf16.msra.mxu1 %v4267_v20  ;;  %v4309_v20 = vld [vmem:[#allocation6 + $0x5c0] ss:$8 sps:$4 sm:$0xff]   ;;  %v4317_v63 = vld [vmem:[#allocation6 + $0x5b4] ss:$8 sps:$4 sm:$0xff]  }
 0x1dd   : > { %1871 = vmatprep.mubr.bf16.mxu1 %v5469_v0  ;;  %2193 = vmatprep.subr.bf16.mxu1 %v4272_v26  ;;  %v4320_v26 = vld [vmem:[#allocation6 + $0x534] ss:$8 sps:$4 sm:$0xff]  }
 0x1de   : > { %2052 = vmatprep.mubr.bf16.mxu0 %v5469_v0  ;;  %2505 = vmatpush1.bf16.msra.mxu0 %v4291_v11 }
 0x1df   : > { %2506 = vmatprep.subr.bf16.mxu0 %v4299_v35 }
 0x1e0   : > { %2194 = vmatpush1.bf16.msra.mxu1 %v4270_v3  ;;  %v4315_v3 = vld [vmem:[#allocation6 + $0x5b0] ss:$8 sps:$4 sm:$0xff]  }
 0x1e1   : > { %2195 = vmatprep.subr.bf16.mxu1 %v4275_v16  ;;  %v4318_v16 = vld [vmem:[#allocation6 + $0x530] ss:$8 sps:$4 sm:$0xff]  }
 0x1e2   : > { %2507 = vmatpush1.bf16.msra.mxu0 %v4297_v55 }
 0x1e3   : > { %1872 = vmatmul.mubr.bf16.gmra.mxu1 %v1730_v58  ;;  %2508 = vmatprep.subr.bf16.mxu0 %v4305_v60  ;;  %v4324_v58 = vld [vmem:[#allocation6 + $0x520] ss:$8 sps:$4 sm:$0xff]  }
 0x1e4   : > { %2053 = vmatmul.mubr.bf16.gmra.mxu0 %v1911_v48  ;;  %2196 = vmatpush1.bf16.msra.mxu1 %v4273_v38  ;;  %v4321_v38 = vld [vmem:[#allocation6 + $0x5a0] ss:$8 sps:$4 sm:$0xff]   ;;  %v4329_v48 = vld [vmem:[#allocation6 + $0x594] ss:$8 sps:$4 sm:$0xff]  }
 0x1e5   : > { %1881 = vmatprep.mubr.bf16.mxu1 %v5469_v0  ;;  %2197 = vmatprep.subr.bf16.mxu1 %v4278_v18  ;;  %v4332_v18 = vld [vmem:[#allocation6 + $0x514] ss:$8 sps:$4 sm:$0xff]  }
 0x1e6   : > { %2062 = vmatprep.mubr.bf16.mxu0 %v5469_v0  ;;  %2509 = vmatpush1.bf16.msra.mxu0 %v4303_v41 }
 0x1e7   : > { %2510 = vmatprep.subr.bf16.mxu0 %v4311_v53 }
 0x1e8   : > { %2198 = vmatpush1.bf16.msra.mxu1 %v4276_v19  ;;  %v4327_v19 = vld [vmem:[#allocation6 + $0x590] ss:$8 sps:$4 sm:$0xff]  }
 0x1e9   : > { %2199 = vmatprep.subr.bf16.mxu1 %v4281_v40  ;;  %v4330_v40 = vld [vmem:[#allocation6 + $0x510] ss:$8 sps:$4 sm:$0xff]  }
 0x1ea   : > { %2511 = vmatpush1.bf16.msra.mxu0 %v4309_v20 }
 0x1eb   : > { %1882 = vmatmul.mubr.bf16.gmra.mxu1 %v1731_v62  ;;  %2512 = vmatprep.subr.bf16.mxu0 %v4317_v63  ;;  %v4336_v62 = vld [vmem:[#allocation6 + $0x500] ss:$8 sps:$4 sm:$0xff]  }
 0x1ec   : > { %2063 = vmatmul.mubr.bf16.gmra.mxu0 %v1912_v47  ;;  %2200 = vmatpush1.bf16.msra.mxu1 %v4279_v25  ;;  %v4333_v25 = vld [vmem:[#allocation6 + $0x580] ss:$8 sps:$4 sm:$0xff]   ;;  %v4341_v47 = vld [vmem:[#allocation6 + $0x674] ss:$8 sps:$4 sm:$0xff]  }
 0x1ed   : > { %2223 = vmatprep.mubr.bf16.mxu1 %v5469_v0  ;;  %2201 = vmatprep.subr.bf16.mxu1 %v4284_v43  ;;  %v4344_v43 = vld [vmem:[#allocation6 + $0x6f4] ss:$8 sps:$4 sm:$0xff]  }
 0x1ee   : > { %2536 = vmatprep.mubr.bf16.mxu0 %v5469_v0  ;;  %2513 = vmatpush1.bf16.msra.mxu0 %v4315_v3 }
 0x1ef   : > { %2514 = vmatprep.subr.bf16.mxu0 %v4323_v56 }
 0x1f0   : > { %2202 = vmatpush1.bf16.msra.mxu1 %v4282_v32 }
 0x1f1   : > { %2203 = vmatprep.subr.bf16.mxu1 %v4287_v44 }
 0x1f2   : > { %2515 = vmatpush1.bf16.msra.mxu0 %v4321_v38 }
 0x1f3   : > { %2516 = vmatprep.subr.bf16.mxu0 %v4329_v48 }
 0x1f4   : > { %2204 = vmatpush1.bf16.msra.mxu1 %v4285_v24 }
 0x1f5   : > { %2205 = vmatprep.subr.bf16.mxu1 %v4290_v14 }
 0x1f6   : > { %2517 = vmatpush1.bf16.msra.mxu0 %v4327_v19 }
 0x1f7   : > { %2518 = vmatprep.subr.bf16.mxu0 %v4335_v21 }
 0x1f8   : > { %2206 = vmatpush1.bf16.msra.mxu1 %v4288_v51 }
 0x1f9   : > { %2645 = vmatprep.subr.bf16.mxu1 %v4296_v10 }
 0x1fa   : > { %2519 = vmatpush1.bf16.msra.mxu0 %v4333_v25 }
 0x1fb   : > { %2224 = vmatmul.mubr.bf16.vlgmr.msra.gmra.mxu1 %v2091_v23  ;;  %2812 = vmatprep.subr.bf16.mxu0 %v4341_v47 }
 0x1fc   : > { %2233 = vmatprep.mubr.bf16.mxu1 %v5469_v0  ;;  %2646 = vmatpush1.bf16.msra.mxu1 %v4294_v22 }
 0x1fd   : > { %2647 = vmatprep.subr.bf16.mxu1 %v4302_v36 }
 0x200   : > { %2648 = vmatpush1.bf16.msra.mxu1 %v4300_v7 }
 0x201   : > { %2649 = vmatprep.subr.bf16.mxu1 %v4308_v13 }
 0x203   : > { %2234 = vmatmul.mubr.bf16.gmra.mxu1 %v2092_v46 }
 0x204   : > { %2243 = vmatprep.mubr.bf16.mxu1 %v5469_v0  ;;  %2650 = vmatpush1.bf16.msra.mxu1 %v4306_v42 }
 0x205   : > { %2651 = vmatprep.subr.bf16.mxu1 %v4314_v59 }
 0x208   : > { %2652 = vmatpush1.bf16.msra.mxu1 %v4312_v8 }
 0x209   : > { %2653 = vmatprep.subr.bf16.mxu1 %v4320_v26 }
 0x20b   : > { %2244 = vmatmul.mubr.bf16.gmra.mxu1 %v2093_v34 }
 0x20c   : > { %2677 = vmatprep.mubr.bf16.mxu1 %v5469_v0  ;;  %2654 = vmatpush1.bf16.msra.mxu1 %v4318_v16 }
 0x20d   : > { %2655 = vmatprep.subr.bf16.mxu1 %v4326_v57 }
 0x210   : > { %2656 = vmatpush1.bf16.msra.mxu1 %v4324_v58 }
 0x211   : > { %2657 = vmatprep.subr.bf16.mxu1 %v4332_v18  ;;  %v2272_v18 = vsub.s32 5, %v4992_v12 }
 0x213   : > { %v2273_v25 = vrot.slane %v5000_v17, %v2272_v18 }
 0x214   : > { %2658 = vmatpush1.bf16.msra.mxu1 %v4330_v40 }
 0x215   : > { %2659 = vmatprep.subr.bf16.mxu1 %v4338_v27 }
 0x218   : > { %2660 = vmatpush1.bf16.msra.mxu1 %v4336_v62 }
 0x219   : > { %2989 = vmatprep.subr.bf16.mxu1 %v4344_v43  ;;  %v5224_v43 = vsub.s32 1, %v4992_v12 }
 0x21b   : > { %v2283_v2 = vrot.slane %v2273_v25, %v5224_v43 }
 0x27a   : > { %v5179_v32 = vpop.f32.mrf.mxu1 }
 0x27b   : > { %v5181_v44 = vpop.f32.mrf.mxu0 }
 0x27c   : > { %v1553_v24 = vpop.f32.mrf.mxu1 }
 0x27d   : > { %v1696_v14 = vpop.f32.mrf.mxu0 }
 0x27e   : > { %v5183_v51 = vpop.f32.mrf.mxu1  ;;  %v1697_v40 = vadd.f32 %v1696_v14, %v1553_v24 }
 0x27f   : > { %v5185_v5 = vpop.f32.mrf.mxu0 }
 0x280   : > { %v1557_v1 = vpop.f32.mrf.mxu1 }
 0x281   : > { %v1700_v23 = vpop.f32.mrf.mxu0 }
 0x282   : > { %v5187_v52 = vpop.f32.mrf.mxu1  ;;  %v1701_v47 = vadd.f32 %v1700_v23, %v1557_v1 }
 0x283   : > { %v5189_v46 = vpop.f32.mrf.mxu0 }
 0x284   : > { %v1563_v54 = vpop.f32.mrf.mxu1 }
 0x285   : > { %v1706_v49 = vpop.f32.mrf.mxu0 }
 0x286   : > { %v5191_v39 = vpop.f32.mrf.mxu1  ;;  %v1707_v4 = vadd.f32 %v1706_v49, %v1563_v54 }
 0x287   : > { %v5193_v30 = vpop.f32.mrf.mxu0 }
 0x288   : > { %v1567_v34 = vpop.f32.mrf.mxu1 }
 0x289   : > { %v1710_v11 = vpop.f32.mrf.mxu0 }
 0x28b   : > { %v5195_v10 = vpop.f32.mrf.mxu1 }
 0x28c   : > { %v5197_v35 = vpop.f32.mrf.mxu0 }
 0x28d   : > { %v1573_v22 = vpop.f32.mrf.mxu1 }
 0x28e   : > { %v1716_v55 = vpop.f32.mrf.mxu0 }
 0x28f   : > { %v5199_v36 = vpop.f32.mrf.mxu1 }
 0x290   : > { %v5203_v13 = vpop.f32.mrf.mxu0 }
 0x291   : > { %v1577_v7 = vpop.f32.mrf.mxu1 }
 0x292   : > { %v1720_v53 = vpop.f32.mrf.mxu0 }
 0x29b   : > { %v5201_v60 = vpop.f32.mrf.mxu1 }
 0x29c   : > { %v5207_v20 = vpop.f32.mrf.mxu0 }
 0x29d   : > { %v1865_v41 = vpop.f32.mrf.mxu1 }
 0x29e   : > { %v2046_v26 = vpop.f32.mrf.mxu0  ;;  %v1893_v27 = vadd.f32 %v1865_v41, %v1697_v40  ;;  %v1711_v40 = vadd.f32 %v1710_v11, %v1567_v34 }
 0x29f   : > { %v5205_v42 = vpop.f32.mrf.mxu1 }
 0x2a0   : > { %v5213_v56 = vpop.f32.mrf.mxu0  ;;  %v2074_v15 = vadd.f32 %v2046_v26, %v1893_v27 }
 0x2a1   : > { %v1869_v59 = vpop.f32.mrf.mxu1 }
 0x2a2   : > { %v2050_v38 = vpop.f32.mrf.mxu0  ;;  %v1895_v50 = vadd.f32 %v1869_v59, %v1701_v47 }
 0x2a3   : > { %v5209_v8 = vpop.f32.mrf.mxu1 }
 0x2a4   : > { %v5217_v48 = vpop.f32.mrf.mxu0  ;;  %v2076_v17 = vadd.f32 %v2050_v38, %v1895_v50  ;;  %v1721_v38 = vadd.f32 %v1720_v53, %v1577_v7 }
 0x2a5   : > { %v1875_v63 = vpop.f32.mrf.mxu1 }
 0x2a6   : > { %v2056_v21 = vpop.f32.mrf.mxu0  ;;  %v1897_v18 = vadd.f32 %v1875_v63, %v1707_v4 }
 0x2a7   : > { %v5211_v3 = vpop.f32.mrf.mxu1 }
 0x2a8   : > { %v5226_v0 = vpop.f32.mrf.mxu0  ;;  %v2078_v59 = vadd.f32 %v2056_v21, %v1897_v18 }
 0x2a9   : > { %v1879_v16 = vpop.f32.mrf.mxu1 }
 0x2aa   : > { %v2060_v14 = vpop.f32.mrf.mxu0  ;;  %v1899_v26 = vadd.f32 %v1879_v16, %v1711_v40 }
 0x2ab   : > { %v5215_v57 = vpop.f32.mrf.mxu1 }
 0x2ac   : > { %v5233_v31 = vpop.f32.mrf.mxu0  ;;  %v2080_v4 = vadd.f32 %v2060_v14, %v1899_v26 }
 0x2ad   : > { %v1885_v58 = vpop.f32.mrf.mxu1 }
 0x2ae   : > { %v2066_v25 = vpop.f32.mrf.mxu0 }
 0x2af   : > { %v5220_v19 = vpop.f32.mrf.mxu1 }
 0x2b1   : > { %v1889_v62 = vpop.f32.mrf.mxu1 }
 0x2bb   : > { %v5228_v45 = vpop.f32.mrf.mxu1 }
 0x2bd   : > { %v2227_v33 = vpop.f32.mrf.mxu1 }
 0x2be   : > { %v2255_v24 = vadd.f32 %v2227_v33, %v2074_v15  ;;  %v1717_v33 = vadd.f32 %v1716_v55, %v1573_v22 }
 0x2bf   : > { %v5231_v41 = vpop.f32.mrf.mxu1 }
 0x2c0   : > { %v2285_v1 = vadd.f32 %v2283_v2, %v2255_v24  ;;  %v1901_v63 = vadd.f32 %v1885_v58, %v1717_v33  ;;  %v1695_v58 = vadd.f32 %v5181_v44, %v5179_v32  ;;  %v5253_v33 = vld [vmem:[%s5454_s3] sm:$0x77] }
 0x2c1   : > { %v2231_v23 = vpop.f32.mrf.mxu1  ;;  %v2269_v32 = vrot.slane %v5253_v33, %v5224_v43 }
 0x2c2   : > { %v3804_v12 = vmul.f32 -1.442695, %v2285_v1  ;;  %v2257_v6 = vadd.f32 %v2231_v23, %v2076_v17  ;;  %v5239_v17 = vpop.f32.mrf.mxu0 }
 0x2c3   : > { %v5235_v28 = vpop.f32.mrf.mxu1 }
 0x2c4   : > { %4443 = vpow2.f32 %v3804_v12  ;;  %v2287_v27 = vadd.f32 %v2283_v2, %v2257_v6  ;;  %v2082_v12 = vadd.f32 %v2066_v25, %v1901_v63  ;;  %v1903_v6 = vadd.f32 %v1889_v62, %v1721_v38  ;;  %v2070_v1 = vpop.f32.mrf.mxu0 }
 0x2c5   : > { %v2237_v54 = vpop.f32.mrf.mxu1  ;;  %v5263_v63 = vrot.slane %v2269_v32, %v5224_v43 }
 0x2c6   : > { %v3805_v15 = vmul.f32 -1.442695, %v2287_v27  ;;  %v2259_v49 = vadd.f32 %v2237_v54, %v2078_v59  ;;  %v2084_v7 = vadd.f32 %v2070_v1, %v1903_v6  ;;  %v1892_v59 = vadd.f32 %v5201_v60, %v1695_v58 }
 0x2c7   : > { %v5237_v50 = vpop.f32.mrf.mxu1  ;;  %v1699_v54 = vadd.f32 %v5185_v5, %v5183_v51  ;;  %v1705_v51 = vadd.f32 %v5189_v46, %v5187_v52  ;;  %v1709_v52 = vadd.f32 %v5193_v30, %v5191_v39  ;;  %v1715_v39 = vadd.f32 %v5197_v35, %v5195_v10 }
 0x2c8   : > { %4445 = vpow2.f32 %v3805_v15  ;;  %v2289_v34 = vadd.f32 %v2283_v2, %v2259_v49  ;;  %v2073_v60 = vadd.f32 %v5207_v20, %v1892_v59  ;;  %v1719_v1 = vadd.f32 %v5203_v13, %v5199_v36  ;;  %v5516_v59 = vld [vmem:[#allocation20_spill] sm:$0xff] }
 0x2c9   : > { %v2241_v11 = vpop.f32.mrf.mxu1  ;;  %v1894_v49 = vadd.f32 %v5205_v42, %v1699_v54  ;;  %v5269_v42 = vrot.slane %v5049_v29, %v5224_v43 }
 0x2ca   : > { %v3806_v47 = vmul.f32 -1.442695, %v2289_v34  ;;  %v2261_v24 = vadd.f32 %v2241_v11, %v2080_v4  ;;  %v2254_v5 = vadd.f32 %v5228_v45, %v2073_v60  ;;  %v1896_v11 = vadd.f32 %v5209_v8, %v1705_v51 }
 0x2cb   : > { %v5241_v16 = vpop.f32.mrf.mxu1 }
 0x2cc   : > { %4447 = vpow2.f32 %v3806_v47  ;;  %v2291_v22 = vadd.f32 %v2283_v2, %v2261_v24  ;;  %v2284_v45 = vadd.f32 %v5263_v63, %v2254_v5  ;;  %v2077_v47 = vadd.f32 %v5217_v48, %v1896_v11  ;;  %v4339_v11 = vld [vmem:[#allocation6 + $0x670] ss:$8 sps:$4 sm:$0xff]  }
 0x2cd   : > { %v2247_v55 = vpop.f32.mrf.mxu1  ;;  %v1900_v48 = vadd.f32 %v5215_v57, %v1715_v39  ;;  %v1902_v57 = vadd.f32 %v5220_v19, %v1719_v1  ;;  %v4351_v1 = vld [vmem:[#allocation6 + $0x650] ss:$8 sps:$4 sm:$0xff]  }
 0x2ce   : > { %v3807_v21 = vmul.f32 -1.442695, %v2291_v22  ;;  %v2263_v18 = vadd.f32 %v2247_v55, %v2082_v12  ;;  %v2300_v8 = vadd.f32 %v5269_v42, %v2284_v45  ;;  %v2258_v29 = vadd.f32 %v5235_v28, %v2077_v47  ;;  %v5521_v45 = vld [vmem:[#allocation26_spill] sm:$0xff] }
 0x2cf   : > { %v5243_v14 = vpop.f32.mrf.mxu1  ;;  %v2081_v58 = vadd.f32 %v5233_v31, %v1900_v48  ;;  %v2083_v19 = vadd.f32 %v5239_v17, %v1902_v57  ;;  %v5519_v17 = vld [vmem:[#allocation24_spill] sm:$0xff] }
 0x2d0   : > { %4449 = vpow2.f32 %v3807_v21  ;;  %v2293_v53 = vadd.f32 %v2283_v2, %v2263_v18  ;;  %v2288_v21 = vadd.f32 %v5263_v63, %v2258_v29  ;;  %v4347_v29 = vld [vmem:[#allocation6 + $0x664] ss:$8 sps:$4 sm:$0xff]  }
 0x2d1   : > { %v4444_v23 = vpop.eup %4443  ;;  %v2251_v40 = vpop.f32.mrf.mxu1  ;;  %v2262_v36 = vadd.f32 %v5241_v16, %v2081_v58  ;;  %v2264_v32 = vadd.f32 %v5243_v14, %v2083_v19  ;;  %v5523_v48 = vld [vmem:[#allocation28_spill] sm:$0xff]  ;;  %v4365_v19 = vld [vmem:[#allocation6 + $0x634] ss:$8 sps:$4 sm:$0xff]  }
 0x2d2   : > { %v2324_v26 = vadd.f32 1.0, %v4444_v23  ;;  %v3808_v62 = vmul.f32 -1.442695, %v2293_v53  ;;  %v2265_v27 = vadd.f32 %v2251_v40, %v2084_v7 }
 0x2d3   : > { %v2292_v54 = vadd.f32 %v5263_v63, %v2262_v36  ;;  %v4362_v36 = vld [vmem:[#allocation6 + $0x6c4] ss:$8 sps:$4 sm:$0xff]  }
 0x2d4   : > { %4451 = vrcp.f32 %v2324_v26  ;;  %v2295_v44 = vadd.f32 %v2283_v2, %v2265_v27  ;;  %v2075_v2 = vadd.f32 %v5213_v56, %v1894_v49  ;;  %v1898_v56 = vadd.f32 %v5211_v3, %v1709_v52 }
 0x2d5   : > { %v4446_v15 = vpop.eup %4445  ;;  %4453 = vpow2.f32 %v3808_v62 }
 0x2d6   : > { %v2325_v25 = vadd.f32 1.0, %v4446_v15  ;;  %v3809_v4 = vmul.f32 -1.442695, %v2295_v44  ;;  %v2256_v46 = vadd.f32 %v5231_v41, %v2075_v2  ;;  %v2079_v41 = vadd.f32 %v5226_v0, %v1898_v56  ;;  %v5518_v15 = vld [vmem:[#allocation21_spill] sm:$0xff]  ;;  %v5520_v2 = vld [vmem:[#allocation23_spill] sm:$0xff] }
 0x2d8   : > { %4455 = vrcp.f32 %v2325_v25  ;;  %v2286_v12 = vadd.f32 %v5263_v63, %v2256_v46  ;;  %v2260_v28 = vadd.f32 %v5237_v50, %v2079_v41  ;;  %v2302_v50 = vadd.f32 %v5269_v42, %v2288_v21  ;;  %v5522_v41 = vld [vmem:[#allocation25_spill] sm:$0xff] }
 0x2d9   : > { %v4448_v34 = vpop.eup %4447  ;;  %4457 = vpow2.f32 %v3809_v4  ;;  %v2304_v25 = vadd.f32 %v5269_v42, %v2292_v54  ;;  %v2294_v4 = vadd.f32 %v5263_v63, %v2264_v32  ;;  %v4356_v21 = vld [vmem:[#allocation6 + $0x6d4] ss:$8 sps:$4 sm:$0xff]  }
 0x2da   : > { %v2326_v20 = vadd.f32 1.0, %v4448_v34  ;;  %v2301_v55 = vadd.f32 %v5269_v42, %v2286_v12  ;;  %v2290_v23 = vadd.f32 %v5263_v63, %v2260_v28 }
 0x2dc   : > { %4459 = vrcp.f32 %v2326_v20  ;;  %v4342_v20 = vld [vmem:[#allocation6 + $0x6f0] ss:$8 sps:$4 sm:$0xff]  }
 0x2dd   : > { %v4450_v38 = vpop.eup %4449 }
 0x2de   : > { %v2327_v24 = vadd.f32 1.0, %v4450_v38  ;;  %v2305_v38 = vadd.f32 %v5269_v42, %v2294_v4  ;;  %v4377_v4 = vld [vmem:[#allocation6 + $0x614] ss:$8 sps:$4 sm:$0xff]  }
 0x2e0   : > { %4461 = vrcp.f32 %v2327_v24 }
 0x2e1   : > { %v4452_v43 = vpop.eup %4451 }
 0x2e2   : > { %v4454_v30 = vpop.eup %4453  ;;  %v2342_v6 = vmul.f32 %v4452_v43, %v2300_v8  ;;  %v4350_v43 = vld [vmem:[#allocation6 + $0x6e4] ss:$8 sps:$4 sm:$0xff]  }
 0x2e3   : > { %v2328_v22 = vadd.f32 1.0, %v4454_v30 }
 0x2e4   : > { %v2348_v3 = vadd.f32 %v2342_v6, %v5097_v37 }
 0x2e5   : > { %v4456_v18 = vpop.eup %4455  ;;  %4463 = vrcp.f32 %v2328_v22 }
 0x2e6   : > { %v4458_v10 = vpop.eup %4457  ;;  %v2354_v35 = vmul.f32 0.70710677, %v2348_v3  ;;  %v2343_v0 = vmul.f32 %v4456_v18, %v2301_v55  ;;  %v4348_v3 = vld [vmem:[#allocation6 + $0x6e0] ss:$8 sps:$4 sm:$0xff]   ;;  %v4353_v55 = vld [vmem:[#allocation6 + $0x654] ss:$8 sps:$4 sm:$0xff]  }
 0x2e7   : > { %v2329_v7 = vadd.f32 1.0, %v4458_v10  ;;  %v5524_v18 = vmov 0   ;;  %v4354_v10 = vld [vmem:[#allocation6 + $0x6d0] ss:$8 sps:$4 sm:$0xff]  }
 0x2e8   : > { %v5293_v37 = vmul.f32 %v5088_v9, %v2354_v35  ;;  %v2349_v53 = vadd.f32 %v2343_v0, %v5111_v61  ;;  %v5517_v9 = vld [vmem:[#allocation22_spill] sm:$0xff]  ;;  %v2303_v61 = vadd.f32 %v5269_v42, %v2290_v23  ;;  %v4345_v42 = vld [vmem:[#allocation6 + $0x660] ss:$8 sps:$4 sm:$0xff]  }
 0x2e9   : > { %v4460_v40 = vpop.eup %4459  ;;  %4465 = vrcp.f32 %v2329_v7  ;;  %v5525_v0 = vld [vmem:[#allocation27_spill] sm:$0xff] }
 0x2ea   : > { %2366 = vst [vmem:[#allocation2 + $0x8] sm:$0xff] %v5293_v37  ;;  %v2355_v13 = vmul.f32 0.70710677, %v2349_v53  ;;  %v2344_v31 = vmul.f32 %v4460_v40, %v2302_v50  ;;  %v4359_v40 = vld [vmem:[#allocation6 + $0x644] ss:$8 sps:$4 sm:$0xff]  }
 0x2ec   : > { %v5302_v26 = vmul.f32 %v5516_v59, %v2355_v13  ;;  %v2350_v62 = vadd.f32 %v2344_v31, %v5517_v9  ;;  %v4357_v13 = vld [vmem:[#allocation6 + $0x640] ss:$8 sps:$4 sm:$0xff]   ;;  %v4368_v59 = vld [vmem:[#allocation6 + $0x6b4] ss:$8 sps:$4 sm:$0xff]   ;;  %v4363_v9 = vld [vmem:[#allocation6 + $0x630] ss:$8 sps:$4 sm:$0xff]  }
 0x2ed   : > { %v4462_v27 = vpop.eup %4461  ;;  %v4360_v31 = vld [vmem:[#allocation6 + $0x6c0] ss:$8 sps:$4 sm:$0xff]  }
 0x2ee   : > { %2367 = vst [vmem:[#allocation2 + $0x10] sm:$0xff] %v5302_v26  ;;  %v2356_v16 = vmul.f32 0.70710677, %v2350_v62  ;;  %v2345_v44 = vmul.f32 %v4462_v27, %v2303_v61  ;;  %v4366_v62 = vld [vmem:[#allocation6 + $0x6b0] ss:$8 sps:$4 sm:$0xff]  }
 0x2f0   : > { %v5310_v60 = vmul.f32 %v5518_v15, %v2356_v16  ;;  %v2351_v49 = vadd.f32 %v2345_v44, %v5519_v17  ;;  %v4371_v15 = vld [vmem:[#allocation6 + $0x624] ss:$8 sps:$4 sm:$0xff]  }
 0x2f1   : > { %v2398_v52 = vld [vmem:[#allocation2 + $0x7] sm:$0xff] }
 0x2f2   : > { %v4464_v51 = vpop.eup %4463  ;;  %2368 = vst [vmem:[#allocation2 + $0x18] sm:$0xff] %v5310_v60  ;;  %v2357_v5 = vmul.f32 0.70710677, %v2351_v49  ;;  %v2372_v56 = vld [vmem:[#allocation2 + $0x6] sm:$0xff] }
 0x2f3   : > { %v2346_v34 = vmul.f32 %v4464_v51, %v2304_v25  ;;  %v4374_v17 = vld [vmem:[#allocation6 + $0x6a4] ss:$8 sps:$4 sm:$0xff]   ;;  %v4369_v49 = vld [vmem:[#allocation6 + $0x620] ss:$8 sps:$4 sm:$0xff]   ;;  %v4380_v51 = vld [vmem:[#allocation6 + $0x694] ss:$8 sps:$4 sm:$0xff]  }
 0x2f4   : > { %v5317_v14 = vmul.f32 %v5520_v2, %v2357_v5  ;;  %v4372_v25 = vld [vmem:[#allocation6 + $0x6a0] ss:$8 sps:$4 sm:$0xff]   ;;  %v4375_v5 = vld [vmem:[#allocation6 + $0x610] ss:$8 sps:$4 sm:$0xff]   ;;  %v4383_v2 = vld [vmem:[#allocation6 + $0x604] ss:$8 sps:$4 sm:$0xff]  }
 0x2f5   : > { %v2352_v46 = vadd.f32 %v2346_v34, %v5521_v45  ;;  %v2399_v47 = vld [vmem:[#allocation2 + $0xf] sm:$0xff] }
 0x2f6   : > { %v2373_v24 = vld [vmem:[#allocation2 + $0xe] sm:$0xff]  ;;  %v4466_v8 = vpop.eup %4465  ;;  %2369 = vst [vmem:[#allocation2 + $0x20] sm:$0xff] %v5317_v14  ;;  %v2404_v63 = vpack.c.bf16 %v2399_v47, %v2398_v52  ;;  %v4384_v52 = vld [vmem:[#allocation6 + $0x680] ss:$8 sps:$4 sm:$0xff]  }
 0x2f7   : > { %v2378_v12 = vpack.c.bf16 %v2373_v24, %v2372_v56  ;;  %v2358_v39 = vmul.f32 0.70710677, %v2352_v46  ;;  %v2347_v30 = vmul.f32 %v4466_v8, %v2305_v38  ;;  %v4378_v34 = vld [vmem:[#allocation6 + $0x690] ss:$8 sps:$4 sm:$0xff]   ;;  %v4389_v45 = vld [vmem:[#allocation6 + $0x774] ss:$8 sps:$4 sm:$0xff]   ;;  %v2712_v56 = vpack.c.bf16 %v5302_v26, %v5293_v37 }
 0x2f8   : > { %2537 = vmatmul.mubr.bf16.vlgmr.msra.gmra.mxu0 %v2404_v63  ;;  %v2883_v38 = vld [vmem:[#allocation2 + $0x9] sm:$0xff] }
 0x2f9   : > { %2678 = vmatmul.mubr.bf16.vlgmr.msra.gmra.mxu1 %v2378_v12  ;;  %v5323_v6 = vmul.f32 %v5522_v41, %v2358_v39  ;;  %v2353_v22 = vadd.f32 %v2347_v30, %v5523_v48  ;;  %2813 = vmatpush1.bf16.msra.mxu0 %v4339_v11  ;;  %v2400_v35 = vld [vmem:[#allocation2 + $0x17] sm:$0xff]  ;;  %v4386_v11 = vld [vmem:[#allocation6 + $0x684] ss:$8 sps:$4 sm:$0xff]   ;;  %v4390_v63 = vld [vmem:[#allocation6 + $0x760] ss:$8 sps:$4 sm:$0xff]   ;;  %v2713_v30 = vpack.c.bf16 %v5317_v14, %v5310_v60 }
 0x2fa   : > { %2990 = vmatpush1.bf16.msra.mxu1 %v4342_v20  ;;  %2814 = vmatprep.subr.bf16.mxu0 %v4347_v29  ;;  %v2374_v7 = vld [vmem:[#allocation2 + $0x16] sm:$0xff]  ;;  %v4381_v20 = vld [vmem:[#allocation6 + $0x600] ss:$8 sps:$4 sm:$0xff]   ;;  %v4392_v8 = vld [vmem:[#allocation6 + $0x764] ss:$8 sps:$4 sm:$0xff]  }
 0x2fb   : > { %2991 = vmatprep.subr.bf16.mxu1 %v4350_v43  ;;  %2370 = vst [vmem:[#allocation2 + $0x28] sm:$0xff] %v5323_v6  ;;  %v2359_v28 = vmul.f32 0.70710677, %v2353_v22  ;;  %2546 = vmatprep.mubr.bf16.mxu0 %v5524_v18  ;;  %v2884_v46 = vld [vmem:[#allocation2 + $0x11] sm:$0xff]  ;;  %v4398_v48 = vld [vmem:[#allocation6 + $0x744] ss:$8 sps:$4 sm:$0xff]  }
 0x2fc   : > { %2687 = vmatprep.mubr.bf16.mxu1 %v5524_v18  ;;  %v4387_v47 = vld [vmem:[#allocation6 + $0x770] ss:$8 sps:$4 sm:$0xff]   ;;  %v2889_v24 = vpack.c.bf16 %v2884_v46, %v2883_v38  ;;  %v4395_v12 = vld [vmem:[#allocation6 + $0x754] ss:$8 sps:$4 sm:$0xff]   ;;  %v4396_v22 = vld [vmem:[#allocation6 + $0x740] ss:$8 sps:$4 sm:$0xff]  }
 0x2fd   : > { %v5330_v58 = vmul.f32 %v5525_v0, %v2359_v28  ;;  %2815 = vmatpush1.bf16.msra.mxu0 %v4345_v42  ;;  %v2401_v57 = vld [vmem:[#allocation2 + $0x1f] sm:$0xff]  ;;  %v4393_v39 = vld [vmem:[#allocation6 + $0x750] ss:$8 sps:$4 sm:$0xff]  }
 0x2fe   : > { %2992 = vmatpush1.bf16.msra.mxu1 %v4348_v3  ;;  %v2375_v53 = vld [vmem:[#allocation2 + $0x1e] sm:$0xff]  ;;  %2816 = vmatprep.subr.bf16.mxu0 %v4353_v55  ;;  %v2405_v50 = vpack.c.bf16 %v2401_v57, %v2400_v35  ;;  %v4405_v57 = vld [vmem:[#allocation6 + $0x710] ss:$8 sps:$4 sm:$0xff]  }
 0x2ff   : > { %2993 = vmatprep.subr.bf16.mxu1 %v4356_v21  ;;  %v2379_v23 = vpack.c.bf16 %v2375_v53, %v2374_v7  ;;  %2371 = vst [vmem:[#allocation2 + $0x30] sm:$0xff] %v5330_v58  ;;  %v2885_v43 = vld [vmem:[#allocation2 + $0x19] sm:$0xff]  ;;  %v2714_v28 = vpack.c.bf16 %v5330_v58, %v5323_v6  ;;  %v4410_v7 = vld [vmem:[#allocation6 + $0x704] ss:$8 sps:$4 sm:$0xff]  }
 0x300   : > { %2547 = vmatmul.mubr.bf16.gmra.mxu0 %v2405_v50  ;;  %v4401_v42 = vld [vmem:[#allocation6 + $0x734] ss:$8 sps:$4 sm:$0xff]   ;;  %v4399_v21 = vld [vmem:[#allocation6 + $0x730] ss:$8 sps:$4 sm:$0xff]   ;;  %v4402_v35 = vld [vmem:[#allocation6 + $0x720] ss:$8 sps:$4 sm:$0xff]  }
 0x301   : > { %2688 = vmatmul.mubr.bf16.gmra.mxu1 %v2379_v23  ;;  %2817 = vmatpush1.bf16.msra.mxu0 %v4351_v1  ;;  %v4407_v0 = vld [vmem:[#allocation6 + $0x714] ss:$8 sps:$4 sm:$0xff]   ;;  %v4408_v53 = vld [vmem:[#allocation6 + $0x700] ss:$8 sps:$4 sm:$0xff]  }
 0x302   : > { %2994 = vmatpush1.bf16.msra.mxu1 %v4354_v10  ;;  %2818 = vmatprep.subr.bf16.mxu0 %v4359_v40  ;;  %v2402_v61 = vld [vmem:[#allocation2 + $0x27] sm:$0xff]  ;;  %v3061_v50 = vld [vmem:[#allocation2 + $0x12] sm:$0xff] }
 0x303   : > { %2995 = vmatprep.subr.bf16.mxu1 %v4362_v36  ;;  %2556 = vmatprep.mubr.bf16.mxu0 %v5524_v18  ;;  %v2376_v54 = vld [vmem:[#allocation2 + $0x26] sm:$0xff]  ;;  %v3062_v36 = vld [vmem:[#allocation2 + $0x1a] sm:$0xff] }
 0x304   : > { %2697 = vmatprep.mubr.bf16.mxu1 %v5524_v18  ;;  %v2886_v29 = vld [vmem:[#allocation2 + $0x21] sm:$0xff]  ;;  %v3060_v58 = vld [vmem:[#allocation2 + $0xa] sm:$0xff] }
 0x305   : > { %2819 = vmatpush1.bf16.msra.mxu0 %v4357_v13  ;;  %v2890_v41 = vpack.c.bf16 %v2886_v29, %v2885_v43  ;;  %v4404_v10 = vld [vmem:[#allocation6 + $0x724] ss:$8 sps:$4 sm:$0xff]   ;;  %v3066_v23 = vpack.c.bf16 %v3061_v50, %v3060_v58 }
 0x306   : > { %2996 = vmatpush1.bf16.msra.mxu1 %v4360_v31  ;;  %2820 = vmatprep.subr.bf16.mxu0 %v4365_v19  ;;  %v2403_v27 = vld [vmem:[#allocation2 + $0x2f] sm:$0xff]  ;;  %v3063_v40 = vld [vmem:[#allocation2 + $0x22] sm:$0xff] }
 0x307   : > { %2997 = vmatprep.subr.bf16.mxu1 %v4368_v59  ;;  %v2377_v32 = vld [vmem:[#allocation2 + $0x2e] sm:$0xff]  ;;  %v2406_v16 = vpack.c.bf16 %v2403_v27, %v2402_v61  ;;  %v3067_v13 = vpack.c.bf16 %v3063_v40, %v3062_v36  ;;  %v4414_v27 = vld [vmem:[#allocation8 + $0x20] sm:$0xff]  }
 0x308   : > { %v2380_v44 = vpack.c.bf16 %v2377_v32, %v2376_v54  ;;  %v2887_v3 = vld [vmem:[#allocation2 + $0x29] sm:$0xff]  ;;  %v2888_v55 = vld [vmem:[#allocation2 + $0x31] sm:$0xff] }
 0x309   : > { %2557 = vmatmul.mubr.bf16.gmra.mxu0 %v2406_v16  ;;  %v2891_v1 = vpack.c.bf16 %v2888_v55, %v2887_v3  ;;  %v3064_v31 = vld [vmem:[#allocation2 + $0x2a] sm:$0xff]  ;;  %v3065_v19 = vld [vmem:[#allocation2 + $0x32] sm:$0xff]  ;;  %v4418_v16 = vld [vmem:[#allocation8] sm:$0xff]  }
 0x30a   : > { %2698 = vmatmul.mubr.bf16.gmra.mxu1 %v2380_v44  ;;  %2821 = vmatpush1.bf16.msra.mxu0 %v4363_v9  ;;  %v3068_v59 = vpack.c.bf16 %v3065_v19, %v3064_v31  ;;  %v4411_v9 = vld [vmem:[#allocation8 + $0x38] sm:$0xff]   ;;  %v4413_v61 = vld [vmem:[#allocation8 + $0x28] sm:$0xff]   ;;  %v4416_v32 = vld [vmem:[#allocation8 + $0x10] sm:$0xff]  }
 0x30b   : > { %2998 = vmatpush1.bf16.msra.mxu1 %v4366_v62  ;;  %2822 = vmatprep.subr.bf16.mxu0 %v4371_v15  ;;  %v4412_v62 = vld [vmem:[#allocation8 + $0x30] sm:$0xff]   ;;  %v4415_v54 = vld [vmem:[#allocation8 + $0x18] sm:$0xff]  }
 0x30c   : > { %2999 = vmatprep.subr.bf16.mxu1 %v4374_v17  ;;  %2844 = vmatprep.mubr.bf16.mxu0 %v5524_v18 }
 0x30d   : > { %3021 = vmatprep.mubr.bf16.mxu1 %v5524_v18 }
 0x30e   : > { %2823 = vmatpush1.bf16.msra.mxu0 %v4369_v49 }
 0x30f   : > { %3000 = vmatpush1.bf16.msra.mxu1 %v4372_v25  ;;  %2824 = vmatprep.subr.bf16.mxu0 %v4377_v4 }
 0x310   : > { %3001 = vmatprep.subr.bf16.mxu1 %v4380_v51 }
 0x312   : > { %2825 = vmatpush1.bf16.msra.mxu0 %v4375_v5 }
 0x313   : > { %3002 = vmatpush1.bf16.msra.mxu1 %v4378_v34  ;;  %2826 = vmatprep.subr.bf16.mxu0 %v4383_v2 }
 0x314   : > { %3003 = vmatprep.subr.bf16.mxu1 %v4386_v11 }
 0x316   : > { %2827 = vmatpush1.bf16.msra.mxu0 %v4381_v20 }
 0x317   : > { %3004 = vmatpush1.bf16.msra.mxu1 %v4384_v52  ;;  %3166 = vmatprep.subr.bf16.mxu0 %v4389_v45 }
 0x318   : > { %3920 = vmatprep.subr.bf16.mxu1 %v4411_v9 }
 0x319   : > { %2845 = vmatmul.mubr.bf16.vlgmr.msra.gmra.mxu0 %v2712_v56 }
 0x31a   : > { %3022 = vmatmul.mubr.bf16.vlgmr.msra.gmra.mxu1 %v2889_v24  ;;  %3167 = vmatpush1.bf16.msra.mxu0 %v4387_v47 }
 0x31b   : > { %2854 = vmatprep.mubr.bf16.mxu0 %v5524_v18  ;;  %3168 = vmatprep.subr.bf16.mxu0 %v4392_v8 }
 0x31c   : > { %3031 = vmatprep.mubr.bf16.mxu1 %v5524_v18  ;;  %3921 = vmatpush3.bf16.msra.mxu1 %v4411_v9 }
 0x31d   : > { %3922 = vmatprep.subr.bf16.mxu1 %v4412_v62 }
 0x31e   : > { %3169 = vmatpush1.bf16.msra.mxu0 %v4390_v63 }
 0x31f   : > { %3170 = vmatprep.subr.bf16.mxu0 %v4395_v12 }
 0x320   : > { %3923 = vmatpush3.bf16.msra.mxu1 %v4412_v62 }
 0x321   : > { %2855 = vmatmul.mubr.bf16.gmra.mxu0 %v2713_v30  ;;  %3924 = vmatprep.subr.bf16.mxu1 %v4413_v61 }
 0x322   : > { %3032 = vmatmul.mubr.bf16.gmra.mxu1 %v2890_v41  ;;  %3171 = vmatpush1.bf16.msra.mxu0 %v4393_v39 }
 0x323   : > { %2864 = vmatprep.mubr.bf16.mxu0 %v5524_v18  ;;  %3172 = vmatprep.subr.bf16.mxu0 %v4398_v48 }
 0x324   : > { %3041 = vmatprep.mubr.bf16.mxu1 %v5524_v18  ;;  %3925 = vmatpush3.bf16.msra.mxu1 %v4413_v61 }
 0x325   : > { %3926 = vmatprep.subr.bf16.mxu1 %v4414_v27 }
 0x326   : > { %3173 = vmatpush1.bf16.msra.mxu0 %v4396_v22 }
 0x327   : > { %3174 = vmatprep.subr.bf16.mxu0 %v4401_v42 }
 0x328   : > { %3927 = vmatpush3.bf16.msra.mxu1 %v4414_v27 }
 0x329   : > { %2865 = vmatmul.mubr.bf16.gmra.mxu0 %v2714_v28  ;;  %3928 = vmatprep.subr.bf16.mxu1 %v4415_v54 }
 0x32a   : > { %3042 = vmatmul.mubr.bf16.gmra.mxu1 %v2891_v1  ;;  %3175 = vmatpush1.bf16.msra.mxu0 %v4399_v21 }
 0x32b   : > { %3198 = vmatprep.mubr.bf16.mxu0 %v5524_v18  ;;  %3176 = vmatprep.subr.bf16.mxu0 %v4404_v10 }
 0x32c   : > { %3929 = vmatpush3.bf16.msra.mxu1 %v4415_v54 }
 0x32d   : > { %3930 = vmatprep.subr.bf16.mxu1 %v4416_v32 }
 0x32e   : > { %3177 = vmatpush1.bf16.msra.mxu0 %v4402_v35 }
 0x32f   : > { %3178 = vmatprep.subr.bf16.mxu0 %v4407_v0 }
 0x330   : > { %3931 = vmatpush3.bf16.msra.mxu1 %v4416_v32 }
 0x332   : > { %3179 = vmatpush1.bf16.msra.mxu0 %v4405_v57 }
 0x333   : > { %3180 = vmatprep.subr.bf16.mxu0 %v4410_v7 }
 0x336   : > { %3181 = vmatpush1.bf16.msra.mxu0 %v4408_v53 }
 0x339   : > { %3199 = vmatmul.mubr.bf16.vlgmr.msra.gmra.mxu0 %v3066_v23 }
 0x33a   : > { %3208 = vmatprep.mubr.bf16.mxu0 %v5524_v18 }
 0x341   : > { %3209 = vmatmul.mubr.bf16.gmra.mxu0 %v3067_v13 }
 0x342   : > { %3218 = vmatprep.mubr.bf16.mxu0 %v5524_v18  ;;  %v4417_v18 = vld [vmem:[#allocation8 + $0x8] sm:$0xff]  }
 0x343   : > { %3932 = vmatprep.subr.bf16.mxu1 %v4417_v18 }
 0x344   : > { %3933 = vmatpush3.bf16.msra.mxu1 %v4417_v18 }
 0x345   : > { %3934 = vmatprep.subr.bf16.mxu1 %v4418_v16 }
 0x348   : > { %3935 = vmatpush3.bf16.msra.mxu1 %v4418_v16 }
 0x349   : > { %3219 = vmatmul.mubr.bf16.gmra.mxu0 %v3068_v59 }
 0x3b8   : > { %v2538_v44 = vpop.f32.mrf.mxu0 }
 0x3b9   : > { %v2679_v15 = vpop.f32.mrf.mxu1 }
 0x3ba   : > { %v2680_v17 = vadd.f32 %v2679_v15, %v2538_v44  ;;  %v2540_v49 = vpop.f32.mrf.mxu0 }
 0x3bb   : > { %v2681_v25 = vpop.f32.mrf.mxu1 }
 0x3bc   : > { %v2682_v4 = vadd.f32 %v2681_v25, %v2540_v49  ;;  %v2542_v51 = vpop.f32.mrf.mxu0  ;;  %v5526_v49 = vld [vmem:[#allocation19_spill] sm:$0xff] }
 0x3bd   : > { %v2683_v5 = vpop.f32.mrf.mxu1  ;;  %v3243_v25 = vsub.s32 6, %v5526_v49 }
 0x3be   : > { %v2684_v34 = vadd.f32 %v2683_v5, %v2542_v51  ;;  %v2544_v2 = vpop.f32.mrf.mxu0 }
 0x3bf   : > { %v2685_v11 = vpop.f32.mrf.mxu1  ;;  %v3244_v5 = vrot.slane %v5253_v33, %v3243_v25 }
 0x3c0   : > { %v2686_v20 = vadd.f32 %v2685_v11, %v2544_v2  ;;  %v2548_v52 = vpop.f32.mrf.mxu0 }
 0x3c1   : > { %v2689_v45 = vpop.f32.mrf.mxu1 }
 0x3c2   : > { %v2690_v46 = vadd.f32 %v2689_v45, %v2548_v52  ;;  %v2550_v38 = vpop.f32.mrf.mxu0 }
 0x3c3   : > { %v2691_v47 = vpop.f32.mrf.mxu1 }
 0x3c4   : > { %v2552_v56 = vpop.f32.mrf.mxu0 }
 0x3c5   : > { %v2693_v24 = vpop.f32.mrf.mxu1 }
 0x3c6   : > { %v5350_v8 = vadd.f32 %v2693_v24, %v2552_v56  ;;  %v2554_v63 = vpop.f32.mrf.mxu0  ;;  %v2692_v56 = vadd.f32 %v2691_v47, %v2550_v38 }
 0x3c7   : > { %v2695_v12 = vpop.f32.mrf.mxu1 }
 0x3c9   : > { %v2558_v29 = vpop.f32.mrf.mxu0 }
 0x3ca   : > { %v2699_v43 = vpop.f32.mrf.mxu1 }
 0x3cb   : > { %v5352_v39 = vadd.f32 %v2699_v43, %v2558_v29  ;;  %v2560_v30 = vpop.f32.mrf.mxu0 }
 0x3cc   : > { %v2701_v41 = vpop.f32.mrf.mxu1 }
 0x3cd   : > { %v2562_v48 = vpop.f32.mrf.mxu0 }
 0x3ce   : > { %v2703_v22 = vpop.f32.mrf.mxu1 }
 0x3cf   : > { %v2563_v42 = vpop.f32.mrf.mxu0 }
 0x3d0   : > { %v2704_v3 = vpop.f32.mrf.mxu1 }
 0x3d1   : > { %v2696_v3 = vadd.f32 %v2695_v12, %v2554_v63 }
 0x3d9   : > { %v2846_v55 = vpop.f32.mrf.mxu0 }
 0x3da   : > { %v3023_v21 = vpop.f32.mrf.mxu1  ;;  %v2873_v28 = vadd.f32 %v2846_v55, %v2680_v17 }
 0x3db   : > { %v2848_v1 = vpop.f32.mrf.mxu0 }
 0x3dc   : > { %v3025_v10 = vpop.f32.mrf.mxu1  ;;  %v5354_v35 = vadd.f32 %v3023_v21, %v2873_v28  ;;  %v2874_v51 = vadd.f32 %v2848_v1, %v2682_v4 }
 0x3dd   : > { %v2850_v0 = vpop.f32.mrf.mxu0 }
 0x3de   : > { %v3027_v57 = vpop.f32.mrf.mxu1  ;;  %v2875_v7 = vadd.f32 %v2850_v0, %v2684_v34  ;;  %v3239_v34 = vsub.s32 2, %v5526_v49  ;;  %v3051_v11 = vadd.f32 %v3025_v10, %v2874_v51  ;;  %v2702_v10 = vadd.f32 %v2701_v41, %v2560_v30 }
 0x3df   : > { %v2852_v53 = vpop.f32.mrf.mxu0 }
 0x3e0   : > { %v3029_v50 = vpop.f32.mrf.mxu1  ;;  %v5356_v58 = vadd.f32 %v3027_v57, %v2875_v7  ;;  %v2876_v52 = vadd.f32 %v2852_v53, %v2686_v20  ;;  %v3254_v45 = vrot.slane %v3244_v5, %v3239_v34 }
 0x3e1   : > { %v2856_v23 = vpop.f32.mrf.mxu0 }
 0x3e2   : > { %v3033_v40 = vpop.f32.mrf.mxu1  ;;  %v2877_v36 = vadd.f32 %v2856_v23, %v2690_v46  ;;  %v3053_v43 = vadd.f32 %v3029_v50, %v2876_v52 }
 0x3e3   : > { %v2858_v13 = vpop.f32.mrf.mxu0 }
 0x3e4   : > { %v3035_v31 = vpop.f32.mrf.mxu1  ;;  %v5358_v19 = vadd.f32 %v3033_v40, %v2877_v36  ;;  %v2878_v48 = vadd.f32 %v2858_v13, %v2692_v56 }
 0x3e5   : > { %v5360_v59 = vpop.f32.mrf.mxu0 }
 0x3e6   : > { %v5362_v9 = vpop.f32.mrf.mxu1  ;;  %v3055_v28 = vadd.f32 %v3035_v31, %v2878_v48 }
 0x3e7   : > { %v2862_v62 = vpop.f32.mrf.mxu0 }
 0x3e8   : > { %v3039_v61 = vpop.f32.mrf.mxu1  ;;  %v2880_v1 = vadd.f32 %v2862_v62, %v2696_v3 }
 0x3e9   : > { %v5364_v27 = vpop.f32.mrf.mxu0 }
 0x3ea   : > { %v5366_v54 = vpop.f32.mrf.mxu1  ;;  %v3057_v38 = vadd.f32 %v3039_v61, %v2880_v1 }
 0x3eb   : > { %v2868_v32 = vpop.f32.mrf.mxu0 }
 0x3ec   : > { %v3045_v18 = vpop.f32.mrf.mxu1  ;;  %v2882_v47 = vadd.f32 %v2868_v32, %v2702_v10 }
 0x3ed   : > { %v2870_v16 = vpop.f32.mrf.mxu0 }
 0x3ee   : > { %v3047_v44 = vpop.f32.mrf.mxu1  ;;  %v3059_v12 = vadd.f32 %v3045_v18, %v2882_v47 }
 0x3ef   : > { %v2871_v15 = vpop.f32.mrf.mxu0 }
 0x3f0   : > { %v3048_v17 = vpop.f32.mrf.mxu1 }
 0x3f1   : > { %v3240_v17 = vrot.slane %v5253_v33, %v3239_v34  ;;  %v2879_v33 = vadd.f32 %v5360_v59, %v5350_v8 }
 0x3f3   : > { %v3250_v51 = vrot.slane %v3240_v17, %v3239_v34  ;;  %v3056_v3 = vadd.f32 %v5362_v9, %v2879_v33 }
 0x3f9   : > { %v3200_v2 = vpop.f32.mrf.mxu0 }
 0x3fa   : > { %v3227_v18 = vadd.f32 %v3200_v2, %v5354_v35 }
 0x3fb   : > { %v3202_v46 = vpop.f32.mrf.mxu0 }
 0x3fc   : > { %v3228_v24 = vadd.f32 %v3202_v46, %v3051_v11  ;;  %v3255_v52 = vadd.f32 %v3250_v51, %v3227_v18  ;;  %v4511_v46 = vld [vmem:[%s5039_s17] sm:$0x7]  ;;  %s4596_s17 = sshll.u32 %s4703_s15, 4  ;;  %s4597_s17 = int_to_ptr.vmem [resolvable:$false] %s4596_s17 }
 0x3fd   : > { %v3204_v29 = vpop.f32.mrf.mxu0  ;;  %s4598_s8 = scalar_lea.vmem %s4597_s17, 1024  ;;  %p4599_p2 = scmp.lt.s32.totalorder %s5398_s9, %s4597_s17 }
 0x3fe   : > { %v3256_v22 = vadd.f32 %v3254_v45, %v3228_v24  ;;  %v3229_v56 = vadd.f32 %v3204_v29, %v5356_v58  ;;  %p4600_p11 = scmp.lt.s32.totalorder %s4598_s8, %s4592_s25 }
 0x3ff   : > { %v3206_v42 = vpop.f32.mrf.mxu0 }
 0x400   : > { %v3890_v55 = vmul.f32 -1.442695, %v3256_v22  ;;  %v3230_v21 = vadd.f32 %v3206_v42, %v3053_v43  ;;  %v3257_v22 = vadd.f32 %v3250_v51, %v3229_v56  ;;  %p4601_p12 = por %p4600_p11, %p4599_p2 }
 0x401   : > { %v3210_v4 = vpop.f32.mrf.mxu0 }
 0x402   : > { %4467 = vpow2.f32 %v3890_v55  ;;  %v3258_v0 = vadd.f32 %v3254_v45, %v3230_v21  ;;  %v3231_v42 = vadd.f32 %v3210_v4, %v5358_v19  ;;  %p4602_p13 = pnand %p4601_p12, %p4595_p9 }
 0x403   : > { %v3212_v57 = vpop.f32.mrf.mxu0 }
 0x404   : > { %v3891_v20 = vmul.f32 -1.442695, %v3258_v0  ;;  %v3232_v7 = vadd.f32 %v3212_v57, %v3055_v28  ;;  %v3259_v21 = vadd.f32 %v3250_v51, %v3231_v42 }
 0x405   : > { %v3214_v53 = vpop.f32.mrf.mxu0 }
 0x406   : > { %4469 = vpow2.f32 %v3891_v20  ;;  %v3260_v50 = vadd.f32 %v3254_v45, %v3232_v7  ;;  %v3233_v28 = vadd.f32 %v3214_v53, %v3056_v3 }
 0x407   : > { %v3216_v23 = vpop.f32.mrf.mxu0 }
 0x408   : > { %v3892_v40 = vmul.f32 -1.442695, %v3260_v50  ;;  %v3234_v36 = vadd.f32 %v3216_v23, %v3057_v38  ;;  %v3261_v0 = vadd.f32 %v3250_v51, %v3233_v28 }
 0x409   : > { %v3220_v63 = vpop.f32.mrf.mxu0 }
 0x40a   : > { %4471 = vpow2.f32 %v3892_v40  ;;  %v3262_v13 = vadd.f32 %v3254_v45, %v3234_v36 }
 0x40b   : > { %v3222_v31 = vpop.f32.mrf.mxu0 }
 0x40c   : > { %v3893_v62 = vmul.f32 -1.442695, %v3262_v13  ;;  %v3236_v16 = vadd.f32 %v3222_v31, %v3059_v12 }
 0x40d   : > { %v3224_v44 = vpop.f32.mrf.mxu0 }
 0x40e   : > { %4473 = vpow2.f32 %v3893_v62  ;;  %v3264_v30 = vadd.f32 %v3254_v45, %v3236_v16  ;;  %v3268_v45 = vrot.slane %v4511_v46, %v3239_v34  ;;  %v2881_v34 = vadd.f32 %v5364_v27, %v5352_v39 }
 0x40f   : > { %v4468_v41 = vpop.eup %4467  ;;  %v3225_v15 = vpop.f32.mrf.mxu0 }
 0x410   : > { %v3289_v61 = vadd.f32 1.0, %v4468_v41  ;;  %v3894_v32 = vmul.f32 -1.442695, %v3264_v30  ;;  %v3269_v48 = vadd.f32 %v3268_v45, %v3255_v52  ;;  %v3270_v29 = vadd.f32 %v3268_v45, %v3257_v22 }
 0x411   : > { %v3058_v19 = vadd.f32 %v5366_v54, %v2881_v34  ;;  %v3271_v4 = vadd.f32 %v3268_v45, %v3259_v21  ;;  %v3272_v27 = vadd.f32 %v3268_v45, %v3261_v0 }
 0x412   : > { %4475 = vrcp.f32 %v3289_v61 }
 0x413   : > { %v4470_v49 = vpop.eup %4469  ;;  %4477 = vpow2.f32 %v3894_v32  ;;  %v3235_v10 = vadd.f32 %v3220_v63, %v3058_v19 }
 0x414   : > { %v3290_v25 = vadd.f32 1.0, %v4470_v49 }
 0x415   : > { %v3263_v53 = vadd.f32 %v3250_v51, %v3235_v10 }
 0x416   : > { %4479 = vrcp.f32 %v3290_v25 }
 0x417   : > { %v4472_v5 = vpop.eup %4471  ;;  %v3273_v40 = vadd.f32 %v3268_v45, %v3263_v53 }
 0x418   : > { %v3291_v11 = vadd.f32 1.0, %v4472_v5 }
 0x41a   : > { %4481 = vrcp.f32 %v3291_v11 }
 0x41b   : > { %v4474_v24 = vpop.eup %4473 }
 0x41c   : > { %v3292_v43 = vadd.f32 1.0, %v4474_v24 }
 0x41e   : > { %4483 = vrcp.f32 %v3292_v43 }
 0x41f   : > { %v4476_v35 = vpop.eup %4475 }
 0x420   : > { %v4478_v2 = vpop.eup %4477  ;;  %v3304_v55 = vmul.f32 %v4476_v35, %v3269_v48 }
 0x421   : > { %v3293_v58 = vadd.f32 1.0, %v4478_v2 }
 0x422   : > { %v3309_v59 = vadd.f32 %v3304_v55, %v5293_v37 }
 0x423   : > { %v4480_v1 = vpop.eup %4479  ;;  %4485 = vrcp.f32 %v3293_v58 }
 0x424   : > { %v3305_v8 = vmul.f32 %v4480_v1, %v3270_v29  ;;  %v3314_v7 = vmul.f32 0.70710677, %v3309_v59 }
 0x426   : > { %v3310_v57 = vadd.f32 %v3305_v8, %v5302_v26 }
 0x427   : > { %v4482_v9 = vpop.eup %4481 }
 0x428   : > { %v3306_v20 = vmul.f32 %v4482_v9, %v3271_v4  ;;  %v3315_v39 = vmul.f32 0.70710677, %v3310_v57 }
 0x42a   : > { %v3319_v38 = vpack.c.bf16 %v3315_v39, %v3314_v7  ;;  %v3311_v23 = vadd.f32 %v3306_v20, %v5310_v60  ;;  %v3895_v60 = vld [vmem:[%s5456_s5] ss:$0 sm:$0xff] }
 0x42b   : > { %v4484_v47 = vpop.eup %4483 }
 0x42c   : > { %v3307_v50 = vmul.f32 %v4484_v47, %v3272_v27  ;;  %v3316_v36 = vmul.f32 0.70710677, %v3311_v23  ;;  %v3349_v31 = vrot.slane %v3319_v38, 3 }
 0x42e   : > { %v3312_v37 = vadd.f32 %v3307_v50, %v5317_v14 }
 0x430   : > { %v4486_v54 = vpop.eup %4485  ;;  %v3317_v12 = vmul.f32 0.70710677, %v3312_v37 }
 0x431   : > { %v3308_v13 = vmul.f32 %v4486_v54, %v3273_v40 }
 0x432   : > { %v3320_v26 = vpack.c.bf16 %v3317_v12, %v3316_v36 }
 0x433   : > { %v3313_v63 = vadd.f32 %v3308_v13, %v5323_v6 }
 0x434   : > { %v3350_v62 = vrot.slane %v3320_v26, 3 }
 0x435   : > { %v3318_v16 = vmul.f32 0.70710677, %v3313_v63 }
 0x436   : > { %v3351_v44 = vsel %vm3348_vm2, %v3349_v31, %v3350_v62 }
 0x437   : > { %3936 = vmatprep.mubr.bf16.mxu1 %v3351_v44  ;;  %v3321_v30 = vpack.c.bf16 %v3318_v16, %v3318_v16 }
 0x439   : > { %v3352_v41 = vrot.slane %v3321_v30, 3 }
 0x43b   : > { %v3353_v15 = vsel %vm3348_vm2, %v3350_v62, %v3352_v41 }
 0x43c   : > { %3937 = vmatmul.mubr.bf16.vlgmr.msra.gmra.mxu1 %v3353_v15 }
 0x4fc   : > { %v3938_v14 = vpop.f32.mrf.mxu1 }
 0x4fd   : > { %v3447_v61 = vadd.f32 %v3938_v14, %v3895_v60 }
 0x4fe   : > { %v3438_v32 = vpop.f32.mrf.mxu1 }
 0x4ff   : > { %v3455_v17 = vmax.f32 %v3447_v61, 1e-07  ;;  %v3439_v49 = vadd.f32 %v3895_v60, %v3438_v32 }
 0x500   : > { %v3939_v25 = vpop.f32.mrf.mxu1 }
 0x501   : > { %4487 = vlog2.f32 %v3455_v17  ;;  %v3453_v6 = vmax.f32 %v3439_v49, 1e-07  ;;  %v3450_v18 = vadd.f32 %v3939_v25, %v3895_v60 }
 0x502   : > { %v3441_v51 = vpop.f32.mrf.mxu1 }
 0x503   : > { %4489 = vlog2.f32 %v3453_v6  ;;  %v3456_v5 = vmax.f32 %v3450_v18, 1e-07  ;;  %v3442_v11 = vadd.f32 %v3895_v60, %v3441_v51 }
 0x505   : > { %4491 = vlog2.f32 %v3456_v5  ;;  %v3454_v52 = vmax.f32 %v3442_v11, 1e-07 }
 0x507   : > { %4493 = vlog2.f32 %v3454_v52 }
 0x50e   : > { %v4488_v46 = vpop.eup %4487 }
 0x50f   : > { %v3462_v45 = vmul.f32 0.6931472, %v4488_v46 }
 0x510   : > { %v4490_v56 = vpop.eup %4489 }
 0x511   : > { %v3467_v24 = vmul.f32 1.4, %v3462_v45  ;;  %v3458_v33 = vmul.f32 0.6931472, %v4490_v56 }
 0x512   : > { %v4492_v43 = vpop.eup %4491 }
 0x513   : > { %v3473_v48 = vmul.f32 1.442695, %v3467_v24  ;;  %v3465_v22 = vmul.f32 1.4, %v3458_v33  ;;  %v3464_v42 = vmul.f32 0.6931472, %v4492_v43 }
 0x514   : > { %v4494_v35 = vpop.eup %4493 }
 0x515   : > { %4495 = vpow2.f32 %v3473_v48  ;;  %v3469_v2 = vmul.f32 1.442695, %v3465_v22  ;;  %v3468_v3 = vmul.f32 1.4, %v3464_v42  ;;  %v3460_v55 = vmul.f32 0.6931472, %v4494_v35 }
 0x517   : > { %4497 = vpow2.f32 %v3469_v2  ;;  %v3475_v34 = vmul.f32 1.442695, %v3468_v3  ;;  %v3466_v58 = vmul.f32 1.4, %v3460_v55 }
 0x519   : > { %4499 = vpow2.f32 %v3475_v34  ;;  %v3471_v29 = vmul.f32 1.442695, %v3466_v58 }
 0x51b   : > { %4501 = vpow2.f32 %v3471_v29 }
 0x522   : > { %v4496_v21 = vpop.eup %4495 }
 0x523   : > { %3479 = vst [vmem:[%s329_s16 + $0x10] sm:$0xff] %v4496_v21 }
 0x524   : > { %v4498_v28 = vpop.eup %4497 }
 0x525   : > { %3477 = vst [vmem:[%s329_s16] sm:$0xff] %v4498_v28 }
 0x526   : > { %v4500_v1 = vpop.eup %4499 }
 0x527   : > { %3480 = vst [vmem:[%s329_s16 + $0x18] sm:$0xff] %v4500_v1 }
 0x528   : > { %v4502_v8 = vpop.eup %4501 }
 0x529   : > { %3478 = vst [vmem:[%s329_s16 + $0x8] sm:$0xff] %v4502_v8 }
 0x52a   : > { %4605 = shalt.err (!%p4602_p13)
}
 0x52b   : > { %s4606_s18 = scalar_lea.hbm %s5396_s12, 512  ;;  %s4610_s14 = scalar_lea.hbm %s5528_s29, 2048 }
 0x52c   : > { %p4607_p3 = scmp.ne.s32.totalorder %s5396_s12, %s4606_s18  ;;  %p4611_p7 = scmp.lt.s32.totalorder %s5396_s12, %s5528_s29 }
 0x52d   : > { %p4612_p1 = scmp.lt.s32.totalorder %s4610_s14, %s4606_s18 }
 0x52e   : > { %p4608_p10 = pnand %p4607_p3, %p4855_p0 }
 0x52f   : > { %p4613_p4 = por %p4612_p1, %p4611_p7 }
 0x530   : > { %p4609_p5 = pneg %p4608_p10 }
 0x532   : > { %p4614_p8 = pnand %p4613_p4, %p4609_p5 }
 0x534   : > { %4617 = shalt.err (!%p4614_p8)
}
 0x535   : > { %s4704_s6 = smov 128   ;;  %s4705_s28 = smov 8  }
 0x536   : > { %3954 = dma.vmem_to_hbm [thread:$0]  (%p4855_p0), %s5398_s9, 512, %s5396_s12, %s3482_s24, %s4704_s6, %s4704_s6, %s4705_s28  }
 0x537 PF: > { %s5529_s16 = sld [smem:[#allocation14_spill]] }
 0x538   : > { %s5530_s7 = sld [smem:[#allocation13_spill]] }
 0x53d   : > { %p3976_p9 = scmp.ge.s32.totalorder %s5529_s16, 2 }
 0x53e   : > { %s3512_s20 = sand.u32 1, %s5530_s7  }
 0x53f   : > { %p3968_p2 = pnand %p3976_p9, %p4800_p6  ;;  %s3513_s25 = scalar_lea.sflag [#allocation5], %s3512_s20 }
 0x541   : > { %p3969_p11 = pneg %p3968_p2 }
 0x543   : > { %4659 = dma.done.wait (%p3969_p11), %s3513_s25, 512  }
 0x544   : > { %4661 = vsyncadd (%p3969_p11), %s3513_s25, 4294966784  ;;  %s23_s28 = sadd.s32 1, %s5529_s16   ;;  %s5532_s30 = sld [smem:[#allocation16_spill]] }
 0x545   : > { %p20_p12 = scmp.ge.s32.totalorder %s23_s28, 6   ;;  %s5533_s9 = sld [smem:[#allocation18_spill]] }
 0x546   : > { %s5534_s21 = smov %s4668_s22  ;;  %s5535_s22 = smov %s4672_s23 }
 0x547   : > { %s5536_s23 = smov %s4874_s10  ;;  %s5537_s24 = smov %s4684_s26 }
 0x548   : > { %s5538_s25 = smov %s4688_s27  ;;  %22 = sbr.rel (!%p20_p12) target bundleno = 12 (0xc), region = 114 }
 0x54a   : > { %s5539_s26 = smov %s5532_s30 }
 0x54b   : > { %s5540_s27 = smov %s5533_s9 }
 0x54d   :  { %3518 = vsyncpa [#allocation4], 1 }
 0x54e   :  { %3520 = vsyncpa [#allocation4 + $0x1], 1 }
 0x54f   :  { %3521 = vsyncpa [#allocation7], 1 }
 0x550   :  { %3522 = vsyncpa [#allocation5], 1 }
 0x551   :  { %3524 = vsyncpa [#allocation5 + $0x1], 1 }

// kernel: tpu_custom_call.1
= control target key start
LH: loop header
LB: loop body
LE: loop exit
PB: predicated region body
PF: predicated region fallthrough
CT: control target
= control target key end

     0   :  { %s5451_s0 = inlined_call_operand.hbm [shape: f32[2,2,48,128], index: 0, kind: input, shape index: {}]   ;;  %s5452_s1 = inlined_call_operand.vmem [shape: f32[2,3,128], index: 1, kind: input, shape index: {}]   ;;  %s5453_s2 = inlined_call_operand.hbm [shape: bf16[3,5,128,256], index: 2, kind: input, shape index: {}]   ;;  %s5454_s3 = inlined_call_operand.vmem [shape: f32[3,256], index: 3, kind: input, shape index: {}]   ;;  %s5455_s4 = inlined_call_operand.hbm [shape: bf16[128,128], index: 4, kind: input, shape index: {}]   ;;  %s5456_s5 = inlined_call_operand.vmem [shape: f32[1,128], index: 5, kind: input, shape index: {}]   ;;  %s5457_s6 = inlined_call_operand.hbm [shape: f32[2,64,128], index: 6, kind: output, shape index: {}]  }
   0x1   :  { %5482 = sst [smem:[#allocation29_spill]] %s5453_s2 }
   0x2   :  { %5483 = sst [smem:[#allocation30_spill]] %s5455_s4 }
   0x3   :  { %5484 = sst [smem:[#allocation31_spill]] %s5457_s6 }
   0x4   :  { %11 = vsyncpa [#allocation4], 0 }
   0x5   :  { %13 = vsyncpa [#allocation4 + $0x1], 0 }
   0x6   :  { %14 = vsyncpa [#allocation7], 0 }
   0x7   :  { %15 = vsyncpa [#allocation5], 0 }
   0x8   :  { %17 = vsyncpa [#allocation5 + $0x1], 0  ;;  %s4741_s21 = smov 0   ;;  %s4743_s22 = smov 0  }
   0x9   :  { %s4745_s23 = smov 0   ;;  %s4747_s24 = smov 0  }
   0xa   :  { %s4749_s25 = smov 0   ;;  %s4751_s26 = smov 0  }
   0xb   :  { %s4753_s27 = smov 0   ;;  %s4755_s28 = smov 0  }
   0xc LB: > { %5485 = sst [smem:[#allocation13_spill]] %s4664_s21  ;;  %s3618_s29 = sadd.s32 4294967295, %s4692_s28   ;;  %s4692_s28 = sphi %s4755_s28, %s23_s28   ;;  %s4688_s27 = sphi %s4753_s27, %s5540_s27   ;;  %s4684_s26 = sphi %s4751_s26, %s5539_s26   ;;  %s4680_s25 = sphi %s4749_s25, %s5538_s25   ;;  %s4676_s24 = sphi %s4747_s24, %s5537_s24   ;;  %s4672_s23 = sphi %s4745_s23, %s5536_s23   ;;  %s4668_s22 = sphi %s4743_s22, %s5535_s22   ;;  %s4664_s21 = sphi %s4741_s21, %s5534_s21  }
   0xd   : > { %5486 = sst [smem:[#allocation14_spill]] %s4692_s28  ;;  %s3619_s30 = sadd.s32 4294967294, %s4692_s28  }
   0xe   : > { %p57_p0 = scmp.ne.s32.totalorder %s4668_s22, %s4664_s21  ;;  %p4785_p1 = scmp.eq.s32.totalorder %s3618_s29, 0 }
   0xf   : > { %p4789_p2 = scmp.eq.s32.totalorder %s3618_s29, 3  ;;  %p199_p3 = scmp.eq.s32.totalorder %s3619_s30, 3 }
  0x10   : > { %p4795_p4 = por %p4785_p1, %p57_p0  ;;  %p3620_p5 = scmp.ge.s32.totalorder %s4692_s28, 1 }
  0x11   : > { %p4800_p6 = por %p199_p3, %p57_p0  ;;  %p206_p7 = scmp.lt.s32.totalorder %s4692_s28, 5 }
  0x12   : > { %s4694_s12 = smov [#allocation6]   ;;  %s4695_s15 = smov [#allocation8]  }
  0x13   : > { %s5490_s10 = scalar_select %p4800_p6, 1, 0 }
  0x14   : > { %p4805_p8 = pnand %p3620_p5, %p206_p7  ;;  %s218_s13 = sshll.u32 %s4694_s12, 4  ;;  %s219_s13 = int_to_ptr.vmem [resolvable:$true] %s218_s13 }
  0x15   : > { %5491 = sst [smem:[#allocation15_spill]] %s5490_s10  ;;  %s234_s16 = sshll.u32 %s4695_s15, 4  ;;  %s235_s16 = int_to_ptr.vmem [resolvable:$true] %s234_s16 }
  0x16   : > { %p3956_p9 = pneg %p4805_p8  ;;  %s4523_s17 = scalar_lea.vmem %s219_s13, 30720 }
  0x17   : > { %p4524_p12 = scmp.ne.s32.totalorder %s219_s13, %s4523_s17  ;;  %p4531_p3 = scmp.lt.s32.totalorder %s219_s13, %s219_s13 }
  0x18   : > { %p4813_p10 = pnand %p3956_p9, %p4785_p1  ;;  %p4532_p5 = scmp.lt.s32.totalorder %s4523_s17, %s4523_s17 }
  0x1a   : > { %p4514_p11 = pneg %p4813_p10  ;;  %p4533_p7 = por %p4532_p5, %p4531_p3 }
  0x1c   : > { %p4526_p13 = pnand %p4524_p12, %p4514_p11 }
  0x1e   : > { %p4527_p0 = pneg %p4526_p13 }
  0x20   : > { %p4534_p9 = pnand %p4533_p7, %p4527_p0 }
  0x22   : > { %4537 = shalt.err (!%p4534_p9)
}
  0x23   : > { %s5458_s18 = smov 128   ;;  %s5459_s19 = smov 8  }
  0x24   : > { %s5494_s2 = sld [smem:[#allocation29_spill]]  ;;  %s4549_s30 = scalar_lea.vmem %s235_s16, 1024 }
  0x25   : > { %p4550_p12 = scmp.ne.s32.totalorder %s235_s16, %s4549_s30  ;;  %p4557_p0 = scmp.lt.s32.totalorder %s235_s16, %s235_s16 }
  0x26   : > { %p4558_p5 = scmp.lt.s32.totalorder %s4549_s30, %s4549_s30 }
  0x27   : > { %p4552_p13 = pnand %p4550_p12, %p4514_p11 }
  0x28   : > { %p4559_p7 = por %p4558_p5, %p4557_p0 }
  0x29   : > { %p4553_p3 = pneg %p4552_p13 }
  0x2a   : > { %3959 = dma.hbm_to_vmem [thread:$0]  (!%p4813_p10), %s5494_s2, 30720, %s219_s13, [#allocation7], %s5458_s18, %s5458_s18, %s5459_s19  }
  0x2b   : > { %p4560_p9 = pnand %p4559_p7, %p4553_p3 }
  0x2d   : > { %4563 = shalt.err (!%p4560_p9)
}
  0x2e   : > { %s4698_s12 = smov 64   ;;  %s4699_s13 = smov 4  }
  0x2f   : > { %s5495_s4 = sld [smem:[#allocation30_spill]]  ;;  %s32_s20 = sadd.s32 1, %s4684_s26 }
  0x30   : > { %s35_s29 = sadd.s32 1, %s4688_s27  ;;  %p33_p11 = scmp.ge.s32.totalorder %s32_s20, 2 }
  0x31   : > { %s44_s30 = sadd.s32 1, %s4672_s23  ;;  %p51_p12 = scmp.ne.s32.totalorder %s4672_s23, %s4668_s22 }
  0x32   : > { %p52_p13 = scmp.eq.s32.totalorder %s4692_s28, 0  ;;  %s5542_s20 = smov (%p33_p11, %s32_s20), 0 }
  0x33   : > { %5496 = sst [smem:[#allocation16_spill]] %s5542_s20  ;;  %s5544_s29 = smov (!%p33_p11, %s35_s29), %s4688_s27 }
  0x34   : > { %s40_s18 = ssub.s32 %s4684_s26, %s5542_s20  ;;  %p4849_p3 = por %p52_p13, %p51_p12 }
  0x35   : > { %3962 = dma.hbm_to_vmem [thread:$0]  (!%p4813_p10), %s5495_s4, 1024, %s235_s16, [#allocation7], %s4698_s12, %s4698_s12, %s4699_s13  }
  0x36   : > { %p37_p10 = scmp.ge.s32.totalorder %s5544_s29, 2  ;;  %p4855_p0 = por %p4789_p2, %p51_p12 }
  0x37   : > { %p3973_p5 = scmp.lt.s32.totalorder %s4692_s28, 4  ;;  %s251_s12 = sand.u32 1, %s4672_s23  }
  0x38   : > { %s5498_s16 = scalar_select %p4855_p0, 1, 0 }
  0x39   : > { %s5546_s29 = smov (%p37_p10, %s5544_s29), 0  ;;  %s3940_s13 = smul.u32 48, %s251_s12 }
  0x3a   : > { %5499 = sst [smem:[#allocation17_spill]] %s5498_s16  ;;  %s39_s15 = ssub.s32 %s4688_s27, %s5546_s29 }
  0x3b   : > { %5500 = sst [smem:[#allocation18_spill]] %s5546_s29  ;;  %s3941_s17 = smul.u32 6, %s4684_s26 }
  0x3c   : > { %s41_s19 = sor.u32 %s40_s18, %s39_s15  ;;  %s3942_s2 = smul.u32 12, %s4688_s27 }
  0x3d   : > { %p42_p7 = scmp.eq.s32.totalorder %s41_s19, 0  ;;  %s255_s4 = scalar_lea.vmem [#allocation3], %s3940_s13 }
  0x3e   : > { %s264_s20 = sshll.u32 %s255_s4, 4  ;;  %p4869_p9 = pnand %p3973_p5, %p4849_p3  ;;  %s265_s20 = int_to_ptr.vmem [resolvable:$true] %s264_s20 }
  0x3f   : > { %s4874_s10 = scalar_select %p42_p7, %s4672_s23, %s44_s30  }
  0x40   : > { %s261_s21 = sadd.s32 %s3942_s2, %s3941_s17  ;;  %s252_s18 = scalar_lea.sflag [#allocation4], %s251_s12 }
  0x41   : > { %s3624_s28 = sshll.u32 %s261_s21, 7  ;;  %p4566_p2 = pneg %p4869_p9 }
  0x42   : > { %s263_s29 = scalar_lea.hbm %s5451_s0, %s3624_s28  ;;  %s4577_s19 = scalar_lea.vmem %s265_s20, 768 }
  0x43   : > { %p4578_p11 = scmp.ne.s32.totalorder %s265_s20, %s4577_s19  ;;  %s4700_s4 = smov [#allocation3]  }
  0x44   : > { %s4582_s14 = sshll.u32 %s4700_s4, 4  ;;  %s4583_s14 = int_to_ptr.vmem [resolvable:$false] %s4582_s14 }
  0x45   : > { %p4580_p12 = pnand %p4578_p11, %p4566_p2  ;;  %s4584_s13 = scalar_lea.vmem %s4583_s14, 1536 }
  0x46   : > { %p4585_p3 = scmp.lt.s32.totalorder %s265_s20, %s4583_s14  ;;  %p4586_p10 = scmp.lt.s32.totalorder %s4584_s13, %s4577_s19 }
  0x47   : > { %p4581_p13 = pneg %p4580_p12 }
  0x48   : > { %p4587_p5 = por %p4586_p10, %p4585_p3 }
  0x4a   : > { %p4588_p7 = pnand %p4587_p5, %p4581_p13 }
  0x4c   : > { %4591 = shalt.err (!%p4588_p7)
}
  0x4d   : > { %s5502_s2 = smov 8   ;;  %s5503_s6 = smov 128  }
  0x4e   : > { %3966 = dma.hbm_to_vmem [thread:$0]  (!%p4869_p9), %s263_s29, 768, %s265_s20, %s252_s18, %s5503_s6, %s5503_s6, %s5502_s2  }
  0x4f   : > { %283 = sbr.rel (%p4805_p8) target bundleno = 1335 (0x537), region = 44 }
  0x54   : > { %s4889_s21 = sand.u32 1, %s4668_s22  }
  0x55   : > { %s3943_s28 = smul.u32 48, %s4889_s21  ;;  %s286_s30 = scalar_lea.sflag [#allocation4], %s4889_s21 }
  0x57   : > { %s4893_s16 = scalar_lea.vmem [#allocation3], %s3943_s28 }
  0x58   : > { %4651 = dma.done.wait (%p4795_p4), %s286_s30, 768  }
  0x59   : > { %4653 = vsyncadd (%p4795_p4), %s286_s30, 4294966528 }
  0x5a   : > { %4655 = dma.done.wait (%p4785_p1), [#allocation7], 31744  }
  0x5b   : > { %4657 = vsyncadd (%p4785_p1), [#allocation7], 4294935552  ;;  %v5469_v0 = vmov 0   ;;  %v4702_v1 = vmov 0.0   ;;  %v4051_v2 = vld [vmem:[#allocation6 + $0xf4] ss:$8 sps:$4 sm:$0xff]  }
  0x5c   : > { %561 = vmatprep.mubr.bf16.mxu0 %v5469_v0  ;;  %704 = vmatprep.mubr.bf16.mxu1 %v5469_v0  ;;  %336 = vst [vmem:[#allocation2] sm:$0xff] %v4702_v1  ;;  %337 = vst [vmem:[#allocation2 + $0x38] sm:$0xff] %v4702_v1  ;;  %v4053_v3 = vld [vmem:[#allocation6 + $0x74] ss:$8 sps:$4 sm:$0xff]   ;;  %v4055_v4 = vld [vmem:[#allocation6 + $0xf0] ss:$8 sps:$4 sm:$0xff]  }
  0x5d   : > { %529 = vmatprep.subr.bf16.mxu0 %v4051_v2  ;;  %v4056_v5 = vld [vmem:[#allocation6 + $0x70] ss:$8 sps:$4 sm:$0xff]   ;;  %672 = vmatprep.subr.bf16.mxu1 %v4053_v3  ;;  %v4057_v6 = vld [vmem:[#allocation6 + $0xe4] ss:$8 sps:$4 sm:$0xff]   ;;  %v4061_v8 = vld [vmem:[#allocation6 + $0xe0] ss:$8 sps:$4 sm:$0xff]  }
  0x5e   : > { %530 = vmatpush1.bf16.msra.mxu0 %v4055_v4  ;;  %673 = vmatpush1.bf16.msra.mxu1 %v4056_v5  ;;  %v4059_v7 = vld [vmem:[#allocation6 + $0x64] ss:$8 sps:$4 sm:$0xff]   ;;  %v4062_v9 = vld [vmem:[#allocation6 + $0x60] ss:$8 sps:$4 sm:$0xff]   ;;  %v4063_v10 = vld [vmem:[#allocation6 + $0xd4] ss:$8 sps:$4 sm:$0xff]  }
  0x5f   : > { %531 = vmatprep.subr.bf16.mxu0 %v4057_v6  ;;  %674 = vmatprep.subr.bf16.mxu1 %v4059_v7  ;;  %v4065_v11 = vld [vmem:[#allocation6 + $0x54] ss:$8 sps:$4 sm:$0xff]   ;;  %v4067_v12 = vld [vmem:[#allocation6 + $0xd0] ss:$8 sps:$4 sm:$0xff]   ;;  %v4069_v14 = vld [vmem:[#allocation6 + $0xc4] ss:$8 sps:$4 sm:$0xff]  }
  0x60   : > { %v4068_v13 = vld [vmem:[#allocation6 + $0x50] ss:$8 sps:$4 sm:$0xff]   ;;  %v4071_v15 = vld [vmem:[#allocation6 + $0x44] ss:$8 sps:$4 sm:$0xff]   ;;  %v4073_v16 = vld [vmem:[#allocation6 + $0xc0] ss:$8 sps:$4 sm:$0xff]  }
  0x61   : > { %v4074_v17 = vld [vmem:[#allocation6 + $0x40] ss:$8 sps:$4 sm:$0xff]   ;;  %v4075_v18 = vld [vmem:[#allocation6 + $0xb4] ss:$8 sps:$4 sm:$0xff]   ;;  %v4079_v20 = vld [vmem:[#allocation6 + $0xb0] ss:$8 sps:$4 sm:$0xff]  }
  0x62   : > { %532 = vmatpush1.bf16.msra.mxu0 %v4061_v8  ;;  %675 = vmatpush1.bf16.msra.mxu1 %v4062_v9  ;;  %v4077_v19 = vld [vmem:[#allocation6 + $0x34] ss:$8 sps:$4 sm:$0xff]   ;;  %v4080_v21 = vld [vmem:[#allocation6 + $0x30] ss:$8 sps:$4 sm:$0xff]   ;;  %v4081_v22 = vld [vmem:[#allocation6 + $0xa4] ss:$8 sps:$4 sm:$0xff]  }
  0x63   : > { %533 = vmatprep.subr.bf16.mxu0 %v4063_v10  ;;  %676 = vmatprep.subr.bf16.mxu1 %v4065_v11  ;;  %v4083_v23 = vld [vmem:[#allocation6 + $0x24] ss:$8 sps:$4 sm:$0xff]   ;;  %v4085_v24 = vld [vmem:[#allocation6 + $0xa0] ss:$8 sps:$4 sm:$0xff]   ;;  %v4087_v26 = vld [vmem:[#allocation6 + $0x94] ss:$8 sps:$4 sm:$0xff]  }
  0x64   : > { %v4086_v25 = vld [vmem:[#allocation6 + $0x20] ss:$8 sps:$4 sm:$0xff]   ;;  %v4089_v27 = vld [vmem:[#allocation6 + $0x14] ss:$8 sps:$4 sm:$0xff]   ;;  %v4091_v30 = vld [vmem:[#allocation6 + $0x90] ss:$8 sps:$4 sm:$0xff]  }
  0x65   : > { %v4906_v28 = vld [vmem:[%s4893_s16] sm:$0xff]  ;;  %v4909_v29 = vld [vmem:[%s4893_s16 + $0x8] sm:$0xff]  ;;  %v4914_v46 = vld [vmem:[%s4893_s16 + $0x10] sm:$0xff]  ;;  %p330_p1 = scmp.lt.s32.totalorder %s4680_s25, 1  ;;  %s3630_s29 = sshll.u32 %s4676_s24, 5 }
  0x66   : > { %534 = vmatpush1.bf16.msra.mxu0 %v4067_v12  ;;  %677 = vmatpush1.bf16.msra.mxu1 %v4068_v13  ;;  %344 = vst [vmem:[#allocation2 + $0x8] sm:$0xff] %v4906_v28  ;;  %345 = vst [vmem:[#allocation2 + $0x10] sm:$0xff] %v4909_v29  ;;  %v4092_v31 = vld [vmem:[#allocation6 + $0x10] ss:$8 sps:$4 sm:$0xff]   ;;  %v4093_v32 = vld [vmem:[#allocation6 + $0x84] ss:$8 sps:$4 sm:$0xff]  }
  0x67   : > { %535 = vmatprep.subr.bf16.mxu0 %v4069_v14  ;;  %678 = vmatprep.subr.bf16.mxu1 %v4071_v15  ;;  %v4095_v33 = vld [vmem:[#allocation6 + $0x4] ss:$8 sps:$4 sm:$0xff]   ;;  %v4097_v34 = vld [vmem:[#allocation6 + $0x80] ss:$8 sps:$4 sm:$0xff]   ;;  %v4101_v36 = vld [vmem:[#allocation6 + $0x174] ss:$8 sps:$4 sm:$0xff]  }
  0x68   : > { %v4098_v35 = vld [vmem:[#allocation6] ss:$8 sps:$4 sm:$0xff]   ;;  %v4104_v37 = vld [vmem:[#allocation6 + $0x1f4] ss:$8 sps:$4 sm:$0xff]   ;;  %v4099_v42 = vld [vmem:[#allocation6 + $0x170] ss:$8 sps:$4 sm:$0xff]  }
  0x69   : > { %v4102_v45 = vld [vmem:[#allocation6 + $0x1f0] ss:$8 sps:$4 sm:$0xff]   ;;  %v4107_v48 = vld [vmem:[#allocation6 + $0x164] ss:$8 sps:$4 sm:$0xff]   ;;  %346 = vst [vmem:[#allocation2 + $0x18] sm:$0xff] %v4914_v46  ;;  %s331_s11 = scalar_select %p330_p1, %s4680_s25, 1 }
  0x6a   : > { %536 = vmatpush1.bf16.msra.mxu0 %v4073_v16  ;;  %679 = vmatpush1.bf16.msra.mxu1 %v4074_v17  ;;  %v4917_v47 = vld [vmem:[%s4893_s16 + $0x18] sm:$0xff]  ;;  %v4922_v54 = vld [vmem:[%s4893_s16 + $0x20] sm:$0xff]  ;;  %v4925_v55 = vld [vmem:[%s4893_s16 + $0x28] sm:$0xff]  ;;  %s3631_s8 = sadd.s32 4294967290, %s3630_s29  ;;  %s3628_s13 = sshll.u32 %s4889_s21, 5 }
  0x6b   : > { %537 = vmatprep.subr.bf16.mxu0 %v4075_v18  ;;  %680 = vmatprep.subr.bf16.mxu1 %v4077_v19  ;;  %347 = vst [vmem:[#allocation2 + $0x20] sm:$0xff] %v4917_v47  ;;  %v4110_v49 = vld [vmem:[#allocation6 + $0x1e4] ss:$8 sps:$4 sm:$0xff]   ;;  %v4105_v50 = vld [vmem:[#allocation6 + $0x160] ss:$8 sps:$4 sm:$0xff]   ;;  %348 = vst [vmem:[#allocation2 + $0x28] sm:$0xff] %v4922_v54 }
  0x6c   : > { %v4108_v51 = vld [vmem:[#allocation6 + $0x1e0] ss:$8 sps:$4 sm:$0xff]   ;;  %v4113_v52 = vld [vmem:[#allocation6 + $0x154] ss:$8 sps:$4 sm:$0xff]   ;;  %v4111_v56 = vld [vmem:[#allocation6 + $0x150] ss:$8 sps:$4 sm:$0xff]  }
  0x6d   : > { %v423_v38 = vld [vmem:[#allocation2 + $0x7] sm:$0xff]  ;;  %v424_v39 = vld [vmem:[#allocation2 + $0xf] sm:$0xff]  ;;  %349 = vst [vmem:[#allocation2 + $0x30] sm:$0xff] %v4925_v55  ;;  %s3629_s20 = sshll.u32 %s331_s11, 2  ;;  %s3905_s2 = sshll.u32 %s4676_s24, 2 }
  0x6e   : > { %538 = vmatpush1.bf16.msra.mxu0 %v4079_v20  ;;  %681 = vmatpush1.bf16.msra.mxu1 %v4080_v21  ;;  %v398_v40 = vld [vmem:[#allocation2 + $0x6] sm:$0xff]  ;;  %v399_v41 = vld [vmem:[#allocation2 + $0xe] sm:$0xff]  ;;  %v429_v43 = vpack.c.bf16 %v424_v39, %v423_v38  ;;  %s5039_s17 = scalar_lea.vmem %s5452_s1, %s3629_s20  ;;  %s3906_s6 = sshll.u32 %s4680_s25, 3 }
  0x6f   : > { %539 = vmatprep.subr.bf16.mxu0 %v4081_v22  ;;  %682 = vmatprep.subr.bf16.mxu1 %v4083_v23  ;;  %v404_v44 = vpack.c.bf16 %v399_v41, %v398_v40  ;;  %v4116_v53 = vld [vmem:[#allocation6 + $0x1d4] ss:$8 sps:$4 sm:$0xff]   ;;  %v4114_v60 = vld [vmem:[#allocation6 + $0x1d0] ss:$8 sps:$4 sm:$0xff]   ;;  %v4119_v1 = vld [vmem:[#allocation6 + $0x144] ss:$8 sps:$4 sm:$0xff]   ;;  %s3494_s28 = sadd.s32 %s3906_s6, %s3905_s2 }
  0x70   : > { %v425_v57 = vld [vmem:[#allocation2 + $0x17] sm:$0xff]  ;;  %v4122_v2 = vld [vmem:[#allocation6 + $0x1c4] ss:$8 sps:$4 sm:$0xff]   ;;  %v4117_v3 = vld [vmem:[#allocation6 + $0x140] ss:$8 sps:$4 sm:$0xff]   ;;  %s329_s16 = scalar_lea.vmem [#allocation9], %s3628_s13 }
  0x71   : > { %v400_v59 = vld [vmem:[#allocation2 + $0x16] sm:$0xff]  ;;  %v4120_v4 = vld [vmem:[#allocation6 + $0x1c0] ss:$8 sps:$4 sm:$0xff]   ;;  %v4131_v15 = vld [vmem:[#allocation6 + $0x124] ss:$8 sps:$4 sm:$0xff]   ;;  %s3907_s7 = sshll.u32 %s3494_s28, 7 }
  0x72   : > { %540 = vmatpush1.bf16.msra.mxu0 %v4085_v24  ;;  %683 = vmatpush1.bf16.msra.mxu1 %v4086_v25  ;;  %v426_v58 = vld [vmem:[#allocation2 + $0x1f] sm:$0xff]  ;;  %v427_v7 = vld [vmem:[#allocation2 + $0x27] sm:$0xff]  ;;  %v4123_v13 = vld [vmem:[#allocation6 + $0x130] ss:$8 sps:$4 sm:$0xff]   ;;  %s3497_s9 = sshll.u32 %s329_s16, 4  ;;  %s5528_s29 = sld [smem:[#allocation31_spill]]  ;;  %s5398_s9 = int_to_ptr.vmem [resolvable:$true] %s3497_s9 }
  0x73   : > { %541 = vmatprep.subr.bf16.mxu0 %v4087_v26  ;;  %684 = vmatprep.subr.bf16.mxu1 %v4089_v27  ;;  %v430_v61 = vpack.c.bf16 %v426_v58, %v425_v57  ;;  %v401_v62 = vld [vmem:[#allocation2 + $0x1e] sm:$0xff]  ;;  %v402_v9 = vld [vmem:[#allocation2 + $0x26] sm:$0xff]  ;;  %v4126_v14 = vld [vmem:[#allocation6 + $0x1b0] ss:$8 sps:$4 sm:$0xff]   ;;  %s3482_s24 = scalar_lea.sflag [#allocation5], %s4889_s21  ;;  %s4592_s25 = scalar_lea.vmem %s5398_s9, 512 }
  0x74   : > { %v405_v63 = vpack.c.bf16 %v401_v62, %v400_v59  ;;  %v4125_v5 = vld [vmem:[#allocation6 + $0x134] ss:$8 sps:$4 sm:$0xff]   ;;  %v4134_v16 = vld [vmem:[#allocation6 + $0x1a4] ss:$8 sps:$4 sm:$0xff]   ;;  %v4129_v17 = vld [vmem:[#allocation6 + $0x120] ss:$8 sps:$4 sm:$0xff]   ;;  %p4593_p4 = scmp.ne.s32.totalorder %s5398_s9, %s4592_s25 }
  0x75   : > { %v4128_v6 = vld [vmem:[#allocation6 + $0x1b4] ss:$8 sps:$4 sm:$0xff]   ;;  %v4132_v18 = vld [vmem:[#allocation6 + $0x1a0] ss:$8 sps:$4 sm:$0xff]   ;;  %v4135_v21 = vld [vmem:[#allocation6 + $0x110] ss:$8 sps:$4 sm:$0xff]  }
  0x76   : > { %542 = vmatpush1.bf16.msra.mxu0 %v4091_v30  ;;  %685 = vmatpush1.bf16.msra.mxu1 %v4092_v31  ;;  %v428_v8 = vld [vmem:[#allocation2 + $0x2f] sm:$0xff]  ;;  %v4141_v25 = vld [vmem:[#allocation6 + $0x100] ss:$8 sps:$4 sm:$0xff]   ;;  %p4594_p8 = pnand %p4593_p4, %p4855_p0  ;;  %s4703_s15 = smov [#allocation9]  }
  0x77   : > { %543 = vmatprep.subr.bf16.mxu0 %v4093_v32  ;;  %686 = vmatprep.subr.bf16.mxu1 %v4095_v33  ;;  %v403_v10 = vld [vmem:[#allocation2 + $0x2e] sm:$0xff]  ;;  %v431_v11 = vpack.c.bf16 %v428_v8, %v427_v7  ;;  %v4144_v26 = vld [vmem:[#allocation6 + $0x180] ss:$8 sps:$4 sm:$0xff]   ;;  %v741_v33 = vpack.c.bf16 %v4909_v29, %v4906_v28  ;;  %v742_v28 = vpack.c.bf16 %v4917_v47, %v4914_v46 }
  0x78   : > { %v406_v12 = vpack.c.bf16 %v403_v10, %v402_v9  ;;  %v4137_v19 = vld [vmem:[#allocation6 + $0x114] ss:$8 sps:$4 sm:$0xff]   ;;  %v4138_v22 = vld [vmem:[#allocation6 + $0x190] ss:$8 sps:$4 sm:$0xff]   ;;  %v4143_v23 = vld [vmem:[#allocation6 + $0x104] ss:$8 sps:$4 sm:$0xff]   ;;  %v743_v46 = vpack.c.bf16 %v4925_v55, %v4922_v54  ;;  %s5396_s12 = scalar_lea.hbm %s5528_s29, %s3907_s7  ;;  %p4595_p9 = pneg %p4594_p8 }
  0x79   : > { %v4140_v20 = vld [vmem:[#allocation6 + $0x194] ss:$8 sps:$4 sm:$0xff]   ;;  %v4146_v24 = vld [vmem:[#allocation6 + $0x184] ss:$8 sps:$4 sm:$0xff]   ;;  %v4147_v32 = vld [vmem:[#allocation6 + $0x270] ss:$8 sps:$4 sm:$0xff]  }
  0x7a   : > { %544 = vmatpush1.bf16.msra.mxu0 %v4097_v34  ;;  %687 = vmatpush1.bf16.msra.mxu1 %v4098_v35  ;;  %v916_v27 = vld [vmem:[#allocation2 + $0x9] sm:$0xff]  ;;  %v917_v30 = vld [vmem:[#allocation2 + $0x11] sm:$0xff]  ;;  %v919_v38 = vld [vmem:[#allocation2 + $0x21] sm:$0xff] }
  0x7b   : > { %841 = vmatprep.subr.bf16.mxu0 %v4101_v36  ;;  %1022 = vmatprep.subr.bf16.mxu1 %v4104_v37  ;;  %v4149_v31 = vld [vmem:[#allocation6 + $0x274] ss:$8 sps:$4 sm:$0xff]   ;;  %v922_v34 = vpack.c.bf16 %v917_v30, %v916_v27  ;;  %v4152_v35 = vld [vmem:[#allocation6 + $0x264] ss:$8 sps:$4 sm:$0xff]   ;;  %v4150_v36 = vld [vmem:[#allocation6 + $0x260] ss:$8 sps:$4 sm:$0xff]  }
  0x7c   : > { %v918_v37 = vld [vmem:[#allocation2 + $0x19] sm:$0xff]  ;;  %v4158_v41 = vld [vmem:[#allocation6 + $0x244] ss:$8 sps:$4 sm:$0xff]  }
  0x7d   : > { %562 = vmatmul.mubr.bf16.vlgmr.msra.gmra.mxu0 %v429_v43  ;;  %705 = vmatmul.mubr.bf16.vlgmr.msra.gmra.mxu1 %v404_v44  ;;  %v4155_v39 = vld [vmem:[#allocation6 + $0x254] ss:$8 sps:$4 sm:$0xff]   ;;  %v4153_v40 = vld [vmem:[#allocation6 + $0x250] ss:$8 sps:$4 sm:$0xff]   ;;  %v923_v29 = vpack.c.bf16 %v919_v38, %v918_v37  ;;  %v1100_v59 = vld [vmem:[#allocation2 + $0x22] sm:$0xff] }
  0x7e   : > { %842 = vmatpush1.bf16.msra.mxu0 %v4099_v42  ;;  %1023 = vmatpush1.bf16.msra.mxu1 %v4102_v45  ;;  %v4156_v42 = vld [vmem:[#allocation6 + $0x240] ss:$8 sps:$4 sm:$0xff]   ;;  %v921_v44 = vld [vmem:[#allocation2 + $0x31] sm:$0xff] }
  0x7f   : > { %843 = vmatprep.subr.bf16.mxu0 %v4107_v48  ;;  %1024 = vmatprep.subr.bf16.mxu1 %v4110_v49  ;;  %v920_v43 = vld [vmem:[#allocation2 + $0x29] sm:$0xff]  ;;  %v4161_v45 = vld [vmem:[#allocation6 + $0x234] ss:$8 sps:$4 sm:$0xff]  }
  0x80   : > { %571 = vmatprep.mubr.bf16.mxu0 %v5469_v0  ;;  %714 = vmatprep.mubr.bf16.mxu1 %v5469_v0  ;;  %v4159_v48 = vld [vmem:[#allocation6 + $0x230] ss:$8 sps:$4 sm:$0xff]   ;;  %v924_v47 = vpack.c.bf16 %v921_v44, %v920_v43  ;;  %v4164_v49 = vld [vmem:[#allocation6 + $0x224] ss:$8 sps:$4 sm:$0xff]   ;;  %v4177_v7 = vld [vmem:[#allocation6 + $0x360] ss:$8 sps:$4 sm:$0xff]  }
  0x81   : > { %v1097_v54 = vld [vmem:[#allocation2 + $0xa] sm:$0xff]  ;;  %v1098_v55 = vld [vmem:[#allocation2 + $0x12] sm:$0xff]  ;;  %v1099_v58 = vld [vmem:[#allocation2 + $0x1a] sm:$0xff] }
  0x82   : > { %844 = vmatpush1.bf16.msra.mxu0 %v4105_v50  ;;  %1025 = vmatpush1.bf16.msra.mxu1 %v4108_v51  ;;  %v4162_v50 = vld [vmem:[#allocation6 + $0x220] ss:$8 sps:$4 sm:$0xff]   ;;  %v4167_v51 = vld [vmem:[#allocation6 + $0x214] ss:$8 sps:$4 sm:$0xff]   ;;  %v1103_v57 = vpack.c.bf16 %v1098_v55, %v1097_v54  ;;  %v4207_v27 = vld [vmem:[#allocation6 + $0x310] ss:$8 sps:$4 sm:$0xff]  }
  0x83   : > { %845 = vmatprep.subr.bf16.mxu0 %v4113_v52  ;;  %1026 = vmatprep.subr.bf16.mxu1 %v4116_v53  ;;  %v4165_v52 = vld [vmem:[#allocation6 + $0x210] ss:$8 sps:$4 sm:$0xff]   ;;  %v4170_v53 = vld [vmem:[#allocation6 + $0x204] ss:$8 sps:$4 sm:$0xff]   ;;  %v4180_v8 = vld [vmem:[#allocation6 + $0x2e0] ss:$8 sps:$4 sm:$0xff]  }
  0x84   : > { %v1102_v62 = vld [vmem:[#allocation2 + $0x32] sm:$0xff] }
  0x85   : > { %572 = vmatmul.mubr.bf16.gmra.mxu0 %v430_v61  ;;  %715 = vmatmul.mubr.bf16.gmra.mxu1 %v405_v63  ;;  %v1101_v61 = vld [vmem:[#allocation2 + $0x2a] sm:$0xff]  ;;  %v4185_v9 = vld [vmem:[#allocation6 + $0x354] ss:$8 sps:$4 sm:$0xff]  }
  0x86   : > { %846 = vmatpush1.bf16.msra.mxu0 %v4111_v56  ;;  %1027 = vmatpush1.bf16.msra.mxu1 %v4114_v60  ;;  %v4168_v56 = vld [vmem:[#allocation6 + $0x200] ss:$8 sps:$4 sm:$0xff]   ;;  %v1104_v60 = vpack.c.bf16 %v1100_v59, %v1099_v58  ;;  %v1105_v63 = vpack.c.bf16 %v1102_v62, %v1101_v61  ;;  %v4188_v10 = vld [vmem:[#allocation6 + $0x2d4] ss:$8 sps:$4 sm:$0xff]   ;;  %v4210_v30 = vld [vmem:[#allocation6 + $0x290] ss:$8 sps:$4 sm:$0xff]  }
  0x87   : > { %847 = vmatprep.subr.bf16.mxu0 %v4119_v1  ;;  %1028 = vmatprep.subr.bf16.mxu1 %v4122_v2  ;;  %v4173_v1 = vld [vmem:[#allocation6 + $0x374] ss:$8 sps:$4 sm:$0xff]  }
  0x88   : > { %581 = vmatprep.mubr.bf16.mxu0 %v5469_v0  ;;  %724 = vmatprep.mubr.bf16.mxu1 %v5469_v0  ;;  %v4176_v2 = vld [vmem:[#allocation6 + $0x2f4] ss:$8 sps:$4 sm:$0xff]  }
  0x8a   : > { %848 = vmatpush1.bf16.msra.mxu0 %v4117_v3  ;;  %1029 = vmatpush1.bf16.msra.mxu1 %v4120_v4  ;;  %v4171_v3 = vld [vmem:[#allocation6 + $0x370] ss:$8 sps:$4 sm:$0xff]  }
  0x8b   : > { %849 = vmatprep.subr.bf16.mxu0 %v4125_v5  ;;  %1030 = vmatprep.subr.bf16.mxu1 %v4128_v6  ;;  %v4174_v4 = vld [vmem:[#allocation6 + $0x2f0] ss:$8 sps:$4 sm:$0xff]   ;;  %v4179_v5 = vld [vmem:[#allocation6 + $0x364] ss:$8 sps:$4 sm:$0xff]  }
  0x8c   : > { %v4182_v6 = vld [vmem:[#allocation6 + $0x2e4] ss:$8 sps:$4 sm:$0xff]  }
  0x8d   : > { %582 = vmatmul.mubr.bf16.gmra.mxu0 %v431_v11  ;;  %725 = vmatmul.mubr.bf16.gmra.mxu1 %v406_v12  ;;  %v4183_v11 = vld [vmem:[#allocation6 + $0x350] ss:$8 sps:$4 sm:$0xff]  }
  0x8e   : > { %850 = vmatpush1.bf16.msra.mxu0 %v4123_v13  ;;  %1031 = vmatpush1.bf16.msra.mxu1 %v4126_v14  ;;  %v4186_v12 = vld [vmem:[#allocation6 + $0x2d0] ss:$8 sps:$4 sm:$0xff]   ;;  %v4191_v13 = vld [vmem:[#allocation6 + $0x344] ss:$8 sps:$4 sm:$0xff]  }
  0x8f   : > { %851 = vmatprep.subr.bf16.mxu0 %v4131_v15  ;;  %1032 = vmatprep.subr.bf16.mxu1 %v4134_v16  ;;  %v4194_v14 = vld [vmem:[#allocation6 + $0x2c4] ss:$8 sps:$4 sm:$0xff]   ;;  %v4189_v15 = vld [vmem:[#allocation6 + $0x340] ss:$8 sps:$4 sm:$0xff]  }
  0x90   : > { %873 = vmatprep.mubr.bf16.mxu0 %v5469_v0  ;;  %1054 = vmatprep.mubr.bf16.mxu1 %v5469_v0  ;;  %v4192_v16 = vld [vmem:[#allocation6 + $0x2c0] ss:$8 sps:$4 sm:$0xff]  }
  0x92   : > { %852 = vmatpush1.bf16.msra.mxu0 %v4129_v17  ;;  %1033 = vmatpush1.bf16.msra.mxu1 %v4132_v18  ;;  %v4197_v17 = vld [vmem:[#allocation6 + $0x334] ss:$8 sps:$4 sm:$0xff]  }
  0x93   : > { %853 = vmatprep.subr.bf16.mxu0 %v4137_v19  ;;  %1034 = vmatprep.subr.bf16.mxu1 %v4140_v20  ;;  %v4200_v18 = vld [vmem:[#allocation6 + $0x2b4] ss:$8 sps:$4 sm:$0xff]   ;;  %v4195_v19 = vld [vmem:[#allocation6 + $0x330] ss:$8 sps:$4 sm:$0xff]  }
  0x94   : > { %v4198_v20 = vld [vmem:[#allocation6 + $0x2b0] ss:$8 sps:$4 sm:$0xff]  }
  0x96   : > { %854 = vmatpush1.bf16.msra.mxu0 %v4135_v21  ;;  %1035 = vmatpush1.bf16.msra.mxu1 %v4138_v22  ;;  %v4203_v21 = vld [vmem:[#allocation6 + $0x324] ss:$8 sps:$4 sm:$0xff]  }
  0x97   : > { %855 = vmatprep.subr.bf16.mxu0 %v4143_v23  ;;  %1036 = vmatprep.subr.bf16.mxu1 %v4146_v24  ;;  %v4206_v22 = vld [vmem:[#allocation6 + $0x2a4] ss:$8 sps:$4 sm:$0xff]   ;;  %v4201_v23 = vld [vmem:[#allocation6 + $0x320] ss:$8 sps:$4 sm:$0xff]  }
  0x98   : > { %v4204_v24 = vld [vmem:[#allocation6 + $0x2a0] ss:$8 sps:$4 sm:$0xff]  }
  0x9a   : > { %856 = vmatpush1.bf16.msra.mxu0 %v4141_v25  ;;  %1037 = vmatpush1.bf16.msra.mxu1 %v4144_v26  ;;  %v4209_v25 = vld [vmem:[#allocation6 + $0x314] ss:$8 sps:$4 sm:$0xff]  }
  0x9b   : > { %1203 = vmatprep.subr.bf16.mxu0 %v4149_v31  ;;  %1517 = vmatprep.subr.bf16.mxu1 %v4173_v1  ;;  %v4212_v26 = vld [vmem:[#allocation6 + $0x294] ss:$8 sps:$4 sm:$0xff]   ;;  %v4215_v31 = vld [vmem:[#allocation6 + $0x304] ss:$8 sps:$4 sm:$0xff]  }
  0x9d   : > { %874 = vmatmul.mubr.bf16.vlgmr.msra.gmra.mxu0 %v741_v33  ;;  %1055 = vmatmul.mubr.bf16.vlgmr.msra.gmra.mxu1 %v922_v34  ;;  %v4213_v33 = vld [vmem:[#allocation6 + $0x300] ss:$8 sps:$4 sm:$0xff]  }
  0x9e   : > { %1204 = vmatpush1.bf16.msra.mxu0 %v4147_v32  ;;  %883 = vmatprep.mubr.bf16.mxu0 %v5469_v0  ;;  %v4218_v32 = vld [vmem:[#allocation6 + $0x284] ss:$8 sps:$4 sm:$0xff]   ;;  %v4216_v34 = vld [vmem:[#allocation6 + $0x280] ss:$8 sps:$4 sm:$0xff]  }
  0x9f   : > { %1205 = vmatprep.subr.bf16.mxu0 %v4152_v35  ;;  %1064 = vmatprep.mubr.bf16.mxu1 %v5469_v0  ;;  %v4221_v35 = vld [vmem:[#allocation6 + $0x3f4] ss:$8 sps:$4 sm:$0xff]  }
  0xa0   : > { %1518 = vmatpush1.bf16.msra.mxu1 %v4171_v3 }
  0xa1   : > { %1519 = vmatprep.subr.bf16.mxu1 %v4179_v5 }
  0xa2   : > { %1206 = vmatpush1.bf16.msra.mxu0 %v4150_v36  ;;  %v4224_v36 = vld [vmem:[#allocation6 + $0x474] ss:$8 sps:$4 sm:$0xff]  }
  0xa3   : > { %1207 = vmatprep.subr.bf16.mxu0 %v4155_v39 }
  0xa4   : > { %1520 = vmatpush1.bf16.msra.mxu1 %v4177_v7 }
  0xa5   : > { %884 = vmatmul.mubr.bf16.gmra.mxu0 %v742_v28  ;;  %1065 = vmatmul.mubr.bf16.gmra.mxu1 %v923_v29 }
  0xa6   : > { %1208 = vmatpush1.bf16.msra.mxu0 %v4153_v40  ;;  %893 = vmatprep.mubr.bf16.mxu0 %v5469_v0 }
  0xa7   : > { %1209 = vmatprep.subr.bf16.mxu0 %v4158_v41  ;;  %1074 = vmatprep.mubr.bf16.mxu1 %v5469_v0 }
  0xa8   : > { %1521 = vmatprep.subr.bf16.mxu1 %v4185_v9  ;;  %v352_v9 = vlaneseq }
  0xa9   : > { %1522 = vmatpush1.bf16.msra.mxu1 %v4183_v11 }
  0xaa   : > { %1210 = vmatpush1.bf16.msra.mxu0 %v4156_v42  ;;  %1523 = vmatprep.subr.bf16.mxu1 %v4191_v13 }
  0xab   : > { %1211 = vmatprep.subr.bf16.mxu0 %v4161_v45 }
  0xad   : > { %894 = vmatmul.mubr.bf16.gmra.mxu0 %v743_v46  ;;  %1075 = vmatmul.mubr.bf16.gmra.mxu1 %v924_v47 }
  0xae   : > { %1212 = vmatpush1.bf16.msra.mxu0 %v4159_v48  ;;  %1235 = vmatprep.mubr.bf16.mxu0 %v5469_v0 }
  0xaf   : > { %1213 = vmatprep.subr.bf16.mxu0 %v4164_v49  ;;  %1549 = vmatprep.mubr.bf16.mxu1 %v5469_v0 }
  0xb0   : > { %1524 = vmatpush1.bf16.msra.mxu1 %v4189_v15 }
  0xb1   : > { %1525 = vmatprep.subr.bf16.mxu1 %v4197_v17  ;;  %v5000_v17 = vld [vmem:[%s5454_s3] sm:$0x77] }
  0xb2   : > { %1214 = vmatpush1.bf16.msra.mxu0 %v4162_v50 }
  0xb3   : > { %1215 = vmatprep.subr.bf16.mxu0 %v4167_v51 }
  0xb4   : > { %1526 = vmatpush1.bf16.msra.mxu1 %v4195_v19 }
  0xb5   : > { %1527 = vmatprep.subr.bf16.mxu1 %v4203_v21 }
  0xb6   : > { %1216 = vmatpush1.bf16.msra.mxu0 %v4165_v52 }
  0xb7   : > { %1217 = vmatprep.subr.bf16.mxu0 %v4170_v53 }
  0xb8   : > { %1528 = vmatpush1.bf16.msra.mxu1 %v4201_v23 }
  0xb9   : > { %1529 = vmatprep.subr.bf16.mxu1 %v4209_v25 }
  0xba   : > { %1218 = vmatpush1.bf16.msra.mxu0 %v4168_v56 }
  0xbb   : > { %1660 = vmatprep.subr.bf16.mxu0 %v4176_v2 }
  0xbc   : > { %1530 = vmatpush1.bf16.msra.mxu1 %v4207_v27 }
  0xbd   : > { %1236 = vmatmul.mubr.bf16.vlgmr.msra.gmra.mxu0 %v1103_v57  ;;  %1531 = vmatprep.subr.bf16.mxu1 %v4215_v31 }
  0xbe   : > { %1245 = vmatprep.mubr.bf16.mxu0 %v5469_v0  ;;  %1661 = vmatpush1.bf16.msra.mxu0 %v4174_v4 }
  0xbf   : > { %1662 = vmatprep.subr.bf16.mxu0 %v4182_v6 }
  0xc0   : > { %1532 = vmatpush1.bf16.msra.mxu1 %v4213_v33 }
  0xc1   : > { %1829 = vmatprep.subr.bf16.mxu1 %v4221_v35 }
  0xc2   : > { %1663 = vmatpush1.bf16.msra.mxu0 %v4180_v8 }
  0xc3   : > { %1664 = vmatprep.subr.bf16.mxu0 %v4188_v10 }
  0xc5   : > { %1246 = vmatmul.mubr.bf16.gmra.mxu0 %v1104_v60 }
  0xc6   : > { %1255 = vmatprep.mubr.bf16.mxu0 %v5469_v0  ;;  %1665 = vmatpush1.bf16.msra.mxu0 %v4186_v12  ;;  %v4992_v12 = vshrl.u32 %v352_v9, 7 }
  0xc7   : > { %1666 = vmatprep.subr.bf16.mxu0 %v4194_v14 }
  0xc8   : > { %5504 = vst [vmem:[#allocation19_spill] sm:$0xff] %v4992_v12  ;;  %v1285_v13 = vsub.s32 4, %v4992_v12  ;;  %v5006_v23 = vsub.s32 0, %v4992_v12 }
  0xca   : > { %1667 = vmatpush1.bf16.msra.mxu0 %v4192_v16  ;;  %v1286_v19 = vrot.slane %v5000_v17, %v1285_v13 }
  0xcb   : > { %1668 = vmatprep.subr.bf16.mxu0 %v4200_v18 }
  0xcc   : > { %v1296_v27 = vrot.slane %v1286_v19, %v5006_v23 }
  0xcd   : > { %1256 = vmatmul.mubr.bf16.gmra.mxu0 %v1105_v63 }
  0xce   : > { %1692 = vmatprep.mubr.bf16.mxu0 %v5469_v0  ;;  %1669 = vmatpush1.bf16.msra.mxu0 %v4198_v20 }
  0xcf   : > { %1670 = vmatprep.subr.bf16.mxu0 %v4206_v22 }
  0xd2   : > { %1671 = vmatpush1.bf16.msra.mxu0 %v4204_v24 }
  0xd3   : > { %1672 = vmatprep.subr.bf16.mxu0 %v4212_v26 }
  0xd6   : > { %1673 = vmatpush1.bf16.msra.mxu0 %v4210_v30 }
  0xd7   : > { %1674 = vmatprep.subr.bf16.mxu0 %v4218_v32 }
  0xda   : > { %1675 = vmatpush1.bf16.msra.mxu0 %v4216_v34 }
  0xdb   : > { %2010 = vmatprep.subr.bf16.mxu0 %v4224_v36 }
 0x13d   : > { %v4950_v37 = vpop.f32.mrf.mxu0  ;;  %v4952_v38 = vpop.f32.mrf.mxu1 }
 0x13f   : > { %v565_v39 = vpop.f32.mrf.mxu0  ;;  %v708_v40 = vpop.f32.mrf.mxu1 }
 0x140   : > { %v709_v16 = vadd.f32 %v708_v40, %v565_v39 }
 0x141   : > { %v4954_v28 = vpop.f32.mrf.mxu0  ;;  %v4956_v29 = vpop.f32.mrf.mxu1 }
 0x143   : > { %v569_v41 = vpop.f32.mrf.mxu0  ;;  %v712_v42 = vpop.f32.mrf.mxu1 }
 0x144   : > { %v713_v22 = vadd.f32 %v712_v42, %v569_v41 }
 0x145   : > { %v4958_v43 = vpop.f32.mrf.mxu0  ;;  %v4960_v44 = vpop.f32.mrf.mxu1 }
 0x147   : > { %v575_v45 = vpop.f32.mrf.mxu0  ;;  %v718_v48 = vpop.f32.mrf.mxu1 }
 0x148   : > { %v719_v32 = vadd.f32 %v718_v48, %v575_v45 }
 0x149   : > { %v4962_v46 = vpop.f32.mrf.mxu0  ;;  %v4964_v49 = vpop.f32.mrf.mxu1 }
 0x14b   : > { %v579_v47 = vpop.f32.mrf.mxu0  ;;  %v722_v51 = vpop.f32.mrf.mxu1 }
 0x14c   : > { %v723_v42 = vadd.f32 %v722_v51, %v579_v47 }
 0x14d   : > { %v4966_v50 = vpop.f32.mrf.mxu0  ;;  %v4968_v53 = vpop.f32.mrf.mxu1 }
 0x14f   : > { %v585_v52 = vpop.f32.mrf.mxu0  ;;  %v728_v54 = vpop.f32.mrf.mxu1 }
 0x151   : > { %v4970_v56 = vpop.f32.mrf.mxu0  ;;  %v4974_v57 = vpop.f32.mrf.mxu1 }
 0x153   : > { %v4972_v55 = vpop.f32.mrf.mxu0  ;;  %v732_v60 = vpop.f32.mrf.mxu1 }
 0x15d   : > { %v4976_v58 = vpop.f32.mrf.mxu0  ;;  %v4980_v62 = vpop.f32.mrf.mxu1 }
 0x15f   : > { %v877_v59 = vpop.f32.mrf.mxu0  ;;  %v1058_v2 = vpop.f32.mrf.mxu1 }
 0x160   : > { %v905_v18 = vadd.f32 %v877_v59, %v709_v16 }
 0x161   : > { %v4978_v61 = vpop.f32.mrf.mxu0  ;;  %v4986_v5 = vpop.f32.mrf.mxu1 }
 0x162   : > { %v1086_v25 = vadd.f32 %v1058_v2, %v905_v18  ;;  %v729_v18 = vadd.f32 %v728_v54, %v585_v52 }
 0x163   : > { %v881_v63 = vpop.f32.mrf.mxu0  ;;  %v1062_v7 = vpop.f32.mrf.mxu1 }
 0x164   : > { %v907_v26 = vadd.f32 %v881_v63, %v713_v22 }
 0x165   : > { %v4982_v1 = vpop.f32.mrf.mxu0  ;;  %v4990_v10 = vpop.f32.mrf.mxu1 }
 0x166   : > { %v1088_v35 = vadd.f32 %v1062_v7, %v907_v26 }
 0x167   : > { %v887_v3 = vpop.f32.mrf.mxu0  ;;  %v1068_v14 = vpop.f32.mrf.mxu1 }
 0x168   : > { %v909_v36 = vadd.f32 %v887_v3, %v719_v32 }
 0x169   : > { %v4984_v4 = vpop.f32.mrf.mxu0  ;;  %v5003_v20 = vpop.f32.mrf.mxu1 }
 0x16a   : > { %v1090_v63 = vadd.f32 %v1068_v14, %v909_v36 }
 0x16b   : > { %v891_v6 = vpop.f32.mrf.mxu0  ;;  %v1072_v30 = vpop.f32.mrf.mxu1 }
 0x16c   : > { %v911_v2 = vadd.f32 %v891_v6, %v723_v42  ;;  %v733_v6 = vadd.f32 %v732_v60, %v4972_v55  ;;  %v707_v55 = vadd.f32 %v4952_v38, %v4950_v37 }
 0x16d   : > { %v4988_v8 = vpop.f32.mrf.mxu0  ;;  %v5013_v40 = vpop.f32.mrf.mxu1 }
 0x16e   : > { %v1092_v22 = vadd.f32 %v1072_v30, %v911_v2 }
 0x16f   : > { %v897_v11 = vpop.f32.mrf.mxu0  ;;  %v1078_v45 = vpop.f32.mrf.mxu1 }
 0x171   : > { %v4995_v15 = vpop.f32.mrf.mxu0  ;;  %v5019_v51 = vpop.f32.mrf.mxu1 }
 0x173   : > { %v901_v21 = vpop.f32.mrf.mxu0  ;;  %v1082_v30 = vpop.f32.mrf.mxu1 }
 0x174   : > { %v915_v54 = vadd.f32 %v901_v21, %v733_v6  ;;  %v904_v21 = vadd.f32 %v4976_v58, %v707_v55 }
 0x176   : > { %v1096_v60 = vadd.f32 %v1082_v30, %v915_v54  ;;  %v1085_v58 = vadd.f32 %v4980_v62, %v904_v21  ;;  %v727_v30 = vadd.f32 %v4968_v53, %v4966_v50  ;;  %v5085_v21 = vld [vmem:[#allocation2] sm:$0xff] }
 0x178   : > { %v912_v55 = vadd.f32 %v4988_v8, %v727_v30  ;;  %v4254_v30 = vld [vmem:[#allocation6 + $0x424] ss:$8 sps:$4 sm:$0xff]  }
 0x17d   : > { %v5008_v24 = vpop.f32.mrf.mxu0 }
 0x17f   : > { %v1239_v31 = vpop.f32.mrf.mxu0 }
 0x180   : > { %v1267_v33 = vadd.f32 %v1239_v31, %v1086_v25  ;;  %v913_v25 = vadd.f32 %v897_v11, %v729_v18 }
 0x181   : > { %v5011_v34 = vpop.f32.mrf.mxu0 }
 0x182   : > { %v1298_v39 = vadd.f32 %v1296_v27, %v1267_v33  ;;  %v1094_v52 = vadd.f32 %v1078_v45, %v913_v25  ;;  %v711_v45 = vadd.f32 %v4956_v29, %v4954_v28  ;;  %v717_v28 = vadd.f32 %v4960_v44, %v4958_v43  ;;  %v5049_v29 = vld [vmem:[%s5039_s17] sm:$0x7] }
 0x183   : > { %v1243_v41 = vpop.f32.mrf.mxu0  ;;  %v354_v44 = vadd.s32 8, %v4992_v12 }
 0x184   : > { %v3718_v59 = vmul.f32 -1.442695, %v1298_v39  ;;  %v1269_v9 = vadd.f32 %v1243_v41, %v1088_v35 }
 0x185   : > { %v5015_v13 = vpop.f32.mrf.mxu0 }
 0x186   : > { %4419 = vpow2.f32 %v3718_v59  ;;  %v1300_v16 = vadd.f32 %v1296_v27, %v1269_v9 }
 0x187   : > { %v1249_v48 = vpop.f32.mrf.mxu0 }
 0x188   : > { %v3719_v19 = vmul.f32 -1.442695, %v1300_v16  ;;  %v1271_v7 = vadd.f32 %v1249_v48, %v1090_v63  ;;  %v1282_v16 = vrot.slane %v5000_v17, %v5006_v23  ;;  %v906_v48 = vadd.f32 %v4978_v61, %v711_v45 }
 0x189   : > { %v5017_v3 = vpop.f32.mrf.mxu0  ;;  %v908_v61 = vadd.f32 %v4982_v1, %v717_v28  ;;  %v355_v1 = vadd.s32 16, %v4992_v12 }
 0x18a   : > { %4421 = vpow2.f32 %v3719_v19  ;;  %v1302_v47 = vadd.f32 %v1296_v27, %v1271_v7  ;;  %v5044_v7 = vrot.slane %v1282_v16, %v5006_v23  ;;  %v1087_v62 = vadd.f32 %v4986_v5, %v906_v48 }
 0x18b   : > { %v1253_v26 = vpop.f32.mrf.mxu0  ;;  %v1093_v16 = vadd.f32 %v5013_v40, %v912_v55 }
 0x18c   : > { %v3720_v14 = vmul.f32 -1.442695, %v1302_v47  ;;  %v1273_v31 = vadd.f32 %v1253_v26, %v1092_v22  ;;  %v5052_v22 = vstv %s3631_s8  ;;  %v5058_v26 = vrot.slane %v5049_v29, %v5006_v23 }
 0x18d   : > { %v5023_v32 = vpop.f32.mrf.mxu0  ;;  %v360_v43 = vadd.s32 %v5052_v22, %v4992_v12  ;;  %v361_v54 = vadd.s32 %v5052_v22, %v354_v44  ;;  %v358_v44 = vadd.s32 40, %v4992_v12 }
 0x18e   : > { %4423 = vpow2.f32 %v3720_v14  ;;  %v1304_v33 = vadd.f32 %v1296_v27, %v1273_v31  ;;  %v1268_v14 = vadd.f32 %v5011_v34, %v1087_v62  ;;  %v1089_v31 = vadd.f32 %v4990_v10, %v908_v61 }
 0x18f   : > { %v1259_v11 = vpop.f32.mrf.mxu0  ;;  %vm366_vm0 = vcmp.ge.s32.totalorder %v360_v43, 0  ;;  %vm372_vm1 = vcmp.lt.s32.totalorder %v360_v43, 56  ;;  %v362_v10 = vadd.s32 %v5052_v22, %v355_v1  ;;  %vm367_vm3 = vcmp.ge.s32.totalorder %v361_v54, 0 }
 0x190   : > { %v3721_v35 = vmul.f32 -1.442695, %v1304_v33  ;;  %v1275_v36 = vadd.f32 %v1259_v11, %v1094_v52  ;;  %vm378_vm2 = vmand %vm366_vm0, %vm372_vm1  ;;  %vm373_vm4 = vcmp.lt.s32.totalorder %v361_v54, 56  ;;  %v1274_v40 = vadd.f32 %v5023_v32, %v1093_v16 }
 0x191   : > { %v5026_v39 = vpop.f32.mrf.mxu0  ;;  %vm368_vm5 = vcmp.ge.s32.totalorder %v362_v10, 0  ;;  %vm379_vm6 = vmand %vm367_vm3, %vm373_vm4  ;;  %vm374_vm7 = vcmp.lt.s32.totalorder %v362_v10, 56  ;;  %v365_v54 = vadd.s32 %v5052_v22, %v358_v44  ;;  %v4237_v44 = vld [vmem:[#allocation6 + $0x3c0] ss:$8 sps:$4 sm:$0xff]  }
 0x192   : > { %4425 = vpow2.f32 %v3721_v35  ;;  %v1306_v41 = vadd.f32 %v1296_v27, %v1275_v36  ;;  %v356_v36 = vadd.s32 24, %v4992_v12  ;;  %v5102_v28 = vsel %vm379_vm6, 1.0, %v5085_v21  ;;  %vm380_vm8 = vmand %vm368_vm5, %vm374_vm7 }
 0x193   : > { %v4420_v42 = vpop.eup %4419  ;;  %v1263_v59 = vpop.f32.mrf.mxu0  ;;  %5505 = vst [vmem:[#allocation20_spill] sm:$0xff] %v5102_v28  ;;  %vm371_vm15 = vcmp.ge.s32.totalorder %v365_v54, 0  ;;  %vm377_vm0 = vcmp.lt.s32.totalorder %v365_v54, 56 }
 0x194   : > { %v1337_v9 = vadd.f32 1.0, %v4420_v42  ;;  %v3722_v63 = vmul.f32 -1.442695, %v1306_v41  ;;  %v1277_v2 = vadd.f32 %v1263_v59, %v1096_v60  ;;  %vm383_vm1 = vmand %vm371_vm15, %vm377_vm0 }
 0x196   : > { %4427 = vrcp.f32 %v1337_v9  ;;  %v1308_v37 = vadd.f32 %v1296_v27, %v1277_v2  ;;  %v1266_v27 = vadd.f32 %v5008_v24, %v1085_v58  ;;  %v721_v24 = vadd.f32 %v4964_v49, %v4962_v46 }
 0x197   : > { %v4422_v38 = vpop.eup %4421  ;;  %4429 = vpow2.f32 %v3722_v63  ;;  %v1299_v46 = vadd.f32 %v5044_v7, %v1268_v14  ;;  %v1270_v49 = vadd.f32 %v5015_v13, %v1089_v31  ;;  %v4503_v13 = vld [vmem:[#allocation2 + $0x8] sm:$0xff]  ;;  %v5088_v9 = vsel %vm378_vm2, 1.0, %v5085_v21 }
 0x198   : > { %v1338_v18 = vadd.f32 1.0, %v4422_v38  ;;  %v3723_v19 = vmul.f32 -1.442695, %v1308_v37  ;;  %v1297_v6 = vadd.f32 %v5044_v7, %v1266_v27  ;;  %v910_v23 = vadd.f32 %v4984_v4, %v721_v24  ;;  %v4505_v38 = vld [vmem:[#allocation2 + $0x10] sm:$0xff] }
 0x199   : > { %v1314_v42 = vadd.f32 %v5058_v26, %v1299_v46  ;;  %v1301_v50 = vadd.f32 %v5044_v7, %v1270_v49  ;;  %v1305_v14 = vadd.f32 %v5044_v7, %v1274_v40  ;;  %vm3348_vm2 = vcmask 1044480  }
 0x19a   : > { %4431 = vrcp.f32 %v1338_v18  ;;  %v1313_v33 = vadd.f32 %v5058_v26, %v1297_v6  ;;  %v1091_v4 = vadd.f32 %v5003_v20, %v910_v23  ;;  %v731_v20 = vadd.f32 %v4974_v57, %v4970_v56  ;;  %v4507_v23 = vld [vmem:[#allocation2 + $0x20] sm:$0xff] }
 0x19b   : > { %v4424_v25 = vpop.eup %4423  ;;  %4433 = vpow2.f32 %v3723_v19  ;;  %v357_v57 = vadd.s32 32, %v4992_v12  ;;  %v1315_v48 = vadd.f32 %v5058_v26, %v1301_v50  ;;  %v5116_v6 = vsel %vm380_vm8, 1.0, %v5085_v21 }
 0x19c   : > { %v1339_v47 = vadd.f32 1.0, %v4424_v25  ;;  %v1272_v53 = vadd.f32 %v5017_v3, %v1091_v4  ;;  %v363_v3 = vadd.s32 %v5052_v22, %v356_v36  ;;  %v914_v56 = vadd.f32 %v4995_v15, %v731_v20  ;;  %5506 = vst [vmem:[#allocation21_spill] sm:$0xff] %v5116_v6  ;;  %v4508_v36 = vld [vmem:[#allocation2 + $0x28] sm:$0xff] }
 0x19d   : > { %v364_v62 = vadd.s32 %v5052_v22, %v357_v57  ;;  %v1317_v46 = vadd.f32 %v5058_v26, %v1305_v14  ;;  %v4222_v22 = vld [vmem:[#allocation6 + $0x470] ss:$8 sps:$4 sm:$0xff]   ;;  %v4227_v20 = vld [vmem:[#allocation6 + $0x3e4] ss:$8 sps:$4 sm:$0xff]   ;;  %v4228_v57 = vld [vmem:[#allocation6 + $0x460] ss:$8 sps:$4 sm:$0xff]  }
 0x19e   : > { %4435 = vrcp.f32 %v1339_v47  ;;  %v1303_v18 = vadd.f32 %v5044_v7, %v1272_v53  ;;  %v1095_v25 = vadd.f32 %v5019_v51, %v914_v56  ;;  %vm369_vm9 = vcmp.ge.s32.totalorder %v363_v3, 0  ;;  %v4506_v47 = vld [vmem:[#allocation2 + $0x18] sm:$0xff]  ;;  %v4225_v56 = vld [vmem:[#allocation6 + $0x3e0] ss:$8 sps:$4 sm:$0xff]  }
 0x19f   : > { %v4426_v5 = vpop.eup %4425  ;;  %vm375_vm10 = vcmp.lt.s32.totalorder %v363_v3, 56  ;;  %vm370_vm12 = vcmp.ge.s32.totalorder %v364_v62, 0  ;;  %vm376_vm13 = vcmp.lt.s32.totalorder %v364_v62, 56  ;;  %v4509_v3 = vld [vmem:[#allocation2 + $0x30] sm:$0xff] }
 0x1a0   : > { %v1340_v52 = vadd.f32 1.0, %v4426_v5  ;;  %v1316_v32 = vadd.f32 %v5058_v26, %v1303_v18  ;;  %v1276_v51 = vadd.f32 %v5026_v39, %v1095_v25  ;;  %vm381_vm11 = vmand %vm369_vm9, %vm375_vm10  ;;  %v4231_v18 = vld [vmem:[#allocation6 + $0x3d0] ss:$8 sps:$4 sm:$0xff]   ;;  %v4245_v14 = vld [vmem:[#allocation6 + $0x3b4] ss:$8 sps:$4 sm:$0xff]  }
 0x1a1   : > { %vm5131_vm14 = vmand %vm370_vm12, %vm376_vm13 }
 0x1a2   : > { %4437 = vrcp.f32 %v1340_v52  ;;  %v1307_v39 = vadd.f32 %v5044_v7, %v1276_v51  ;;  %v5143_v50 = vsel %vm5131_vm14, 1.0, %v5085_v21  ;;  %v4248_v51 = vld [vmem:[#allocation6 + $0x434] ss:$8 sps:$4 sm:$0xff]  }
 0x1a3   : > { %v4428_v34 = vpop.eup %4427  ;;  %5512 = vst [vmem:[#allocation25_spill] sm:$0xff] %v5143_v50 }
 0x1a4   : > { %v4430_v11 = vpop.eup %4429  ;;  %v1355_v35 = vmul.f32 %v4428_v34, %v1313_v33  ;;  %v5126_v33 = vsel %vm381_vm11, 1.0, %v5085_v21  ;;  %v1318_v7 = vadd.f32 %v5058_v26, %v1307_v39 }
 0x1a5   : > { %v1341_v60 = vadd.f32 1.0, %v4430_v11  ;;  %5508 = vst [vmem:[#allocation23_spill] sm:$0xff] %v5126_v33  ;;  %v4219_v11 = vld [vmem:[#allocation6 + $0x3f0] ss:$8 sps:$4 sm:$0xff]  }
 0x1a6   : > { %v1361_v41 = vadd.f32 %v4503_v13, %v1355_v35 }
 0x1a7   : > { %v4432_v59 = vpop.eup %4431  ;;  %4439 = vrcp.f32 %v1341_v60 }
 0x1a8   : > { %v4434_v8 = vpop.eup %4433  ;;  %v1367_v63 = vmul.f32 0.70710677, %v1361_v41  ;;  %v1356_v2 = vmul.f32 %v4432_v59, %v1314_v42 }
 0x1a9   : > { %v1342_v45 = vadd.f32 1.0, %v4434_v8  ;;  %v4230_v8 = vld [vmem:[#allocation6 + $0x464] ss:$8 sps:$4 sm:$0xff]  }
 0x1aa   : > { %v5097_v37 = vmul.f32 %v5088_v9, %v1367_v63  ;;  %v1362_v58 = vadd.f32 %v4505_v38, %v1356_v2  ;;  %v4233_v38 = vld [vmem:[#allocation6 + $0x3d4] ss:$8 sps:$4 sm:$0xff]  }
 0x1ab   : > { %v4436_v19 = vpop.eup %4435  ;;  %4441 = vrcp.f32 %v1342_v45  ;;  %v5151_v45 = vsel %vm383_vm1, 1.0, %v5085_v21 }
 0x1ac   : > { %1379 = vst [vmem:[#allocation2 + $0x8] sm:$0xff] %v5097_v37  ;;  %v1368_v15 = vmul.f32 0.70710677, %v1362_v58  ;;  %v1357_v27 = vmul.f32 %v4436_v19, %v1315_v48  ;;  %5514 = vst [vmem:[#allocation27_spill] sm:$0xff] %v5151_v45  ;;  %v4236_v58 = vld [vmem:[#allocation6 + $0x454] ss:$8 sps:$4 sm:$0xff]  }
 0x1ad   : > { %v4234_v19 = vld [vmem:[#allocation6 + $0x450] ss:$8 sps:$4 sm:$0xff]  }
 0x1ae   : > { %v5111_v61 = vmul.f32 %v5102_v28, %v1368_v15  ;;  %v1363_v43 = vadd.f32 %v4506_v47, %v1357_v27 }
 0x1af   : > { %v4438_v24 = vpop.eup %4437 }
 0x1b0   : > { %1380 = vst [vmem:[#allocation2 + $0x10] sm:$0xff] %v5111_v61  ;;  %v1369_v5 = vmul.f32 0.70710677, %v1363_v43  ;;  %v1358_v1 = vmul.f32 %v4438_v24, %v1316_v32  ;;  %v4239_v43 = vld [vmem:[#allocation6 + $0x3c4] ss:$8 sps:$4 sm:$0xff]  }
 0x1b1   : > { %v4242_v32 = vld [vmem:[#allocation6 + $0x444] ss:$8 sps:$4 sm:$0xff]   ;;  %v4240_v24 = vld [vmem:[#allocation6 + $0x440] ss:$8 sps:$4 sm:$0xff]  }
 0x1b2   : > { %v5122_v31 = vmul.f32 %v5116_v6, %v1369_v5  ;;  %v1364_v52 = vadd.f32 %v4507_v23, %v1358_v1  ;;  %v4243_v5 = vld [vmem:[#allocation6 + $0x3b0] ss:$8 sps:$4 sm:$0xff]  }
 0x1b3   : > { %v1411_v35 = vld [vmem:[#allocation2 + $0x7] sm:$0xff]  ;;  %v4246_v1 = vld [vmem:[#allocation6 + $0x430] ss:$8 sps:$4 sm:$0xff]  }
 0x1b4   : > { %5507 = vst [vmem:[#allocation22_spill] sm:$0xff] %v5122_v31  ;;  %v4440_v49 = vpop.eup %4439  ;;  %1381 = vst [vmem:[#allocation2 + $0x18] sm:$0xff] %v5122_v31  ;;  %v1370_v34 = vmul.f32 0.70710677, %v1364_v52  ;;  %v1385_v13 = vld [vmem:[#allocation2 + $0x6] sm:$0xff] }
 0x1b5   : > { %v1359_v10 = vmul.f32 %v4440_v49, %v1317_v46 }
 0x1b6   : > { %v5136_v4 = vmul.f32 %v5126_v33, %v1370_v34  ;;  %v4251_v34 = vld [vmem:[#allocation6 + $0x3a4] ss:$8 sps:$4 sm:$0xff]  }
 0x1b7   : > { %v1365_v55 = vadd.f32 %v4508_v36, %v1359_v10  ;;  %v1412_v60 = vld [vmem:[#allocation2 + $0xf] sm:$0xff]  ;;  %v4249_v10 = vld [vmem:[#allocation6 + $0x3a0] ss:$8 sps:$4 sm:$0xff]  }
 0x1b8   : > { %5511 = vst [vmem:[#allocation24_spill] sm:$0xff] %v5136_v4  ;;  %v1386_v41 = vld [vmem:[#allocation2 + $0xe] sm:$0xff]  ;;  %v4442_v42 = vpop.eup %4441  ;;  %1382 = vst [vmem:[#allocation2 + $0x20] sm:$0xff] %v5136_v4  ;;  %v1417_v53 = vpack.c.bf16 %v1412_v60, %v1411_v35 }
 0x1b9   : > { %v1391_v59 = vpack.c.bf16 %v1386_v41, %v1385_v13  ;;  %v1371_v63 = vmul.f32 0.70710677, %v1365_v55  ;;  %v1360_v26 = vmul.f32 %v4442_v42, %v1318_v7  ;;  %v4260_v35 = vld [vmem:[#allocation6 + $0x414] ss:$8 sps:$4 sm:$0xff]   ;;  %v4255_v36 = vld [vmem:[#allocation6 + $0x390] ss:$8 sps:$4 sm:$0xff]  }
 0x1ba   : > { %1550 = vmatmul.mubr.bf16.vlgmr.msra.gmra.mxu1 %v1417_v53  ;;  %v4258_v55 = vld [vmem:[#allocation6 + $0x410] ss:$8 sps:$4 sm:$0xff]   ;;  %v4263_v7 = vld [vmem:[#allocation6 + $0x384] ss:$8 sps:$4 sm:$0xff]   ;;  %v4261_v13 = vld [vmem:[#allocation6 + $0x380] ss:$8 sps:$4 sm:$0xff]  }
 0x1bb   : > { %1693 = vmatmul.mubr.bf16.vlgmr.msra.gmra.mxu0 %v1391_v59  ;;  %v5148_v2 = vmul.f32 %v5143_v50, %v1371_v63  ;;  %v1366_v16 = vadd.f32 %v4509_v3, %v1360_v26  ;;  %1830 = vmatpush1.bf16.msra.mxu1 %v4219_v11  ;;  %v1413_v40 = vld [vmem:[#allocation2 + $0x17] sm:$0xff]  ;;  %v4252_v11 = vld [vmem:[#allocation6 + $0x420] ss:$8 sps:$4 sm:$0xff]   ;;  %v4266_v60 = vld [vmem:[#allocation6 + $0x404] ss:$8 sps:$4 sm:$0xff]  }
 0x1bc   : > { %2011 = vmatpush1.bf16.msra.mxu0 %v4222_v22  ;;  %1831 = vmatprep.subr.bf16.mxu1 %v4227_v20  ;;  %v1387_v27 = vld [vmem:[#allocation2 + $0x16] sm:$0xff]  ;;  %v4264_v41 = vld [vmem:[#allocation6 + $0x400] ss:$8 sps:$4 sm:$0xff]   ;;  %v4272_v26 = vld [vmem:[#allocation6 + $0x4e4] ss:$8 sps:$4 sm:$0xff]  }
 0x1bd   : > { %5513 = vst [vmem:[#allocation26_spill] sm:$0xff] %v5148_v2  ;;  %2012 = vmatprep.subr.bf16.mxu0 %v4230_v8  ;;  %1383 = vst [vmem:[#allocation2 + $0x28] sm:$0xff] %v5148_v2  ;;  %v1372_v48 = vmul.f32 0.70710677, %v1366_v16  ;;  %1559 = vmatprep.mubr.bf16.mxu1 %v5469_v0  ;;  %v4257_v22 = vld [vmem:[#allocation6 + $0x394] ss:$8 sps:$4 sm:$0xff]   ;;  %v1729_v8 = vpack.c.bf16 %v5111_v61, %v5097_v37 }
 0x1be   : > { %1702 = vmatprep.mubr.bf16.mxu0 %v5469_v0  ;;  %v4269_v42 = vld [vmem:[#allocation6 + $0x4f4] ss:$8 sps:$4 sm:$0xff]   ;;  %v1904_v59 = vld [vmem:[#allocation2 + $0x9] sm:$0xff] }
 0x1bf   : > { %v5157_v15 = vmul.f32 %v5151_v45, %v1372_v48  ;;  %1832 = vmatpush1.bf16.msra.mxu1 %v4225_v56  ;;  %v1414_v21 = vld [vmem:[#allocation2 + $0x1f] sm:$0xff]  ;;  %v1905_v53 = vld [vmem:[#allocation2 + $0x11] sm:$0xff] }
 0x1c0   : > { %2013 = vmatpush1.bf16.msra.mxu0 %v4228_v57  ;;  %v1388_v25 = vld [vmem:[#allocation2 + $0x1e] sm:$0xff]  ;;  %1833 = vmatprep.subr.bf16.mxu1 %v4233_v38  ;;  %v1418_v62 = vpack.c.bf16 %v1414_v21, %v1413_v40  ;;  %v4267_v20 = vld [vmem:[#allocation6 + $0x4f0] ss:$8 sps:$4 sm:$0xff]   ;;  %v1910_v63 = vpack.c.bf16 %v1905_v53, %v1904_v59 }
 0x1c1   : > { %5515 = vst [vmem:[#allocation28_spill] sm:$0xff] %v5157_v15  ;;  %2014 = vmatprep.subr.bf16.mxu0 %v4236_v58  ;;  %v1392_v47 = vpack.c.bf16 %v1388_v25, %v1387_v27  ;;  %1384 = vst [vmem:[#allocation2 + $0x30] sm:$0xff] %v5157_v15  ;;  %v4270_v3 = vld [vmem:[#allocation6 + $0x4e0] ss:$8 sps:$4 sm:$0xff]   ;;  %v4275_v16 = vld [vmem:[#allocation6 + $0x4d4] ss:$8 sps:$4 sm:$0xff]   ;;  %v1730_v58 = vpack.c.bf16 %v5136_v4, %v5122_v31 }
 0x1c2   : > { %1560 = vmatmul.mubr.bf16.gmra.mxu1 %v1418_v62  ;;  %v1906_v57 = vld [vmem:[#allocation2 + $0x19] sm:$0xff]  ;;  %v1731_v62 = vpack.c.bf16 %v5157_v15, %v5148_v2  ;;  %v4311_v53 = vld [vmem:[#allocation6 + $0x5c4] ss:$8 sps:$4 sm:$0xff]  }
 0x1c3   : > { %1703 = vmatmul.mubr.bf16.gmra.mxu0 %v1392_v47  ;;  %1834 = vmatpush1.bf16.msra.mxu1 %v4231_v18  ;;  %v4273_v38 = vld [vmem:[#allocation6 + $0x4d0] ss:$8 sps:$4 sm:$0xff]   ;;  %v4278_v18 = vld [vmem:[#allocation6 + $0x4c4] ss:$8 sps:$4 sm:$0xff]   ;;  %v4281_v40 = vld [vmem:[#allocation6 + $0x4b4] ss:$8 sps:$4 sm:$0xff]  }
 0x1c4   : > { %2015 = vmatpush1.bf16.msra.mxu0 %v4234_v19  ;;  %1835 = vmatprep.subr.bf16.mxu1 %v4239_v43  ;;  %v1415_v23 = vld [vmem:[#allocation2 + $0x27] sm:$0xff]  ;;  %v4279_v25 = vld [vmem:[#allocation6 + $0x4b0] ss:$8 sps:$4 sm:$0xff]  }
 0x1c5   : > { %2016 = vmatprep.subr.bf16.mxu0 %v4242_v32  ;;  %1569 = vmatprep.mubr.bf16.mxu1 %v5469_v0  ;;  %v1389_v54 = vld [vmem:[#allocation2 + $0x26] sm:$0xff] }
 0x1c6   : > { %1712 = vmatprep.mubr.bf16.mxu0 %v5469_v0  ;;  %v1907_v56 = vld [vmem:[#allocation2 + $0x21] sm:$0xff] }
 0x1c7   : > { %1836 = vmatpush1.bf16.msra.mxu1 %v4237_v44  ;;  %v1911_v48 = vpack.c.bf16 %v1907_v56, %v1906_v57  ;;  %v4276_v19 = vld [vmem:[#allocation6 + $0x4c0] ss:$8 sps:$4 sm:$0xff]   ;;  %v4284_v43 = vld [vmem:[#allocation6 + $0x4a4] ss:$8 sps:$4 sm:$0xff]   ;;  %v4287_v44 = vld [vmem:[#allocation6 + $0x494] ss:$8 sps:$4 sm:$0xff]  }
 0x1c8   : > { %2017 = vmatpush1.bf16.msra.mxu0 %v4240_v24  ;;  %1837 = vmatprep.subr.bf16.mxu1 %v4245_v14  ;;  %v1416_v52 = vld [vmem:[#allocation2 + $0x2f] sm:$0xff]  ;;  %v4282_v32 = vld [vmem:[#allocation6 + $0x4a0] ss:$8 sps:$4 sm:$0xff]  }
 0x1c9   : > { %2018 = vmatprep.subr.bf16.mxu0 %v4248_v51  ;;  %v1390_v46 = vld [vmem:[#allocation2 + $0x2e] sm:$0xff]  ;;  %v1419_v39 = vpack.c.bf16 %v1416_v52, %v1415_v23  ;;  %v4288_v51 = vld [vmem:[#allocation6 + $0x480] ss:$8 sps:$4 sm:$0xff]  }
 0x1ca   : > { %v1393_v49 = vpack.c.bf16 %v1390_v46, %v1389_v54  ;;  %v1908_v21 = vld [vmem:[#allocation2 + $0x29] sm:$0xff]  ;;  %v1909_v27 = vld [vmem:[#allocation2 + $0x31] sm:$0xff]  ;;  %v2087_v54 = vld [vmem:[#allocation2 + $0x1a] sm:$0xff] }
 0x1cb   : > { %1570 = vmatmul.mubr.bf16.gmra.mxu1 %v1419_v39  ;;  %v1912_v47 = vpack.c.bf16 %v1909_v27, %v1908_v21  ;;  %v4285_v24 = vld [vmem:[#allocation6 + $0x490] ss:$8 sps:$4 sm:$0xff]   ;;  %v4290_v14 = vld [vmem:[#allocation6 + $0x484] ss:$8 sps:$4 sm:$0xff]  }
 0x1cc   : > { %1713 = vmatmul.mubr.bf16.gmra.mxu0 %v1393_v49  ;;  %1838 = vmatpush1.bf16.msra.mxu1 %v4243_v5  ;;  %v2086_v5 = vld [vmem:[#allocation2 + $0x12] sm:$0xff]  ;;  %v2088_v52 = vld [vmem:[#allocation2 + $0x22] sm:$0xff]  ;;  %v2089_v39 = vld [vmem:[#allocation2 + $0x2a] sm:$0xff] }
 0x1cd   : > { %2019 = vmatpush1.bf16.msra.mxu0 %v4246_v1  ;;  %1839 = vmatprep.subr.bf16.mxu1 %v4251_v34  ;;  %v2085_v1 = vld [vmem:[#allocation2 + $0xa] sm:$0xff]  ;;  %v2092_v46 = vpack.c.bf16 %v2088_v52, %v2087_v54  ;;  %v2090_v49 = vld [vmem:[#allocation2 + $0x32] sm:$0xff] }
 0x1ce   : > { %2020 = vmatprep.subr.bf16.mxu0 %v4254_v30  ;;  %1861 = vmatprep.mubr.bf16.mxu1 %v5469_v0  ;;  %v2091_v23 = vpack.c.bf16 %v2086_v5, %v2085_v1  ;;  %v2093_v34 = vpack.c.bf16 %v2090_v49, %v2089_v39  ;;  %v4293_v30 = vld [vmem:[#allocation6 + $0x5f4] ss:$8 sps:$4 sm:$0xff]   ;;  %v4314_v59 = vld [vmem:[#allocation6 + $0x544] ss:$8 sps:$4 sm:$0xff]  }
 0x1cf   : > { %2042 = vmatprep.mubr.bf16.mxu0 %v5469_v0  ;;  %v4323_v56 = vld [vmem:[#allocation6 + $0x5a4] ss:$8 sps:$4 sm:$0xff]  }
 0x1d0   : > { %1840 = vmatpush1.bf16.msra.mxu1 %v4249_v10  ;;  %v4296_v10 = vld [vmem:[#allocation6 + $0x574] ss:$8 sps:$4 sm:$0xff]   ;;  %v4326_v57 = vld [vmem:[#allocation6 + $0x524] ss:$8 sps:$4 sm:$0xff]  }
 0x1d1   : > { %2021 = vmatpush1.bf16.msra.mxu0 %v4252_v11  ;;  %1841 = vmatprep.subr.bf16.mxu1 %v4257_v22  ;;  %v4291_v11 = vld [vmem:[#allocation6 + $0x5f0] ss:$8 sps:$4 sm:$0xff]   ;;  %v4335_v21 = vld [vmem:[#allocation6 + $0x584] ss:$8 sps:$4 sm:$0xff]  }
 0x1d2   : > { %2022 = vmatprep.subr.bf16.mxu0 %v4260_v35  ;;  %v4294_v22 = vld [vmem:[#allocation6 + $0x570] ss:$8 sps:$4 sm:$0xff]   ;;  %v4299_v35 = vld [vmem:[#allocation6 + $0x5e4] ss:$8 sps:$4 sm:$0xff]  }
 0x1d3   : > { %v4338_v27 = vld [vmem:[#allocation6 + $0x504] ss:$8 sps:$4 sm:$0xff]  }
 0x1d4   : > { %1842 = vmatpush1.bf16.msra.mxu1 %v4255_v36  ;;  %v4302_v36 = vld [vmem:[#allocation6 + $0x564] ss:$8 sps:$4 sm:$0xff]  }
 0x1d5   : > { %2023 = vmatpush1.bf16.msra.mxu0 %v4258_v55  ;;  %1843 = vmatprep.subr.bf16.mxu1 %v4263_v7  ;;  %v4297_v55 = vld [vmem:[#allocation6 + $0x5e0] ss:$8 sps:$4 sm:$0xff]  }
 0x1d6   : > { %2024 = vmatprep.subr.bf16.mxu0 %v4266_v60  ;;  %v4300_v7 = vld [vmem:[#allocation6 + $0x560] ss:$8 sps:$4 sm:$0xff]   ;;  %v4305_v60 = vld [vmem:[#allocation6 + $0x5d4] ss:$8 sps:$4 sm:$0xff]  }
 0x1d8   : > { %1844 = vmatpush1.bf16.msra.mxu1 %v4261_v13  ;;  %v4308_v13 = vld [vmem:[#allocation6 + $0x554] ss:$8 sps:$4 sm:$0xff]  }
 0x1d9   : > { %2025 = vmatpush1.bf16.msra.mxu0 %v4264_v41  ;;  %2191 = vmatprep.subr.bf16.mxu1 %v4269_v42  ;;  %v4303_v41 = vld [vmem:[#allocation6 + $0x5d0] ss:$8 sps:$4 sm:$0xff]  }
 0x1da   : > { %2504 = vmatprep.subr.bf16.mxu0 %v4293_v30  ;;  %v4306_v42 = vld [vmem:[#allocation6 + $0x550] ss:$8 sps:$4 sm:$0xff]  }
 0x1db   : > { %1862 = vmatmul.mubr.bf16.vlgmr.msra.gmra.mxu1 %v1729_v8  ;;  %v4312_v8 = vld [vmem:[#allocation6 + $0x540] ss:$8 sps:$4 sm:$0xff]  }
 0x1dc   : > { %2043 = vmatmul.mubr.bf16.vlgmr.msra.gmra.mxu0 %v1910_v63  ;;  %2192 = vmatpush1.bf16.msra.mxu1 %v4267_v20  ;;  %v4309_v20 = vld [vmem:[#allocation6 + $0x5c0] ss:$8 sps:$4 sm:$0xff]   ;;  %v4317_v63 = vld [vmem:[#allocation6 + $0x5b4] ss:$8 sps:$4 sm:$0xff]  }
 0x1dd   : > { %1871 = vmatprep.mubr.bf16.mxu1 %v5469_v0  ;;  %2193 = vmatprep.subr.bf16.mxu1 %v4272_v26  ;;  %v4320_v26 = vld [vmem:[#allocation6 + $0x534] ss:$8 sps:$4 sm:$0xff]  }
 0x1de   : > { %2052 = vmatprep.mubr.bf16.mxu0 %v5469_v0  ;;  %2505 = vmatpush1.bf16.msra.mxu0 %v4291_v11 }
 0x1df   : > { %2506 = vmatprep.subr.bf16.mxu0 %v4299_v35 }
 0x1e0   : > { %2194 = vmatpush1.bf16.msra.mxu1 %v4270_v3  ;;  %v4315_v3 = vld [vmem:[#allocation6 + $0x5b0] ss:$8 sps:$4 sm:$0xff]  }
 0x1e1   : > { %2195 = vmatprep.subr.bf16.mxu1 %v4275_v16  ;;  %v4318_v16 = vld [vmem:[#allocation6 + $0x530] ss:$8 sps:$4 sm:$0xff]  }
 0x1e2   : > { %2507 = vmatpush1.bf16.msra.mxu0 %v4297_v55 }
 0x1e3   : > { %1872 = vmatmul.mubr.bf16.gmra.mxu1 %v1730_v58  ;;  %2508 = vmatprep.subr.bf16.mxu0 %v4305_v60  ;;  %v4324_v58 = vld [vmem:[#allocation6 + $0x520] ss:$8 sps:$4 sm:$0xff]  }
 0x1e4   : > { %2053 = vmatmul.mubr.bf16.gmra.mxu0 %v1911_v48  ;;  %2196 = vmatpush1.bf16.msra.mxu1 %v4273_v38  ;;  %v4321_v38 = vld [vmem:[#allocation6 + $0x5a0] ss:$8 sps:$4 sm:$0xff]   ;;  %v4329_v48 = vld [vmem:[#allocation6 + $0x594] ss:$8 sps:$4 sm:$0xff]  }
 0x1e5   : > { %1881 = vmatprep.mubr.bf16.mxu1 %v5469_v0  ;;  %2197 = vmatprep.subr.bf16.mxu1 %v4278_v18  ;;  %v4332_v18 = vld [vmem:[#allocation6 + $0x514] ss:$8 sps:$4 sm:$0xff]  }
 0x1e6   : > { %2062 = vmatprep.mubr.bf16.mxu0 %v5469_v0  ;;  %2509 = vmatpush1.bf16.msra.mxu0 %v4303_v41 }
 0x1e7   : > { %2510 = vmatprep.subr.bf16.mxu0 %v4311_v53 }
 0x1e8   : > { %2198 = vmatpush1.bf16.msra.mxu1 %v4276_v19  ;;  %v4327_v19 = vld [vmem:[#allocation6 + $0x590] ss:$8 sps:$4 sm:$0xff]  }
 0x1e9   : > { %2199 = vmatprep.subr.bf16.mxu1 %v4281_v40  ;;  %v4330_v40 = vld [vmem:[#allocation6 + $0x510] ss:$8 sps:$4 sm:$0xff]  }
 0x1ea   : > { %2511 = vmatpush1.bf16.msra.mxu0 %v4309_v20 }
 0x1eb   : > { %1882 = vmatmul.mubr.bf16.gmra.mxu1 %v1731_v62  ;;  %2512 = vmatprep.subr.bf16.mxu0 %v4317_v63  ;;  %v4336_v62 = vld [vmem:[#allocation6 + $0x500] ss:$8 sps:$4 sm:$0xff]  }
 0x1ec   : > { %2063 = vmatmul.mubr.bf16.gmra.mxu0 %v1912_v47  ;;  %2200 = vmatpush1.bf16.msra.mxu1 %v4279_v25  ;;  %v4333_v25 = vld [vmem:[#allocation6 + $0x580] ss:$8 sps:$4 sm:$0xff]   ;;  %v4341_v47 = vld [vmem:[#allocation6 + $0x674] ss:$8 sps:$4 sm:$0xff]  }
 0x1ed   : > { %2223 = vmatprep.mubr.bf16.mxu1 %v5469_v0  ;;  %2201 = vmatprep.subr.bf16.mxu1 %v4284_v43  ;;  %v4344_v43 = vld [vmem:[#allocation6 + $0x6f4] ss:$8 sps:$4 sm:$0xff]  }
 0x1ee   : > { %2536 = vmatprep.mubr.bf16.mxu0 %v5469_v0  ;;  %2513 = vmatpush1.bf16.msra.mxu0 %v4315_v3 }
 0x1ef   : > { %2514 = vmatprep.subr.bf16.mxu0 %v4323_v56 }
 0x1f0   : > { %2202 = vmatpush1.bf16.msra.mxu1 %v4282_v32 }
 0x1f1   : > { %2203 = vmatprep.subr.bf16.mxu1 %v4287_v44 }
 0x1f2   : > { %2515 = vmatpush1.bf16.msra.mxu0 %v4321_v38 }
 0x1f3   : > { %2516 = vmatprep.subr.bf16.mxu0 %v4329_v48 }
 0x1f4   : > { %2204 = vmatpush1.bf16.msra.mxu1 %v4285_v24 }
 0x1f5   : > { %2205 = vmatprep.subr.bf16.mxu1 %v4290_v14 }
 0x1f6   : > { %2517 = vmatpush1.bf16.msra.mxu0 %v4327_v19 }
 0x1f7   : > { %2518 = vmatprep.subr.bf16.mxu0 %v4335_v21 }
 0x1f8   : > { %2206 = vmatpush1.bf16.msra.mxu1 %v4288_v51 }
 0x1f9   : > { %2645 = vmatprep.subr.bf16.mxu1 %v4296_v10 }
 0x1fa   : > { %2519 = vmatpush1.bf16.msra.mxu0 %v4333_v25 }
 0x1fb   : > { %2224 = vmatmul.mubr.bf16.vlgmr.msra.gmra.mxu1 %v2091_v23  ;;  %2812 = vmatprep.subr.bf16.mxu0 %v4341_v47 }
 0x1fc   : > { %2233 = vmatprep.mubr.bf16.mxu1 %v5469_v0  ;;  %2646 = vmatpush1.bf16.msra.mxu1 %v4294_v22 }
 0x1fd   : > { %2647 = vmatprep.subr.bf16.mxu1 %v4302_v36 }
 0x200   : > { %2648 = vmatpush1.bf16.msra.mxu1 %v4300_v7 }
 0x201   : > { %2649 = vmatprep.subr.bf16.mxu1 %v4308_v13 }
 0x203   : > { %2234 = vmatmul.mubr.bf16.gmra.mxu1 %v2092_v46 }
 0x204   : > { %2243 = vmatprep.mubr.bf16.mxu1 %v5469_v0  ;;  %2650 = vmatpush1.bf16.msra.mxu1 %v4306_v42 }
 0x205   : > { %2651 = vmatprep.subr.bf16.mxu1 %v4314_v59 }
 0x208   : > { %2652 = vmatpush1.bf16.msra.mxu1 %v4312_v8 }
 0x209   : > { %2653 = vmatprep.subr.bf16.mxu1 %v4320_v26 }
 0x20b   : > { %2244 = vmatmul.mubr.bf16.gmra.mxu1 %v2093_v34 }
 0x20c   : > { %2677 = vmatprep.mubr.bf16.mxu1 %v5469_v0  ;;  %2654 = vmatpush1.bf16.msra.mxu1 %v4318_v16 }
 0x20d   : > { %2655 = vmatprep.subr.bf16.mxu1 %v4326_v57 }
 0x210   : > { %2656 = vmatpush1.bf16.msra.mxu1 %v4324_v58 }
 0x211   : > { %2657 = vmatprep.subr.bf16.mxu1 %v4332_v18  ;;  %v2272_v18 = vsub.s32 5, %v4992_v12 }
 0x213   : > { %v2273_v25 = vrot.slane %v5000_v17, %v2272_v18 }
 0x214   : > { %2658 = vmatpush1.bf16.msra.mxu1 %v4330_v40 }
 0x215   : > { %2659 = vmatprep.subr.bf16.mxu1 %v4338_v27 }
 0x218   : > { %2660 = vmatpush1.bf16.msra.mxu1 %v4336_v62 }
 0x219   : > { %2989 = vmatprep.subr.bf16.mxu1 %v4344_v43  ;;  %v5224_v43 = vsub.s32 1, %v4992_v12 }
 0x21b   : > { %v2283_v2 = vrot.slane %v2273_v25, %v5224_v43 }
 0x27a   : > { %v5179_v32 = vpop.f32.mrf.mxu1 }
 0x27b   : > { %v5181_v44 = vpop.f32.mrf.mxu0 }
 0x27c   : > { %v1553_v24 = vpop.f32.mrf.mxu1 }
 0x27d   : > { %v1696_v14 = vpop.f32.mrf.mxu0 }
 0x27e   : > { %v5183_v51 = vpop.f32.mrf.mxu1  ;;  %v1697_v40 = vadd.f32 %v1696_v14, %v1553_v24 }
 0x27f   : > { %v5185_v5 = vpop.f32.mrf.mxu0 }
 0x280   : > { %v1557_v1 = vpop.f32.mrf.mxu1 }
 0x281   : > { %v1700_v23 = vpop.f32.mrf.mxu0 }
 0x282   : > { %v5187_v52 = vpop.f32.mrf.mxu1  ;;  %v1701_v47 = vadd.f32 %v1700_v23, %v1557_v1 }
 0x283   : > { %v5189_v46 = vpop.f32.mrf.mxu0 }
 0x284   : > { %v1563_v54 = vpop.f32.mrf.mxu1 }
 0x285   : > { %v1706_v49 = vpop.f32.mrf.mxu0 }
 0x286   : > { %v5191_v39 = vpop.f32.mrf.mxu1  ;;  %v1707_v4 = vadd.f32 %v1706_v49, %v1563_v54 }
 0x287   : > { %v5193_v30 = vpop.f32.mrf.mxu0 }
 0x288   : > { %v1567_v34 = vpop.f32.mrf.mxu1 }
 0x289   : > { %v1710_v11 = vpop.f32.mrf.mxu0 }
 0x28b   : > { %v5195_v10 = vpop.f32.mrf.mxu1 }
 0x28c   : > { %v5197_v35 = vpop.f32.mrf.mxu0 }
 0x28d   : > { %v1573_v22 = vpop.f32.mrf.mxu1 }
 0x28e   : > { %v1716_v55 = vpop.f32.mrf.mxu0 }
 0x28f   : > { %v5199_v36 = vpop.f32.mrf.mxu1 }
 0x290   : > { %v5203_v13 = vpop.f32.mrf.mxu0 }
 0x291   : > { %v1577_v7 = vpop.f32.mrf.mxu1 }
 0x292   : > { %v1720_v53 = vpop.f32.mrf.mxu0 }
 0x29b   : > { %v5201_v60 = vpop.f32.mrf.mxu1 }
 0x29c   : > { %v5207_v20 = vpop.f32.mrf.mxu0 }
 0x29d   : > { %v1865_v41 = vpop.f32.mrf.mxu1 }
 0x29e   : > { %v2046_v26 = vpop.f32.mrf.mxu0  ;;  %v1893_v27 = vadd.f32 %v1865_v41, %v1697_v40  ;;  %v1711_v40 = vadd.f32 %v1710_v11, %v1567_v34 }
 0x29f   : > { %v5205_v42 = vpop.f32.mrf.mxu1 }
 0x2a0   : > { %v5213_v56 = vpop.f32.mrf.mxu0  ;;  %v2074_v15 = vadd.f32 %v2046_v26, %v1893_v27 }
 0x2a1   : > { %v1869_v59 = vpop.f32.mrf.mxu1 }
 0x2a2   : > { %v2050_v38 = vpop.f32.mrf.mxu0  ;;  %v1895_v50 = vadd.f32 %v1869_v59, %v1701_v47 }
 0x2a3   : > { %v5209_v8 = vpop.f32.mrf.mxu1 }
 0x2a4   : > { %v5217_v48 = vpop.f32.mrf.mxu0  ;;  %v2076_v17 = vadd.f32 %v2050_v38, %v1895_v50  ;;  %v1721_v38 = vadd.f32 %v1720_v53, %v1577_v7 }
 0x2a5   : > { %v1875_v63 = vpop.f32.mrf.mxu1 }
 0x2a6   : > { %v2056_v21 = vpop.f32.mrf.mxu0  ;;  %v1897_v18 = vadd.f32 %v1875_v63, %v1707_v4 }
 0x2a7   : > { %v5211_v3 = vpop.f32.mrf.mxu1 }
 0x2a8   : > { %v5226_v0 = vpop.f32.mrf.mxu0  ;;  %v2078_v59 = vadd.f32 %v2056_v21, %v1897_v18 }
 0x2a9   : > { %v1879_v16 = vpop.f32.mrf.mxu1 }
 0x2aa   : > { %v2060_v14 = vpop.f32.mrf.mxu0  ;;  %v1899_v26 = vadd.f32 %v1879_v16, %v1711_v40 }
 0x2ab   : > { %v5215_v57 = vpop.f32.mrf.mxu1 }
 0x2ac   : > { %v5233_v31 = vpop.f32.mrf.mxu0  ;;  %v2080_v4 = vadd.f32 %v2060_v14, %v1899_v26 }
 0x2ad   : > { %v1885_v58 = vpop.f32.mrf.mxu1 }
 0x2ae   : > { %v2066_v25 = vpop.f32.mrf.mxu0 }
 0x2af   : > { %v5220_v19 = vpop.f32.mrf.mxu1 }
 0x2b1   : > { %v1889_v62 = vpop.f32.mrf.mxu1 }
 0x2bb   : > { %v5228_v45 = vpop.f32.mrf.mxu1 }
 0x2bd   : > { %v2227_v33 = vpop.f32.mrf.mxu1 }
 0x2be   : > { %v2255_v24 = vadd.f32 %v2227_v33, %v2074_v15  ;;  %v1717_v33 = vadd.f32 %v1716_v55, %v1573_v22 }
 0x2bf   : > { %v5231_v41 = vpop.f32.mrf.mxu1 }
 0x2c0   : > { %v2285_v1 = vadd.f32 %v2283_v2, %v2255_v24  ;;  %v1901_v63 = vadd.f32 %v1885_v58, %v1717_v33  ;;  %v1695_v58 = vadd.f32 %v5181_v44, %v5179_v32  ;;  %v5253_v33 = vld [vmem:[%s5454_s3] sm:$0x77] }
 0x2c1   : > { %v2231_v23 = vpop.f32.mrf.mxu1  ;;  %v2269_v32 = vrot.slane %v5253_v33, %v5224_v43 }
 0x2c2   : > { %v3804_v12 = vmul.f32 -1.442695, %v2285_v1  ;;  %v2257_v6 = vadd.f32 %v2231_v23, %v2076_v17  ;;  %v5239_v17 = vpop.f32.mrf.mxu0 }
 0x2c3   : > { %v5235_v28 = vpop.f32.mrf.mxu1 }
 0x2c4   : > { %4443 = vpow2.f32 %v3804_v12  ;;  %v2287_v27 = vadd.f32 %v2283_v2, %v2257_v6  ;;  %v2082_v12 = vadd.f32 %v2066_v25, %v1901_v63  ;;  %v1903_v6 = vadd.f32 %v1889_v62, %v1721_v38  ;;  %v2070_v1 = vpop.f32.mrf.mxu0 }
 0x2c5   : > { %v2237_v54 = vpop.f32.mrf.mxu1  ;;  %v5263_v63 = vrot.slane %v2269_v32, %v5224_v43 }
 0x2c6   : > { %v3805_v15 = vmul.f32 -1.442695, %v2287_v27  ;;  %v2259_v49 = vadd.f32 %v2237_v54, %v2078_v59  ;;  %v2084_v7 = vadd.f32 %v2070_v1, %v1903_v6  ;;  %v1892_v59 = vadd.f32 %v5201_v60, %v1695_v58 }
 0x2c7   : > { %v5237_v50 = vpop.f32.mrf.mxu1  ;;  %v1699_v54 = vadd.f32 %v5185_v5, %v5183_v51  ;;  %v1705_v51 = vadd.f32 %v5189_v46, %v5187_v52  ;;  %v1709_v52 = vadd.f32 %v5193_v30, %v5191_v39  ;;  %v1715_v39 = vadd.f32 %v5197_v35, %v5195_v10 }
 0x2c8   : > { %4445 = vpow2.f32 %v3805_v15  ;;  %v2289_v34 = vadd.f32 %v2283_v2, %v2259_v49  ;;  %v2073_v60 = vadd.f32 %v5207_v20, %v1892_v59  ;;  %v1719_v1 = vadd.f32 %v5203_v13, %v5199_v36  ;;  %v5516_v59 = vld [vmem:[#allocation20_spill] sm:$0xff] }
 0x2c9   : > { %v2241_v11 = vpop.f32.mrf.mxu1  ;;  %v1894_v49 = vadd.f32 %v5205_v42, %v1699_v54  ;;  %v5269_v42 = vrot.slane %v5049_v29, %v5224_v43 }
 0x2ca   : > { %v3806_v47 = vmul.f32 -1.442695, %v2289_v34  ;;  %v2261_v24 = vadd.f32 %v2241_v11, %v2080_v4  ;;  %v2254_v5 = vadd.f32 %v5228_v45, %v2073_v60  ;;  %v1896_v11 = vadd.f32 %v5209_v8, %v1705_v51 }
 0x2cb   : > { %v5241_v16 = vpop.f32.mrf.mxu1 }
 0x2cc   : > { %4447 = vpow2.f32 %v3806_v47  ;;  %v2291_v22 = vadd.f32 %v2283_v2, %v2261_v24  ;;  %v2284_v45 = vadd.f32 %v5263_v63, %v2254_v5  ;;  %v2077_v47 = vadd.f32 %v5217_v48, %v1896_v11  ;;  %v4339_v11 = vld [vmem:[#allocation6 + $0x670] ss:$8 sps:$4 sm:$0xff]  }
 0x2cd   : > { %v2247_v55 = vpop.f32.mrf.mxu1  ;;  %v1900_v48 = vadd.f32 %v5215_v57, %v1715_v39  ;;  %v1902_v57 = vadd.f32 %v5220_v19, %v1719_v1  ;;  %v4351_v1 = vld [vmem:[#allocation6 + $0x650] ss:$8 sps:$4 sm:$0xff]  }
 0x2ce   : > { %v3807_v21 = vmul.f32 -1.442695, %v2291_v22  ;;  %v2263_v18 = vadd.f32 %v2247_v55, %v2082_v12  ;;  %v2300_v8 = vadd.f32 %v5269_v42, %v2284_v45  ;;  %v2258_v29 = vadd.f32 %v5235_v28, %v2077_v47  ;;  %v5521_v45 = vld [vmem:[#allocation26_spill] sm:$0xff] }
 0x2cf   : > { %v5243_v14 = vpop.f32.mrf.mxu1  ;;  %v2081_v58 = vadd.f32 %v5233_v31, %v1900_v48  ;;  %v2083_v19 = vadd.f32 %v5239_v17, %v1902_v57  ;;  %v5519_v17 = vld [vmem:[#allocation24_spill] sm:$0xff] }
 0x2d0   : > { %4449 = vpow2.f32 %v3807_v21  ;;  %v2293_v53 = vadd.f32 %v2283_v2, %v2263_v18  ;;  %v2288_v21 = vadd.f32 %v5263_v63, %v2258_v29  ;;  %v4347_v29 = vld [vmem:[#allocation6 + $0x664] ss:$8 sps:$4 sm:$0xff]  }
 0x2d1   : > { %v4444_v23 = vpop.eup %4443  ;;  %v2251_v40 = vpop.f32.mrf.mxu1  ;;  %v2262_v36 = vadd.f32 %v5241_v16, %v2081_v58  ;;  %v2264_v32 = vadd.f32 %v5243_v14, %v2083_v19  ;;  %v5523_v48 = vld [vmem:[#allocation28_spill] sm:$0xff]  ;;  %v4365_v19 = vld [vmem:[#allocation6 + $0x634] ss:$8 sps:$4 sm:$0xff]  }
 0x2d2   : > { %v2324_v26 = vadd.f32 1.0, %v4444_v23  ;;  %v3808_v62 = vmul.f32 -1.442695, %v2293_v53  ;;  %v2265_v27 = vadd.f32 %v2251_v40, %v2084_v7 }
 0x2d3   : > { %v2292_v54 = vadd.f32 %v5263_v63, %v2262_v36  ;;  %v4362_v36 = vld [vmem:[#allocation6 + $0x6c4] ss:$8 sps:$4 sm:$0xff]  }
 0x2d4   : > { %4451 = vrcp.f32 %v2324_v26  ;;  %v2295_v44 = vadd.f32 %v2283_v2, %v2265_v27  ;;  %v2075_v2 = vadd.f32 %v5213_v56, %v1894_v49  ;;  %v1898_v56 = vadd.f32 %v5211_v3, %v1709_v52 }
 0x2d5   : > { %v4446_v15 = vpop.eup %4445  ;;  %4453 = vpow2.f32 %v3808_v62 }
 0x2d6   : > { %v2325_v25 = vadd.f32 1.0, %v4446_v15  ;;  %v3809_v4 = vmul.f32 -1.442695, %v2295_v44  ;;  %v2256_v46 = vadd.f32 %v5231_v41, %v2075_v2  ;;  %v2079_v41 = vadd.f32 %v5226_v0, %v1898_v56  ;;  %v5518_v15 = vld [vmem:[#allocation21_spill] sm:$0xff]  ;;  %v5520_v2 = vld [vmem:[#allocation23_spill] sm:$0xff] }
 0x2d8   : > { %4455 = vrcp.f32 %v2325_v25  ;;  %v2286_v12 = vadd.f32 %v5263_v63, %v2256_v46  ;;  %v2260_v28 = vadd.f32 %v5237_v50, %v2079_v41  ;;  %v2302_v50 = vadd.f32 %v5269_v42, %v2288_v21  ;;  %v5522_v41 = vld [vmem:[#allocation25_spill] sm:$0xff] }
 0x2d9   : > { %v4448_v34 = vpop.eup %4447  ;;  %4457 = vpow2.f32 %v3809_v4  ;;  %v2304_v25 = vadd.f32 %v5269_v42, %v2292_v54  ;;  %v2294_v4 = vadd.f32 %v5263_v63, %v2264_v32  ;;  %v4356_v21 = vld [vmem:[#allocation6 + $0x6d4] ss:$8 sps:$4 sm:$0xff]  }
 0x2da   : > { %v2326_v20 = vadd.f32 1.0, %v4448_v34  ;;  %v2301_v55 = vadd.f32 %v5269_v42, %v2286_v12  ;;  %v2290_v23 = vadd.f32 %v5263_v63, %v2260_v28 }
 0x2dc   : > { %4459 = vrcp.f32 %v2326_v20  ;;  %v4342_v20 = vld [vmem:[#allocation6 + $0x6f0] ss:$8 sps:$4 sm:$0xff]  }
 0x2dd   : > { %v4450_v38 = vpop.eup %4449 }
 0x2de   : > { %v2327_v24 = vadd.f32 1.0, %v4450_v38  ;;  %v2305_v38 = vadd.f32 %v5269_v42, %v2294_v4  ;;  %v4377_v4 = vld [vmem:[#allocation6 + $0x614] ss:$8 sps:$4 sm:$0xff]  }
 0x2e0   : > { %4461 = vrcp.f32 %v2327_v24 }
 0x2e1   : > { %v4452_v43 = vpop.eup %4451 }
 0x2e2   : > { %v4454_v30 = vpop.eup %4453  ;;  %v2342_v6 = vmul.f32 %v4452_v43, %v2300_v8  ;;  %v4350_v43 = vld [vmem:[#allocation6 + $0x6e4] ss:$8 sps:$4 sm:$0xff]  }
 0x2e3   : > { %v2328_v22 = vadd.f32 1.0, %v4454_v30 }
 0x2e4   : > { %v2348_v3 = vadd.f32 %v2342_v6, %v5097_v37 }
 0x2e5   : > { %v4456_v18 = vpop.eup %4455  ;;  %4463 = vrcp.f32 %v2328_v22 }
 0x2e6   : > { %v4458_v10 = vpop.eup %4457  ;;  %v2354_v35 = vmul.f32 0.70710677, %v2348_v3  ;;  %v2343_v0 = vmul.f32 %v4456_v18, %v2301_v55  ;;  %v4348_v3 = vld [vmem:[#allocation6 + $0x6e0] ss:$8 sps:$4 sm:$0xff]   ;;  %v4353_v55 = vld [vmem:[#allocation6 + $0x654] ss:$8 sps:$4 sm:$0xff]  }
 0x2e7   : > { %v2329_v7 = vadd.f32 1.0, %v4458_v10  ;;  %v5524_v18 = vmov 0   ;;  %v4354_v10 = vld [vmem:[#allocation6 + $0x6d0] ss:$8 sps:$4 sm:$0xff]  }
 0x2e8   : > { %v5293_v37 = vmul.f32 %v5088_v9, %v2354_v35  ;;  %v2349_v53 = vadd.f32 %v2343_v0, %v5111_v61  ;;  %v5517_v9 = vld [vmem:[#allocation22_spill] sm:$0xff]  ;;  %v2303_v61 = vadd.f32 %v5269_v42, %v2290_v23  ;;  %v4345_v42 = vld [vmem:[#allocation6 + $0x660] ss:$8 sps:$4 sm:$0xff]  }
 0x2e9   : > { %v4460_v40 = vpop.eup %4459  ;;  %4465 = vrcp.f32 %v2329_v7  ;;  %v5525_v0 = vld [vmem:[#allocation27_spill] sm:$0xff] }
 0x2ea   : > { %2366 = vst [vmem:[#allocation2 + $0x8] sm:$0xff] %v5293_v37  ;;  %v2355_v13 = vmul.f32 0.70710677, %v2349_v53  ;;  %v2344_v31 = vmul.f32 %v4460_v40, %v2302_v50  ;;  %v4359_v40 = vld [vmem:[#allocation6 + $0x644] ss:$8 sps:$4 sm:$0xff]  }
 0x2ec   : > { %v5302_v26 = vmul.f32 %v5516_v59, %v2355_v13  ;;  %v2350_v62 = vadd.f32 %v2344_v31, %v5517_v9  ;;  %v4357_v13 = vld [vmem:[#allocation6 + $0x640] ss:$8 sps:$4 sm:$0xff]   ;;  %v4368_v59 = vld [vmem:[#allocation6 + $0x6b4] ss:$8 sps:$4 sm:$0xff]   ;;  %v4363_v9 = vld [vmem:[#allocation6 + $0x630] ss:$8 sps:$4 sm:$0xff]  }
 0x2ed   : > { %v4462_v27 = vpop.eup %4461  ;;  %v4360_v31 = vld [vmem:[#allocation6 + $0x6c0] ss:$8 sps:$4 sm:$0xff]  }
 0x2ee   : > { %2367 = vst [vmem:[#allocation2 + $0x10] sm:$0xff] %v5302_v26  ;;  %v2356_v16 = vmul.f32 0.70710677, %v2350_v62  ;;  %v2345_v44 = vmul.f32 %v4462_v27, %v2303_v61  ;;  %v4366_v62 = vld [vmem:[#allocation6 + $0x6b0] ss:$8 sps:$4 sm:$0xff]  }
 0x2f0   : > { %v5310_v60 = vmul.f32 %v5518_v15, %v2356_v16  ;;  %v2351_v49 = vadd.f32 %v2345_v44, %v5519_v17  ;;  %v4371_v15 = vld [vmem:[#allocation6 + $0x624] ss:$8 sps:$4 sm:$0xff]  }
 0x2f1   : > { %v2398_v52 = vld [vmem:[#allocation2 + $0x7] sm:$0xff] }
 0x2f2   : > { %v4464_v51 = vpop.eup %4463  ;;  %2368 = vst [vmem:[#allocation2 + $0x18] sm:$0xff] %v5310_v60  ;;  %v2357_v5 = vmul.f32 0.70710677, %v2351_v49  ;;  %v2372_v56 = vld [vmem:[#allocation2 + $0x6] sm:$0xff] }
 0x2f3   : > { %v2346_v34 = vmul.f32 %v4464_v51, %v2304_v25  ;;  %v4374_v17 = vld [vmem:[#allocation6 + $0x6a4] ss:$8 sps:$4 sm:$0xff]   ;;  %v4369_v49 = vld [vmem:[#allocation6 + $0x620] ss:$8 sps:$4 sm:$0xff]   ;;  %v4380_v51 = vld [vmem:[#allocation6 + $0x694] ss:$8 sps:$4 sm:$0xff]  }
 0x2f4   : > { %v5317_v14 = vmul.f32 %v5520_v2, %v2357_v5  ;;  %v4372_v25 = vld [vmem:[#allocation6 + $0x6a0] ss:$8 sps:$4 sm:$0xff]   ;;  %v4375_v5 = vld [vmem:[#allocation6 + $0x610] ss:$8 sps:$4 sm:$0xff]   ;;  %v4383_v2 = vld [vmem:[#allocation6 + $0x604] ss:$8 sps:$4 sm:$0xff]  }
 0x2f5   : > { %v2352_v46 = vadd.f32 %v2346_v34, %v5521_v45  ;;  %v2399_v47 = vld [vmem:[#allocation2 + $0xf] sm:$0xff] }
 0x2f6   : > { %v2373_v24 = vld [vmem:[#allocation2 + $0xe] sm:$0xff]  ;;  %v4466_v8 = vpop.eup %4465  ;;  %2369 = vst [vmem:[#allocation2 + $0x20] sm:$0xff] %v5317_v14  ;;  %v2404_v63 = vpack.c.bf16 %v2399_v47, %v2398_v52  ;;  %v4384_v52 = vld [vmem:[#allocation6 + $0x680] ss:$8 sps:$4 sm:$0xff]  }
 0x2f7   : > { %v2378_v12 = vpack.c.bf16 %v2373_v24, %v2372_v56  ;;  %v2358_v39 = vmul.f32 0.70710677, %v2352_v46  ;;  %v2347_v30 = vmul.f32 %v4466_v8, %v2305_v38  ;;  %v4378_v34 = vld [vmem:[#allocation6 + $0x690] ss:$8 sps:$4 sm:$0xff]   ;;  %v4389_v45 = vld [vmem:[#allocation6 + $0x774] ss:$8 sps:$4 sm:$0xff]   ;;  %v2712_v56 = vpack.c.bf16 %v5302_v26, %v5293_v37 }
 0x2f8   : > { %2537 = vmatmul.mubr.bf16.vlgmr.msra.gmra.mxu0 %v2404_v63  ;;  %v2883_v38 = vld [vmem:[#allocation2 + $0x9] sm:$0xff] }
 0x2f9   : > { %2678 = vmatmul.mubr.bf16.vlgmr.msra.gmra.mxu1 %v2378_v12  ;;  %v5323_v6 = vmul.f32 %v5522_v41, %v2358_v39  ;;  %v2353_v22 = vadd.f32 %v2347_v30, %v5523_v48  ;;  %2813 = vmatpush1.bf16.msra.mxu0 %v4339_v11  ;;  %v2400_v35 = vld [vmem:[#allocation2 + $0x17] sm:$0xff]  ;;  %v4386_v11 = vld [vmem:[#allocation6 + $0x684] ss:$8 sps:$4 sm:$0xff]   ;;  %v4390_v63 = vld [vmem:[#allocation6 + $0x760] ss:$8 sps:$4 sm:$0xff]   ;;  %v2713_v30 = vpack.c.bf16 %v5317_v14, %v5310_v60 }
 0x2fa   : > { %2990 = vmatpush1.bf16.msra.mxu1 %v4342_v20  ;;  %2814 = vmatprep.subr.bf16.mxu0 %v4347_v29  ;;  %v2374_v7 = vld [vmem:[#allocation2 + $0x16] sm:$0xff]  ;;  %v4381_v20 = vld [vmem:[#allocation6 + $0x600] ss:$8 sps:$4 sm:$0xff]   ;;  %v4392_v8 = vld [vmem:[#allocation6 + $0x764] ss:$8 sps:$4 sm:$0xff]  }
 0x2fb   : > { %2991 = vmatprep.subr.bf16.mxu1 %v4350_v43  ;;  %2370 = vst [vmem:[#allocation2 + $0x28] sm:$0xff] %v5323_v6  ;;  %v2359_v28 = vmul.f32 0.70710677, %v2353_v22  ;;  %2546 = vmatprep.mubr.bf16.mxu0 %v5524_v18  ;;  %v2884_v46 = vld [vmem:[#allocation2 + $0x11] sm:$0xff]  ;;  %v4398_v48 = vld [vmem:[#allocation6 + $0x744] ss:$8 sps:$4 sm:$0xff]  }
 0x2fc   : > { %2687 = vmatprep.mubr.bf16.mxu1 %v5524_v18  ;;  %v4387_v47 = vld [vmem:[#allocation6 + $0x770] ss:$8 sps:$4 sm:$0xff]   ;;  %v2889_v24 = vpack.c.bf16 %v2884_v46, %v2883_v38  ;;  %v4395_v12 = vld [vmem:[#allocation6 + $0x754] ss:$8 sps:$4 sm:$0xff]   ;;  %v4396_v22 = vld [vmem:[#allocation6 + $0x740] ss:$8 sps:$4 sm:$0xff]  }
 0x2fd   : > { %v5330_v58 = vmul.f32 %v5525_v0, %v2359_v28  ;;  %2815 = vmatpush1.bf16.msra.mxu0 %v4345_v42  ;;  %v2401_v57 = vld [vmem:[#allocation2 + $0x1f] sm:$0xff]  ;;  %v4393_v39 = vld [vmem:[#allocation6 + $0x750] ss:$8 sps:$4 sm:$0xff]  }
 0x2fe   : > { %2992 = vmatpush1.bf16.msra.mxu1 %v4348_v3  ;;  %v2375_v53 = vld [vmem:[#allocation2 + $0x1e] sm:$0xff]  ;;  %2816 = vmatprep.subr.bf16.mxu0 %v4353_v55  ;;  %v2405_v50 = vpack.c.bf16 %v2401_v57, %v2400_v35  ;;  %v4405_v57 = vld [vmem:[#allocation6 + $0x710] ss:$8 sps:$4 sm:$0xff]  }
 0x2ff   : > { %2993 = vmatprep.subr.bf16.mxu1 %v4356_v21  ;;  %v2379_v23 = vpack.c.bf16 %v2375_v53, %v2374_v7  ;;  %2371 = vst [vmem:[#allocation2 + $0x30] sm:$0xff] %v5330_v58  ;;  %v2885_v43 = vld [vmem:[#allocation2 + $0x19] sm:$0xff]  ;;  %v2714_v28 = vpack.c.bf16 %v5330_v58, %v5323_v6  ;;  %v4410_v7 = vld [vmem:[#allocation6 + $0x704] ss:$8 sps:$4 sm:$0xff]  }
 0x300   : > { %2547 = vmatmul.mubr.bf16.gmra.mxu0 %v2405_v50  ;;  %v4401_v42 = vld [vmem:[#allocation6 + $0x734] ss:$8 sps:$4 sm:$0xff]   ;;  %v4399_v21 = vld [vmem:[#allocation6 + $0x730] ss:$8 sps:$4 sm:$0xff]   ;;  %v4402_v35 = vld [vmem:[#allocation6 + $0x720] ss:$8 sps:$4 sm:$0xff]  }
 0x301   : > { %2688 = vmatmul.mubr.bf16.gmra.mxu1 %v2379_v23  ;;  %2817 = vmatpush1.bf16.msra.mxu0 %v4351_v1  ;;  %v4407_v0 = vld [vmem:[#allocation6 + $0x714] ss:$8 sps:$4 sm:$0xff]   ;;  %v4408_v53 = vld [vmem:[#allocation6 + $0x700] ss:$8 sps:$4 sm:$0xff]  }
 0x302   : > { %2994 = vmatpush1.bf16.msra.mxu1 %v4354_v10  ;;  %2818 = vmatprep.subr.bf16.mxu0 %v4359_v40  ;;  %v2402_v61 = vld [vmem:[#allocation2 + $0x27] sm:$0xff]  ;;  %v3061_v50 = vld [vmem:[#allocation2 + $0x12] sm:$0xff] }
 0x303   : > { %2995 = vmatprep.subr.bf16.mxu1 %v4362_v36  ;;  %2556 = vmatprep.mubr.bf16.mxu0 %v5524_v18  ;;  %v2376_v54 = vld [vmem:[#allocation2 + $0x26] sm:$0xff]  ;;  %v3062_v36 = vld [vmem:[#allocation2 + $0x1a] sm:$0xff] }
 0x304   : > { %2697 = vmatprep.mubr.bf16.mxu1 %v5524_v18  ;;  %v2886_v29 = vld [vmem:[#allocation2 + $0x21] sm:$0xff]  ;;  %v3060_v58 = vld [vmem:[#allocation2 + $0xa] sm:$0xff] }
 0x305   : > { %2819 = vmatpush1.bf16.msra.mxu0 %v4357_v13  ;;  %v2890_v41 = vpack.c.bf16 %v2886_v29, %v2885_v43  ;;  %v4404_v10 = vld [vmem:[#allocation6 + $0x724] ss:$8 sps:$4 sm:$0xff]   ;;  %v3066_v23 = vpack.c.bf16 %v3061_v50, %v3060_v58 }
 0x306   : > { %2996 = vmatpush1.bf16.msra.mxu1 %v4360_v31  ;;  %2820 = vmatprep.subr.bf16.mxu0 %v4365_v19  ;;  %v2403_v27 = vld [vmem:[#allocation2 + $0x2f] sm:$0xff]  ;;  %v3063_v40 = vld [vmem:[#allocation2 + $0x22] sm:$0xff] }
 0x307   : > { %2997 = vmatprep.subr.bf16.mxu1 %v4368_v59  ;;  %v2377_v32 = vld [vmem:[#allocation2 + $0x2e] sm:$0xff]  ;;  %v2406_v16 = vpack.c.bf16 %v2403_v27, %v2402_v61  ;;  %v3067_v13 = vpack.c.bf16 %v3063_v40, %v3062_v36  ;;  %v4414_v27 = vld [vmem:[#allocation8 + $0x20] sm:$0xff]  }
 0x308   : > { %v2380_v44 = vpack.c.bf16 %v2377_v32, %v2376_v54  ;;  %v2887_v3 = vld [vmem:[#allocation2 + $0x29] sm:$0xff]  ;;  %v2888_v55 = vld [vmem:[#allocation2 + $0x31] sm:$0xff] }
 0x309   : > { %2557 = vmatmul.mubr.bf16.gmra.mxu0 %v2406_v16  ;;  %v2891_v1 = vpack.c.bf16 %v2888_v55, %v2887_v3  ;;  %v3064_v31 = vld [vmem:[#allocation2 + $0x2a] sm:$0xff]  ;;  %v3065_v19 = vld [vmem:[#allocation2 + $0x32] sm:$0xff]  ;;  %v4418_v16 = vld [vmem:[#allocation8] sm:$0xff]  }
 0x30a   : > { %2698 = vmatmul.mubr.bf16.gmra.mxu1 %v2380_v44  ;;  %2821 = vmatpush1.bf16.msra.mxu0 %v4363_v9  ;;  %v3068_v59 = vpack.c.bf16 %v3065_v19, %v3064_v31  ;;  %v4411_v9 = vld [vmem:[#allocation8 + $0x38] sm:$0xff]   ;;  %v4413_v61 = vld [vmem:[#allocation8 + $0x28] sm:$0xff]   ;;  %v4416_v32 = vld [vmem:[#allocation8 + $0x10] sm:$0xff]  }
 0x30b   : > { %2998 = vmatpush1.bf16.msra.mxu1 %v4366_v62  ;;  %2822 = vmatprep.subr.bf16.mxu0 %v4371_v15  ;;  %v4412_v62 = vld [vmem:[#allocation8 + $0x30] sm:$0xff]   ;;  %v4415_v54 = vld [vmem:[#allocation8 + $0x18] sm:$0xff]  }
 0x30c   : > { %2999 = vmatprep.subr.bf16.mxu1 %v4374_v17  ;;  %2844 = vmatprep.mubr.bf16.mxu0 %v5524_v18 }
 0x30d   : > { %3021 = vmatprep.mubr.bf16.mxu1 %v5524_v18 }
 0x30e   : > { %2823 = vmatpush1.bf16.msra.mxu0 %v4369_v49 }
 0x30f   : > { %3000 = vmatpush1.bf16.msra.mxu1 %v4372_v25  ;;  %2824 = vmatprep.subr.bf16.mxu0 %v4377_v4 }
 0x310   : > { %3001 = vmatprep.subr.bf16.mxu1 %v4380_v51 }
 0x312   : > { %2825 = vmatpush1.bf16.msra.mxu0 %v4375_v5 }
 0x313   : > { %3002 = vmatpush1.bf16.msra.mxu1 %v4378_v34  ;;  %2826 = vmatprep.subr.bf16.mxu0 %v4383_v2 }
 0x314   : > { %3003 = vmatprep.subr.bf16.mxu1 %v4386_v11 }
 0x316   : > { %2827 = vmatpush1.bf16.msra.mxu0 %v4381_v20 }
 0x317   : > { %3004 = vmatpush1.bf16.msra.mxu1 %v4384_v52  ;;  %3166 = vmatprep.subr.bf16.mxu0 %v4389_v45 }
 0x318   : > { %3920 = vmatprep.subr.bf16.mxu1 %v4411_v9 }
 0x319   : > { %2845 = vmatmul.mubr.bf16.vlgmr.msra.gmra.mxu0 %v2712_v56 }
 0x31a   : > { %3022 = vmatmul.mubr.bf16.vlgmr.msra.gmra.mxu1 %v2889_v24  ;;  %3167 = vmatpush1.bf16.msra.mxu0 %v4387_v47 }
 0x31b   : > { %2854 = vmatprep.mubr.bf16.mxu0 %v5524_v18  ;;  %3168 = vmatprep.subr.bf16.mxu0 %v4392_v8 }
 0x31c   : > { %3031 = vmatprep.mubr.bf16.mxu1 %v5524_v18  ;;  %3921 = vmatpush3.bf16.msra.mxu1 %v4411_v9 }
 0x31d   : > { %3922 = vmatprep.subr.bf16.mxu1 %v4412_v62 }
 0x31e   : > { %3169 = vmatpush1.bf16.msra.mxu0 %v4390_v63 }
 0x31f   : > { %3170 = vmatprep.subr.bf16.mxu0 %v4395_v12 }
 0x320   : > { %3923 = vmatpush3.bf16.msra.mxu1 %v4412_v62 }
 0x321   : > { %2855 = vmatmul.mubr.bf16.gmra.mxu0 %v2713_v30  ;;  %3924 = vmatprep.subr.bf16.mxu1 %v4413_v61 }
 0x322   : > { %3032 = vmatmul.mubr.bf16.gmra.mxu1 %v2890_v41  ;;  %3171 = vmatpush1.bf16.msra.mxu0 %v4393_v39 }
 0x323   : > { %2864 = vmatprep.mubr.bf16.mxu0 %v5524_v18  ;;  %3172 = vmatprep.subr.bf16.mxu0 %v4398_v48 }
 0x324   : > { %3041 = vmatprep.mubr.bf16.mxu1 %v5524_v18  ;;  %3925 = vmatpush3.bf16.msra.mxu1 %v4413_v61 }
 0x325   : > { %3926 = vmatprep.subr.bf16.mxu1 %v4414_v27 }
 0x326   : > { %3173 = vmatpush1.bf16.msra.mxu0 %v4396_v22 }
 0x327   : > { %3174 = vmatprep.subr.bf16.mxu0 %v4401_v42 }
 0x328   : > { %3927 = vmatpush3.bf16.msra.mxu1 %v4414_v27 }
 0x329   : > { %2865 = vmatmul.mubr.bf16.gmra.mxu0 %v2714_v28  ;;  %3928 = vmatprep.subr.bf16.mxu1 %v4415_v54 }
 0x32a   : > { %3042 = vmatmul.mubr.bf16.gmra.mxu1 %v2891_v1  ;;  %3175 = vmatpush1.bf16.msra.mxu0 %v4399_v21 }
 0x32b   : > { %3198 = vmatprep.mubr.bf16.mxu0 %v5524_v18  ;;  %3176 = vmatprep.subr.bf16.mxu0 %v4404_v10 }
 0x32c   : > { %3929 = vmatpush3.bf16.msra.mxu1 %v4415_v54 }
 0x32d   : > { %3930 = vmatprep.subr.bf16.mxu1 %v4416_v32 }
 0x32e   : > { %3177 = vmatpush1.bf16.msra.mxu0 %v4402_v35 }
 0x32f   : > { %3178 = vmatprep.subr.bf16.mxu0 %v4407_v0 }
 0x330   : > { %3931 = vmatpush3.bf16.msra.mxu1 %v4416_v32 }
 0x332   : > { %3179 = vmatpush1.bf16.msra.mxu0 %v4405_v57 }
 0x333   : > { %3180 = vmatprep.subr.bf16.mxu0 %v4410_v7 }
 0x336   : > { %3181 = vmatpush1.bf16.msra.mxu0 %v4408_v53 }
 0x339   : > { %3199 = vmatmul.mubr.bf16.vlgmr.msra.gmra.mxu0 %v3066_v23 }
 0x33a   : > { %3208 = vmatprep.mubr.bf16.mxu0 %v5524_v18 }
 0x341   : > { %3209 = vmatmul.mubr.bf16.gmra.mxu0 %v3067_v13 }
 0x342   : > { %3218 = vmatprep.mubr.bf16.mxu0 %v5524_v18  ;;  %v4417_v18 = vld [vmem:[#allocation8 + $0x8] sm:$0xff]  }
 0x343   : > { %3932 = vmatprep.subr.bf16.mxu1 %v4417_v18 }
 0x344   : > { %3933 = vmatpush3.bf16.msra.mxu1 %v4417_v18 }
 0x345   : > { %3934 = vmatprep.subr.bf16.mxu1 %v4418_v16 }
 0x348   : > { %3935 = vmatpush3.bf16.msra.mxu1 %v4418_v16 }
 0x349   : > { %3219 = vmatmul.mubr.bf16.gmra.mxu0 %v3068_v59 }
 0x3b8   : > { %v2538_v44 = vpop.f32.mrf.mxu0 }
 0x3b9   : > { %v2679_v15 = vpop.f32.mrf.mxu1 }
 0x3ba   : > { %v2680_v17 = vadd.f32 %v2679_v15, %v2538_v44  ;;  %v2540_v49 = vpop.f32.mrf.mxu0 }
 0x3bb   : > { %v2681_v25 = vpop.f32.mrf.mxu1 }
 0x3bc   : > { %v2682_v4 = vadd.f32 %v2681_v25, %v2540_v49  ;;  %v2542_v51 = vpop.f32.mrf.mxu0  ;;  %v5526_v49 = vld [vmem:[#allocation19_spill] sm:$0xff] }
 0x3bd   : > { %v2683_v5 = vpop.f32.mrf.mxu1  ;;  %v3243_v25 = vsub.s32 6, %v5526_v49 }
 0x3be   : > { %v2684_v34 = vadd.f32 %v2683_v5, %v2542_v51  ;;  %v2544_v2 = vpop.f32.mrf.mxu0 }
 0x3bf   : > { %v2685_v11 = vpop.f32.mrf.mxu1  ;;  %v3244_v5 = vrot.slane %v5253_v33, %v3243_v25 }
 0x3c0   : > { %v2686_v20 = vadd.f32 %v2685_v11, %v2544_v2  ;;  %v2548_v52 = vpop.f32.mrf.mxu0 }
 0x3c1   : > { %v2689_v45 = vpop.f32.mrf.mxu1 }
 0x3c2   : > { %v2690_v46 = vadd.f32 %v2689_v45, %v2548_v52  ;;  %v2550_v38 = vpop.f32.mrf.mxu0 }
 0x3c3   : > { %v2691_v47 = vpop.f32.mrf.mxu1 }
 0x3c4   : > { %v2552_v56 = vpop.f32.mrf.mxu0 }
 0x3c5   : > { %v2693_v24 = vpop.f32.mrf.mxu1 }
 0x3c6   : > { %v5350_v8 = vadd.f32 %v2693_v24, %v2552_v56  ;;  %v2554_v63 = vpop.f32.mrf.mxu0  ;;  %v2692_v56 = vadd.f32 %v2691_v47, %v2550_v38 }
 0x3c7   : > { %v2695_v12 = vpop.f32.mrf.mxu1 }
 0x3c9   : > { %v2558_v29 = vpop.f32.mrf.mxu0 }
 0x3ca   : > { %v2699_v43 = vpop.f32.mrf.mxu1 }
 0x3cb   : > { %v5352_v39 = vadd.f32 %v2699_v43, %v2558_v29  ;;  %v2560_v30 = vpop.f32.mrf.mxu0 }
 0x3cc   : > { %v2701_v41 = vpop.f32.mrf.mxu1 }
 0x3cd   : > { %v2562_v48 = vpop.f32.mrf.mxu0 }
 0x3ce   : > { %v2703_v22 = vpop.f32.mrf.mxu1 }
 0x3cf   : > { %v2563_v42 = vpop.f32.mrf.mxu0 }
 0x3d0   : > { %v2704_v3 = vpop.f32.mrf.mxu1 }
 0x3d1   : > { %v2696_v3 = vadd.f32 %v2695_v12, %v2554_v63 }
 0x3d9   : > { %v2846_v55 = vpop.f32.mrf.mxu0 }
 0x3da   : > { %v3023_v21 = vpop.f32.mrf.mxu1  ;;  %v2873_v28 = vadd.f32 %v2846_v55, %v2680_v17 }
 0x3db   : > { %v2848_v1 = vpop.f32.mrf.mxu0 }
 0x3dc   : > { %v3025_v10 = vpop.f32.mrf.mxu1  ;;  %v5354_v35 = vadd.f32 %v3023_v21, %v2873_v28  ;;  %v2874_v51 = vadd.f32 %v2848_v1, %v2682_v4 }
 0x3dd   : > { %v2850_v0 = vpop.f32.mrf.mxu0 }
 0x3de   : > { %v3027_v57 = vpop.f32.mrf.mxu1  ;;  %v2875_v7 = vadd.f32 %v2850_v0, %v2684_v34  ;;  %v3239_v34 = vsub.s32 2, %v5526_v49  ;;  %v3051_v11 = vadd.f32 %v3025_v10, %v2874_v51  ;;  %v2702_v10 = vadd.f32 %v2701_v41, %v2560_v30 }
 0x3df   : > { %v2852_v53 = vpop.f32.mrf.mxu0 }
 0x3e0   : > { %v3029_v50 = vpop.f32.mrf.mxu1  ;;  %v5356_v58 = vadd.f32 %v3027_v57, %v2875_v7  ;;  %v2876_v52 = vadd.f32 %v2852_v53, %v2686_v20  ;;  %v3254_v45 = vrot.slane %v3244_v5, %v3239_v34 }
 0x3e1   : > { %v2856_v23 = vpop.f32.mrf.mxu0 }
 0x3e2   : > { %v3033_v40 = vpop.f32.mrf.mxu1  ;;  %v2877_v36 = vadd.f32 %v2856_v23, %v2690_v46  ;;  %v3053_v43 = vadd.f32 %v3029_v50, %v2876_v52 }
 0x3e3   : > { %v2858_v13 = vpop.f32.mrf.mxu0 }
 0x3e4   : > { %v3035_v31 = vpop.f32.mrf.mxu1  ;;  %v5358_v19 = vadd.f32 %v3033_v40, %v2877_v36  ;;  %v2878_v48 = vadd.f32 %v2858_v13, %v2692_v56 }
 0x3e5   : > { %v5360_v59 = vpop.f32.mrf.mxu0 }
 0x3e6   : > { %v5362_v9 = vpop.f32.mrf.mxu1  ;;  %v3055_v28 = vadd.f32 %v3035_v31, %v2878_v48 }
 0x3e7   : > { %v2862_v62 = vpop.f32.mrf.mxu0 }
 0x3e8   : > { %v3039_v61 = vpop.f32.mrf.mxu1  ;;  %v2880_v1 = vadd.f32 %v2862_v62, %v2696_v3 }
 0x3e9   : > { %v5364_v27 = vpop.f32.mrf.mxu0 }
 0x3ea   : > { %v5366_v54 = vpop.f32.mrf.mxu1  ;;  %v3057_v38 = vadd.f32 %v3039_v61, %v2880_v1 }
 0x3eb   : > { %v2868_v32 = vpop.f32.mrf.mxu0 }
 0x3ec   : > { %v3045_v18 = vpop.f32.mrf.mxu1  ;;  %v2882_v47 = vadd.f32 %v2868_v32, %v2702_v10 }
 0x3ed   : > { %v2870_v16 = vpop.f32.mrf.mxu0 }
 0x3ee   : > { %v3047_v44 = vpop.f32.mrf.mxu1  ;;  %v3059_v12 = vadd.f32 %v3045_v18, %v2882_v47 }
 0x3ef   : > { %v2871_v15 = vpop.f32.mrf.mxu0 }
 0x3f0   : > { %v3048_v17 = vpop.f32.mrf.mxu1 }
 0x3f1   : > { %v3240_v17 = vrot.slane %v5253_v33, %v3239_v34  ;;  %v2879_v33 = vadd.f32 %v5360_v59, %v5350_v8 }
 0x3f3   : > { %v3250_v51 = vrot.slane %v3240_v17, %v3239_v34  ;;  %v3056_v3 = vadd.f32 %v5362_v9, %v2879_v33 }
 0x3f9   : > { %v3200_v2 = vpop.f32.mrf.mxu0 }
 0x3fa   : > { %v3227_v18 = vadd.f32 %v3200_v2, %v5354_v35 }
 0x3fb   : > { %v3202_v46 = vpop.f32.mrf.mxu0 }
 0x3fc   : > { %v3228_v24 = vadd.f32 %v3202_v46, %v3051_v11  ;;  %v3255_v52 = vadd.f32 %v3250_v51, %v3227_v18  ;;  %v4511_v46 = vld [vmem:[%s5039_s17] sm:$0x7]  ;;  %s4596_s17 = sshll.u32 %s4703_s15, 4  ;;  %s4597_s17 = int_to_ptr.vmem [resolvable:$false] %s4596_s17 }
 0x3fd   : > { %v3204_v29 = vpop.f32.mrf.mxu0  ;;  %s4598_s8 = scalar_lea.vmem %s4597_s17, 1024  ;;  %p4599_p2 = scmp.lt.s32.totalorder %s5398_s9, %s4597_s17 }
 0x3fe   : > { %v3256_v22 = vadd.f32 %v3254_v45, %v3228_v24  ;;  %v3229_v56 = vadd.f32 %v3204_v29, %v5356_v58  ;;  %p4600_p11 = scmp.lt.s32.totalorder %s4598_s8, %s4592_s25 }
 0x3ff   : > { %v3206_v42 = vpop.f32.mrf.mxu0 }
 0x400   : > { %v3890_v55 = vmul.f32 -1.442695, %v3256_v22  ;;  %v3230_v21 = vadd.f32 %v3206_v42, %v3053_v43  ;;  %v3257_v22 = vadd.f32 %v3250_v51, %v3229_v56  ;;  %p4601_p12 = por %p4600_p11, %p4599_p2 }
 0x401   : > { %v3210_v4 = vpop.f32.mrf.mxu0 }
 0x402   : > { %4467 = vpow2.f32 %v3890_v55  ;;  %v3258_v0 = vadd.f32 %v3254_v45, %v3230_v21  ;;  %v3231_v42 = vadd.f32 %v3210_v4, %v5358_v19  ;;  %p4602_p13 = pnand %p4601_p12, %p4595_p9 }
 0x403   : > { %v3212_v57 = vpop.f32.mrf.mxu0 }
 0x404   : > { %v3891_v20 = vmul.f32 -1.442695, %v3258_v0  ;;  %v3232_v7 = vadd.f32 %v3212_v57, %v3055_v28  ;;  %v3259_v21 = vadd.f32 %v3250_v51, %v3231_v42 }
 0x405   : > { %v3214_v53 = vpop.f32.mrf.mxu0 }
 0x406   : > { %4469 = vpow2.f32 %v3891_v20  ;;  %v3260_v50 = vadd.f32 %v3254_v45, %v3232_v7  ;;  %v3233_v28 = vadd.f32 %v3214_v53, %v3056_v3 }
 0x407   : > { %v3216_v23 = vpop.f32.mrf.mxu0 }
 0x408   : > { %v3892_v40 = vmul.f32 -1.442695, %v3260_v50  ;;  %v3234_v36 = vadd.f32 %v3216_v23, %v3057_v38  ;;  %v3261_v0 = vadd.f32 %v3250_v51, %v3233_v28 }
 0x409   : > { %v3220_v63 = vpop.f32.mrf.mxu0 }
 0x40a   : > { %4471 = vpow2.f32 %v3892_v40  ;;  %v3262_v13 = vadd.f32 %v3254_v45, %v3234_v36 }
 0x40b   : > { %v3222_v31 = vpop.f32.mrf.mxu0 }
 0x40c   : > { %v3893_v62 = vmul.f32 -1.442695, %v3262_v13  ;;  %v3236_v16 = vadd.f32 %v3222_v31, %v3059_v12 }
 0x40d   : > { %v3224_v44 = vpop.f32.mrf.mxu0 }
 0x40e   : > { %4473 = vpow2.f32 %v3893_v62  ;;  %v3264_v30 = vadd.f32 %v3254_v45, %v3236_v16  ;;  %v3268_v45 = vrot.slane %v4511_v46, %v3239_v34  ;;  %v2881_v34 = vadd.f32 %v5364_v27, %v5352_v39 }
 0x40f   : > { %v4468_v41 = vpop.eup %4467  ;;  %v3225_v15 = vpop.f32.mrf.mxu0 }
 0x410   : > { %v3289_v61 = vadd.f32 1.0, %v4468_v41  ;;  %v3894_v32 = vmul.f32 -1.442695, %v3264_v30  ;;  %v3269_v48 = vadd.f32 %v3268_v45, %v3255_v52  ;;  %v3270_v29 = vadd.f32 %v3268_v45, %v3257_v22 }
 0x411   : > { %v3058_v19 = vadd.f32 %v5366_v54, %v2881_v34  ;;  %v3271_v4 = vadd.f32 %v3268_v45, %v3259_v21  ;;  %v3272_v27 = vadd.f32 %v3268_v45, %v3261_v0 }
 0x412   : > { %4475 = vrcp.f32 %v3289_v61 }
 0x413   : > { %v4470_v49 = vpop.eup %4469  ;;  %4477 = vpow2.f32 %v3894_v32  ;;  %v3235_v10 = vadd.f32 %v3220_v63, %v3058_v19 }
 0x414   : > { %v3290_v25 = vadd.f32 1.0, %v4470_v49 }
 0x415   : > { %v3263_v53 = vadd.f32 %v3250_v51, %v3235_v10 }
 0x416   : > { %4479 = vrcp.f32 %v3290_v25 }
 0x417   : > { %v4472_v5 = vpop.eup %4471  ;;  %v3273_v40 = vadd.f32 %v3268_v45, %v3263_v53 }
 0x418   : > { %v3291_v11 = vadd.f32 1.0, %v4472_v5 }
 0x41a   : > { %4481 = vrcp.f32 %v3291_v11 }
 0x41b   : > { %v4474_v24 = vpop.eup %4473 }
 0x41c   : > { %v3292_v43 = vadd.f32 1.0, %v4474_v24 }
 0x41e   : > { %4483 = vrcp.f32 %v3292_v43 }
 0x41f   : > { %v4476_v35 = vpop.eup %4475 }
 0x420   : > { %v4478_v2 = vpop.eup %4477  ;;  %v3304_v55 = vmul.f32 %v4476_v35, %v3269_v48 }
 0x421   : > { %v3293_v58 = vadd.f32 1.0, %v4478_v2 }
 0x422   : > { %v3309_v59 = vadd.f32 %v3304_v55, %v5293_v37 }
 0x423   : > { %v4480_v1 = vpop.eup %4479  ;;  %4485 = vrcp.f32 %v3293_v58 }
 0x424   : > { %v3305_v8 = vmul.f32 %v4480_v1, %v3270_v29  ;;  %v3314_v7 = vmul.f32 0.70710677, %v3309_v59 }
 0x426   : > { %v3310_v57 = vadd.f32 %v3305_v8, %v5302_v26 }
 0x427   : > { %v4482_v9 = vpop.eup %4481 }
 0x428   : > { %v3306_v20 = vmul.f32 %v4482_v9, %v3271_v4  ;;  %v3315_v39 = vmul.f32 0.70710677, %v3310_v57 }
 0x42a   : > { %v3319_v38 = vpack.c.bf16 %v3315_v39, %v3314_v7  ;;  %v3311_v23 = vadd.f32 %v3306_v20, %v5310_v60  ;;  %v3895_v60 = vld [vmem:[%s5456_s5] ss:$0 sm:$0xff] }
 0x42b   : > { %v4484_v47 = vpop.eup %4483 }
 0x42c   : > { %v3307_v50 = vmul.f32 %v4484_v47, %v3272_v27  ;;  %v3316_v36 = vmul.f32 0.70710677, %v3311_v23  ;;  %v3349_v31 = vrot.slane %v3319_v38, 3 }
 0x42e   : > { %v3312_v37 = vadd.f32 %v3307_v50, %v5317_v14 }
 0x430   : > { %v4486_v54 = vpop.eup %4485  ;;  %v3317_v12 = vmul.f32 0.70710677, %v3312_v37 }
 0x431   : > { %v3308_v13 = vmul.f32 %v4486_v54, %v3273_v40 }
 0x432   : > { %v3320_v26 = vpack.c.bf16 %v3317_v12, %v3316_v36 }
 0x433   : > { %v3313_v63 = vadd.f32 %v3308_v13, %v5323_v6 }
 0x434   : > { %v3350_v62 = vrot.slane %v3320_v26, 3 }
 0x435   : > { %v3318_v16 = vmul.f32 0.70710677, %v3313_v63 }
 0x436   : > { %v3351_v44 = vsel %vm3348_vm2, %v3349_v31, %v3350_v62 }
 0x437   : > { %3936 = vmatprep.mubr.bf16.mxu1 %v3351_v44  ;;  %v3321_v30 = vpack.c.bf16 %v3318_v16, %v3318_v16 }
 0x439   : > { %v3352_v41 = vrot.slane %v3321_v30, 3 }
 0x43b   : > { %v3353_v15 = vsel %vm3348_vm2, %v3350_v62, %v3352_v41 }
 0x43c   : > { %3937 = vmatmul.mubr.bf16.vlgmr.msra.gmra.mxu1 %v3353_v15 }
 0x4fc   : > { %v3938_v14 = vpop.f32.mrf.mxu1 }
 0x4fd   : > { %v3447_v61 = vadd.f32 %v3938_v14, %v3895_v60 }
 0x4fe   : > { %v3438_v32 = vpop.f32.mrf.mxu1 }
 0x4ff   : > { %v3455_v17 = vmax.f32 %v3447_v61, 1e-07  ;;  %v3439_v49 = vadd.f32 %v3895_v60, %v3438_v32 }
 0x500   : > { %v3939_v25 = vpop.f32.mrf.mxu1 }
 0x501   : > { %4487 = vlog2.f32 %v3455_v17  ;;  %v3453_v6 = vmax.f32 %v3439_v49, 1e-07  ;;  %v3450_v18 = vadd.f32 %v3939_v25, %v3895_v60 }
 0x502   : > { %v3441_v51 = vpop.f32.mrf.mxu1 }
 0x503   : > { %4489 = vlog2.f32 %v3453_v6  ;;  %v3456_v5 = vmax.f32 %v3450_v18, 1e-07  ;;  %v3442_v11 = vadd.f32 %v3895_v60, %v3441_v51 }
 0x505   : > { %4491 = vlog2.f32 %v3456_v5  ;;  %v3454_v52 = vmax.f32 %v3442_v11, 1e-07 }
 0x507   : > { %4493 = vlog2.f32 %v3454_v52 }
 0x50e   : > { %v4488_v46 = vpop.eup %4487 }
 0x50f   : > { %v3462_v45 = vmul.f32 0.6931472, %v4488_v46 }
 0x510   : > { %v4490_v56 = vpop.eup %4489 }
 0x511   : > { %v3467_v24 = vmul.f32 1.4, %v3462_v45  ;;  %v3458_v33 = vmul.f32 0.6931472, %v4490_v56 }
 0x512   : > { %v4492_v43 = vpop.eup %4491 }
 0x513   : > { %v3473_v48 = vmul.f32 1.442695, %v3467_v24  ;;  %v3465_v22 = vmul.f32 1.4, %v3458_v33  ;;  %v3464_v42 = vmul.f32 0.6931472, %v4492_v43 }
 0x514   : > { %v4494_v35 = vpop.eup %4493 }
 0x515   : > { %4495 = vpow2.f32 %v3473_v48  ;;  %v3469_v2 = vmul.f32 1.442695, %v3465_v22  ;;  %v3468_v3 = vmul.f32 1.4, %v3464_v42  ;;  %v3460_v55 = vmul.f32 0.6931472, %v4494_v35 }
 0x517   : > { %4497 = vpow2.f32 %v3469_v2  ;;  %v3475_v34 = vmul.f32 1.442695, %v3468_v3  ;;  %v3466_v58 = vmul.f32 1.4, %v3460_v55 }
 0x519   : > { %4499 = vpow2.f32 %v3475_v34  ;;  %v3471_v29 = vmul.f32 1.442695, %v3466_v58 }
 0x51b   : > { %4501 = vpow2.f32 %v3471_v29 }
 0x522   : > { %v4496_v21 = vpop.eup %4495 }
 0x523   : > { %3479 = vst [vmem:[%s329_s16 + $0x10] sm:$0xff] %v4496_v21 }
 0x524   : > { %v4498_v28 = vpop.eup %4497 }
 0x525   : > { %3477 = vst [vmem:[%s329_s16] sm:$0xff] %v4498_v28 }
 0x526   : > { %v4500_v1 = vpop.eup %4499 }
 0x527   : > { %3480 = vst [vmem:[%s329_s16 + $0x18] sm:$0xff] %v4500_v1 }
 0x528   : > { %v4502_v8 = vpop.eup %4501 }
 0x529   : > { %3478 = vst [vmem:[%s329_s16 + $0x8] sm:$0xff] %v4502_v8 }
 0x52a   : > { %4605 = shalt.err (!%p4602_p13)
}
 0x52b   : > { %s4606_s18 = scalar_lea.hbm %s5396_s12, 512  ;;  %s4610_s14 = scalar_lea.hbm %s5528_s29, 2048 }
 0x52c   : > { %p4607_p3 = scmp.ne.s32.totalorder %s5396_s12, %s4606_s18  ;;  %p4611_p7 = scmp.lt.s32.totalorder %s5396_s12, %s5528_s29 }
 0x52d   : > { %p4612_p1 = scmp.lt.s32.totalorder %s4610_s14, %s4606_s18 }
 0x52e   : > { %p4608_p10 = pnand %p4607_p3, %p4855_p0 }
 0x52f   : > { %p4613_p4 = por %p4612_p1, %p4611_p7 }
 0x530   : > { %p4609_p5 = pneg %p4608_p10 }
 0x532   : > { %p4614_p8 = pnand %p4613_p4, %p4609_p5 }
 0x534   : > { %4617 = shalt.err (!%p4614_p8)
}
 0x535   : > { %s4704_s6 = smov 128   ;;  %s4705_s28 = smov 8  }
 0x536   : > { %3954 = dma.vmem_to_hbm [thread:$0]  (%p4855_p0), %s5398_s9, 512, %s5396_s12, %s3482_s24, %s4704_s6, %s4704_s6, %s4705_s28  }
 0x537 PF: > { %s5529_s16 = sld [smem:[#allocation14_spill]] }
 0x538   : > { %s5530_s7 = sld [smem:[#allocation13_spill]] }
 0x53d   : > { %p3976_p9 = scmp.ge.s32.totalorder %s5529_s16, 2 }
 0x53e   : > { %s3512_s20 = sand.u32 1, %s5530_s7  }
 0x53f   : > { %p3968_p2 = pnand %p3976_p9, %p4800_p6  ;;  %s3513_s25 = scalar_lea.sflag [#allocation5], %s3512_s20 }
 0x541   : > { %p3969_p11 = pneg %p3968_p2 }
 0x543   : > { %4659 = dma.done.wait (%p3969_p11), %s3513_s25, 512  }
 0x544   : > { %4661 = vsyncadd (%p3969_p11), %s3513_s25, 4294966784  ;;  %s23_s28 = sadd.s32 1, %s5529_s16   ;;  %s5532_s30 = sld [smem:[#allocation16_spill]] }
 0x545   : > { %p20_p12 = scmp.ge.s32.totalorder %s23_s28, 6   ;;  %s5533_s9 = sld [smem:[#allocation18_spill]] }
 0x546   : > { %s5534_s21 = smov %s4668_s22  ;;  %s5535_s22 = smov %s4672_s23 }
 0x547   : > { %s5536_s23 = smov %s4874_s10  ;;  %s5537_s24 = smov %s4684_s26 }
 0x548   : > { %s5538_s25 = smov %s4688_s27  ;;  %22 = sbr.rel (!%p20_p12) target bundleno = 12 (0xc), region = 114 }
 0x54a   : > { %s5539_s26 = smov %s5532_s30 }
 0x54b   : > { %s5540_s27 = smov %s5533_s9 }
 0x54d   :  { %3518 = vsyncpa [#allocation4], 1 }
 0x54e   :  { %3520 = vsyncpa [#allocation4 + $0x1], 1 }
 0x54f   :  { %3521 = vsyncpa [#allocation7], 1 }
 0x550   :  { %3522 = vsyncpa [#allocation5], 1 }
 0x551   :  { %3524 = vsyncpa [#allocation5 + $0x1], 1 }

</bundles_post_ra>
